<compile_context>
chip_gen: v7x
topology: tpu7x:2x2x1
jax: 0.10.0
libtpu: 0.0.40
codegen_flags: <defaults>
</compile_context>

<pallas_src>
import math
from functools import partial

import jax
import jax.numpy as jnp
import numpy as np
from jax.experimental import pallas as pl
from jax.experimental.pallas import tpu as pltpu

F32_MIN = float(np.finfo(np.float32).min)
LN_EPS = 1e-5
BN_EPS = 1e-5
REL_SHIFT_BASE = 1   # constant part of the per-row lane roll used for rel-shift


def _layer_norm(x, g, b):
    mu = jnp.mean(x, axis=-1, keepdims=True)
    var = jnp.mean((x - mu) ** 2, axis=-1, keepdims=True)
    return (x - mu) * jax.lax.rsqrt(var + LN_EPS) * g + b


# ----------------------------------------------------------------------------
# Fused encoder kernel: grid = (B // Bc, num_layers), layer axis innermost.
# Per-layer parameter packing (stacked along a leading layer axis L):
#   vecs (L, 24, D) f32 (rows grouped by phase into 8-sublane tiles):
#     0 ffin_ln_g  1 ffin_ln_b  2 ffin_b2  3 mha_ln_g  4 mha_ln_b  5 bq 6 bk 7 bv
#     8 bo  9 conv_ln_g 10 conv_ln_b 11 dw_b 12 bn_scale 13 bn_off
#    14 ffout_ln_g 15 ffout_ln_b | 16 ffout_b2 17 final_ln_g 18 final_ln_b 19-23 pad
#   ffb  (L, 2, d_ffn) f32 : [ffin_b1, ffout_b1]
#   wqkv (L, D, 3D) bf16   : fused [Wq^T | Wk^T | Wv^T]      (in x out)
#   wo   (L, D, D)  bf16   : Wo^T
#   w1   (L, 2, D, d_ffn), w2 (L, 2, d_ffn, D) bf16 : FF weights (pre-transposed)
#   dww  (L, ks, D) f32    : depthwise conv weights (tap, channel)
#   scal (L*6,) f32 SMEM   : [pw1_w0, pw1_w1, pw1_b0, pw1_b1, pw2_w, pw2_b] / layer
#   posw (dk, Lp)   bf16   : relative-position matmul table (shared)
#   lens (B,) int32 SMEM   : per-utterance valid key length
# ----------------------------------------------------------------------------
def _conformer_kernel(xs_ref, we_ref, evec_ref, posw_ref, vecs_ref, ffb_ref,
                      wqkv_ref, wo_ref, w1_ref, w2_ref, dww_ref, scal_ref,
                      lens_ref, out_ref, ctx_ref, *,
                      n_head, kernel_size, t_len, bc_sz):
    M, D = out_ref.shape                       # M = bc_sz * t_len
    dk = D // n_head
    ks = kernel_size
    pad = (ks - 1) // 2
    inv_sqrt_dk = 1.0 / math.sqrt(dk)
    bf16 = jnp.bfloat16
    f32 = jnp.float32

    l = pl.program_id(1)

    # ---- layer 0 only: fused embedding  Linear(idim->D) + LayerNorm + ReLU ----
    @pl.when(l == 0)
    def _():
        h = jnp.dot(xs_ref[...].astype(bf16), we_ref[...],
                    preferred_element_type=f32)
        h = h + evec_ref[0:1, :]
        h = _layer_norm(h, evec_ref[1:2, :], evec_ref[2:3, :])
        out_ref[...] = jnp.maximum(h, 0.0)     # Dropout: identity (inference)

    def vec(i):
        return vecs_ref[i:i + 1, :]            # (1, D) f32

    def ffn(x_in, ln_g, ln_b, w1, b1, w2, b2):
        h = _layer_norm(x_in, ln_g, ln_b)
        h = jnp.dot(h.astype(bf16), w1, preferred_element_type=f32) + b1
        h = jnp.maximum(h, 0.0)                # ReLU; Dropout: identity
        return jnp.dot(h.astype(bf16), w2, preferred_element_type=f32) + b2

    x = out_ref[...]                           # (M, D) f32 VMEM-resident carry

    # ---- x = x + 0.5 * feed_forward_in(x)
    x = x + 0.5 * ffn(x, vec(0), vec(1), w1_ref[0], ffb_ref[0:1, :],
                      w2_ref[0], vec(2))

    # ---- x = x + self_attn(x, pos_k, mask)
    xl = _layer_norm(x, vec(3), vec(4))
    qkv = jnp.dot(xl.astype(bf16), wqkv_ref[...],
                  preferred_element_type=f32)                  # (M, 3D)
    q = (qkv[:, 0 * D:1 * D] + vec(5)).astype(bf16)
    k = (qkv[:, 1 * D:2 * D] + vec(6)).astype(bf16)
    v = (qkv[:, 2 * D:3 * D] + vec(7)).astype(bf16)
    posw = posw_ref[...]                                       # (dk, Lp) bf16

    b0 = pl.program_id(0) * bc_sz
    keyvalid = []
    for b in range(bc_sz):
        kv_len = lens_ref[b0 + b]                              # SMEM scalar
        keyvalid.append(
            jax.lax.broadcasted_iota(jnp.int32, (1, t_len), 1) < kv_len)

    for h_i in range(n_head):
        lo = h_i * dk
        qh = q[:, lo:lo + dk]
        kh = k[:, lo:lo + dk]
        vh = v[:, lo:lo + dk]
        # relative-position term for every row of this head in one matmul
        P = jnp.dot(qh, posw, preferred_element_type=f32)      # (M, Lp)
        for b in range(bc_sz):                                 # attention per-b
            r0 = b * t_len
            A = jax.lax.dot_general(qh[r0:r0 + t_len], kh[r0:r0 + t_len],
                                    (((1,), (1,)), ((), ())),
                                    preferred_element_type=f32)  # (T, T)
            # Transformer-XL style relative shift: per-row lane rotate (XLU) so
            # Bm[i, j] = q_i . pe_k[clip(i - j, -maxlen, maxlen-1) + maxlen]
            Bm = pltpu.roll(P[r0:r0 + t_len], REL_SHIFT_BASE, axis=1,
                            stride=1, stride_axis=0)[:, :t_len]
            scores = (A + Bm) * inv_sqrt_dk
            scores = jnp.where(keyvalid[b], scores, F32_MIN)
            m = jnp.max(scores, axis=-1, keepdims=True)
            e = jnp.exp(scores - m)
            p = e * pl.reciprocal(jnp.sum(e, axis=-1, keepdims=True),
                                  approx=True)
            p = jnp.where(keyvalid[b], p, 0.0)                 # masked_fill(mask, 0.0)
            ctx_ref[r0:r0 + t_len, lo:lo + dk] = jnp.dot(
                p.astype(bf16), vh[r0:r0 + t_len], preferred_element_type=f32)

    attn = jnp.dot(ctx_ref[...].astype(bf16), wo_ref[...],
                   preferred_element_type=f32) + vec(8)
    x = x + attn

    # ---- x = x + conv(x)
    cl = _layer_norm(x, vec(9), vec(10))
    s = l * 6
    a_ch = cl * scal_ref[s + 0] + scal_ref[s + 2]              # pw_conv_1 chan 0
    g_ch = cl * scal_ref[s + 1] + scal_ref[s + 3]              # pw_conv_1 chan 1
    glu = a_ch * jax.nn.sigmoid(g_ch)                          # GLU
    # depthwise conv over time (non-causal, pad=(ks-1)//2): sublane roll (XLU)
    # + per-row edge masks; correct across the folded-batch boundaries.
    t_idx = jax.lax.broadcasted_iota(jnp.int32, (M, 1), 0) % t_len
    conv = jnp.zeros_like(x) + vec(11)                         # depthwise bias
    for kk in range(ks):                                       # static taps
        off = kk - pad
        w_k = dww_ref[kk:kk + 1, :]
        if off == 0:
            conv = conv + glu * w_k
        else:
            shifted = pltpu.roll(glu, (-off) % M, axis=0)      # row r <- row r+off
            valid = (t_idx + off >= 0) & (t_idx + off < t_len)
            conv = conv + jnp.where(valid, shifted, 0.0) * w_k
    # inference BatchNorm folded into scale/offset; ReLU; pw_conv_2 (1x1)
    conv = conv * vec(12) + vec(13)
    conv = jnp.maximum(conv, 0.0)
    conv = conv * scal_ref[s + 4] + scal_ref[s + 5]
    x = x + conv

    # ---- x = x + 0.5 * feed_forward_out(x)
    x = x + 0.5 * ffn(x, vec(14), vec(15), w1_ref[1], ffb_ref[1:2, :],
                      w2_ref[1], vec(16))

    # ---- out = layer_norm(x); the last layer's write is the kernel output
    out_ref[...] = _layer_norm(x, vec(17), vec(18))


def run_conformer_stack(xs2, lens, we_t, embed_vecs, posw, params, *,
                        n_head, kernel_size, t_len, batch_block):
    BT, idim = xs2.shape
    B = BT // t_len
    D = we_t.shape[1]
    L, NV, _ = params["vecs"].shape
    d_ffn = params["ffb"].shape[2]
    dk = D // n_head
    Lp = posw.shape[1]
    ks = kernel_size
    bc = batch_block
    assert B % bc == 0, "batch_block must divide batch"
    assert t_len % 8 == 0 and D % 128 == 0, "need T % 8 == 0 and D % 128 == 0"
    assert ks % 2 == 1, "kernel_size must be odd (non-causal ConvModule)"
    m_blk = bc * t_len

    kernel = partial(_conformer_kernel, n_head=n_head, kernel_size=ks,
                     t_len=t_len, bc_sz=bc)
    return pl.pallas_call(
        kernel,
        out_shape=jax.ShapeDtypeStruct((BT, D), jnp.float32),
        grid=(B // bc, L),                                     # layers innermost
        in_specs=[
            pl.BlockSpec((m_blk, idim), lambda g, l: (g, 0)),            # xs
            pl.BlockSpec((idim, D), lambda g, l: (0, 0)),                # embed W^T
            pl.BlockSpec((3, D), lambda g, l: (0, 0)),                   # embed vecs
            pl.BlockSpec((dk, Lp), lambda g, l: (0, 0)),                 # posw
            pl.BlockSpec((None, NV, D), lambda g, l: (l, 0, 0)),         # vecs
            pl.BlockSpec((None, 2, d_ffn), lambda g, l: (l, 0, 0)),      # ffb
            pl.BlockSpec((None, D, 3 * D), lambda g, l: (l, 0, 0)),      # wqkv
            pl.BlockSpec((None, D, D), lambda g, l: (l, 0, 0)),          # wo
            pl.BlockSpec((None, 2, D, d_ffn), lambda g, l: (l, 0, 0, 0)),  # w1
            pl.BlockSpec((None, 2, d_ffn, D), lambda g, l: (l, 0, 0, 0)),  # w2
            pl.BlockSpec((None, ks, D), lambda g, l: (l, 0, 0)),         # dww
            pl.BlockSpec(memory_space=pltpu.MemorySpace.SMEM),           # scal (L*6,)
            pl.BlockSpec(memory_space=pltpu.MemorySpace.SMEM),           # lens (B,)
        ],
        # constant block index along the layer axis -> VMEM-resident carry
        out_specs=pl.BlockSpec((m_blk, D), lambda g, l: (g, 0)),
        scratch_shapes=[pltpu.VMEM((m_blk, D), jnp.float32)],            # head ctx
        compiler_params=pltpu.CompilerParams(
            dimension_semantics=("parallel", "arbitrary"),
            vmem_limit_bytes=32 * 1024 * 1024,   # ample; stays within v7x VMEM
        ),
    )(xs2, we_t, embed_vecs, posw, params["vecs"], params["ffb"],
      params["wqkv"], params["wo"], params["w1"], params["w2"],
      params["dww"], params["scal"], lens)


# ----------------------------------------------------------------------------
# Relative positional encoding folded into a single matmul weight.
# After the in-kernel per-row roll by (REL_SHIFT_BASE + i), score position
# (i, j) reads column (j - i - REL_SHIFT_BASE) mod Lp of q_h @ posw; that
# column is set to pe_k[clip(i - j, -maxlen, maxlen - 1) + maxlen].
# ----------------------------------------------------------------------------
def build_rel_pos_weights(pe_k_table, T, maxlen):
    dk = pe_k_table.shape[1]
    Lp = 128 * pl.cdiv(2 * T - 1, 128)                 # lane-dense, >= 2T-1
    assert Lp >= 2 * T - 1
    deltas = jnp.arange(-(T - 1), T)                   # delta = j - i
    cols = jnp.mod(deltas - REL_SHIFT_BASE, Lp)
    emb_idx = jnp.clip(-deltas, -maxlen, maxlen - 1) + maxlen   # rel = i - j
    table = jnp.zeros((Lp, dk), jnp.float32).at[cols].set(pe_k_table[emb_idx])
    return table.T.astype(jnp.bfloat16)                # (dk, Lp)


# ----------------------------------------------------------------------------
# Deterministic parameter construction (synthetic weights, not a checkpoint).
# ----------------------------------------------------------------------------
def init_layer_params(key, d_model, d_ffn, kernel_size):
    D = d_model
    keys = iter(jax.random.split(key, 64))

    def rn(shape, scale=0.1):
        return scale * jax.random.normal(next(keys), shape, jnp.float32)

    ones = jnp.ones((D,), jnp.float32)
    zeros = jnp.zeros((D,), jnp.float32)
    # BatchNorm1d (inference): fresh running stats, folded into scale/offset
    bn_g, bn_b = ones + rn((D,)), rn((D,))
    bn_rmean, bn_rvar = zeros, ones
    bn_scale = bn_g * jax.lax.rsqrt(bn_rvar + BN_EPS)
    bn_off = bn_b - bn_rmean * bn_scale
    vec_rows = [
        ones + rn((D,)), rn((D,)),                 # 0,1  ff_in LN gamma, beta
        rn((D,)),                                  # 2    ff_in Linear2 bias
        ones + rn((D,)), rn((D,)),                 # 3,4  mha LN gamma, beta
        rn((D,)), rn((D,)), rn((D,)),              # 5-7  bq, bk, bv
        rn((D,)),                                  # 8    bo
        ones + rn((D,)), rn((D,)),                 # 9,10 conv LN gamma, beta
        rn((D,)),                                  # 11   depthwise conv bias
        bn_scale, bn_off,                          # 12,13 folded BatchNorm
        ones + rn((D,)), rn((D,)),                 # 14,15 ff_out LN gamma, beta
        rn((D,)),                                  # 16   ff_out Linear2 bias
        ones + rn((D,)), rn((D,)),                 # 17,18 final LN gamma, beta
    ] + [zeros] * 5                                # 19-23 pad -> 3 sublane tiles
    return {
        "vecs": jnp.stack(vec_rows, axis=0),                                # (24, D)
        "ffb": jnp.stack([rn((d_ffn,)), rn((d_ffn,))], axis=0),             # (2, d_ffn)
        "wqkv": jnp.concatenate([rn((D, D)), rn((D, D)), rn((D, D))],
                                axis=1).astype(jnp.bfloat16),               # (D, 3D)
        "wo": rn((D, D)).astype(jnp.bfloat16),                              # (D, D)
        "w1": jnp.stack([rn((D, d_ffn)), rn((D, d_ffn))], 0).astype(jnp.bfloat16),
        "w2": jnp.stack([rn((d_ffn, D)), rn((d_ffn, D))], 0).astype(jnp.bfloat16),
        "dww": rn((kernel_size, D)),                                        # (ks, D)
        "scal": jnp.array([1.0, 1.0, 0.0, 0.0, 1.0, 0.0], jnp.float32) + rn((6,)),
    }


def stack_layer_params(layer_params):
    stacked = {k: jnp.stack([p[k] for p in layer_params], axis=0)
               for k in layer_params[0]}
    stacked["scal"] = stacked["scal"].reshape(-1)      # flat 1-D SMEM (L*6,)
    return stacked


def conformer_encoder(xs, lens, embed_we_t, embed_vecs, pe_k_table,
                      stacked_params, n_head, kernel_size, maxlen,
                      batch_block=None):
    B, T, idim = xs.shape
    D = embed_we_t.shape[1]
    if batch_block is None:
        # Fold the whole (small) batch per block so each layer's weights are
        # streamed once; keep >= 2 parallel grid steps for megacore when B >= 4.
        batch_block = B // 2 if (B >= 4 and B % 2 == 0) else B
    posw = build_rel_pos_weights(pe_k_table, T, maxlen)        # plain-JAX glue
    out2 = run_conformer_stack(
        xs.reshape(B * T, idim), lens.astype(jnp.int32), embed_we_t,
        embed_vecs, posw, stacked_params, n_head=n_head,
        kernel_size=kernel_size, t_len=T, batch_block=batch_block)
    x = out2.reshape(B, T, D)
    # (batch, time1, time2) mask for API parity with the torch module
    j = jnp.arange(T)
    masks = jnp.broadcast_to(j[None, None, :] < lens[:, None, None],
                             (B, T, T)).astype(jnp.int32)
    return x, masks


if __name__ == "__main__":
    # small config consistent with the module; D=128 keeps blocks lane-dense.
    B, T, idim = 2, 8, 16
    D, H, d_ffn, ks, num_blocks = 128, 4, 256, 5, 2
    maxlen = 16
    dk = D // H

    key = jax.random.PRNGKey(0)
    k_in, k_emb, k_pe, *k_layers = jax.random.split(key, 3 + num_blocks)

    xs = jax.random.normal(k_in, (B, T, idim), jnp.float32)
    lens = jnp.array([T, T - 2], jnp.int32)        # per-utterance valid lengths

    # embed params (Linear weight pre-transposed to (idim, D), bf16 for the MXU)
    ke = iter(jax.random.split(k_emb, 8))
    embed_we_t = (0.1 * jax.random.normal(next(ke), (idim, D), jnp.float32)
                  ).astype(jnp.bfloat16)
    embed_vecs = jnp.stack([
        0.1 * jax.random.normal(next(ke), (D,), jnp.float32),        # bias
        1.0 + 0.1 * jax.random.normal(next(ke), (D,), jnp.float32),  # LN gamma
        0.1 * jax.random.normal(next(ke), (D,), jnp.float32),        # LN beta
    ], axis=0)

    # RelativePositionalEncoding.pe_k embedding table (2*maxlen, d_k)
    pe_k_table = 0.1 * jax.random.normal(k_pe, (2 * maxlen, dk), jnp.float32)

    stacked = stack_layer_params(
        [init_layer_params(k, D, d_ffn, ks) for k in k_layers])

    out_x, out_mask = conformer_encoder(
        xs, lens, embed_we_t, embed_vecs, pe_k_table, stacked,
        n_head=H, kernel_size=ks, maxlen=maxlen)
    jax.block_until_ready((out_x, out_mask))
    assert out_x.shape == (B, T, D)
    assert out_mask.shape == (B, T, T)
    print("KERNEL_OK")
</pallas_src>

<mosaic_0001>
module attributes {stable_mosaic.version = 11 : i64} {
  func.func @_conformer_kernel(%arg0: i32, %arg1: i32, %arg2: memref<16x16xf32, #tpu.memory_space<vmem>>, %arg3: memref<16x128xbf16, #tpu.memory_space<vmem>>, %arg4: memref<3x128xf32, #tpu.memory_space<vmem>>, %arg5: memref<32x128xbf16, #tpu.memory_space<vmem>>, %arg6: memref<1x24x128xf32, #tpu.memory_space<vmem>>, %arg7: memref<1x2x256xf32, #tpu.memory_space<vmem>>, %arg8: memref<1x128x384xbf16, #tpu.memory_space<vmem>>, %arg9: memref<1x128x128xbf16, #tpu.memory_space<vmem>>, %arg10: memref<1x2x128x256xbf16, #tpu.memory_space<vmem>>, %arg11: memref<1x2x256x128xbf16, #tpu.memory_space<vmem>>, %arg12: memref<1x5x128xf32, #tpu.memory_space<vmem>>, %arg13: memref<12xf32, #tpu.memory_space<smem>>, %arg14: memref<2xi32, #tpu.memory_space<smem>>, %arg15: memref<16x128xf32, #tpu.memory_space<vmem>>, %arg16: memref<16x128xf32, #tpu.memory_space<vmem>>) attributes {dimension_semantics = [#tpu.dimension_semantics<parallel>, #tpu.dimension_semantics<arbitrary>], iteration_bounds = array<i64: 1, 2>, scalar_prefetch = 0 : i64, scratch_operands = 1 : i64, tpu.core_type = #tpu.core_type<tc>, window_params = [{transform_indices = @transform_0, window_bounds = array<i64: 16, 16>}, {pipeline_mode = #tpu.pipeline_mode<synchronous>, transform_indices = @transform_1, window_bounds = array<i64: 16, 128>}, {pipeline_mode = #tpu.pipeline_mode<synchronous>, transform_indices = @transform_2, window_bounds = array<i64: 3, 128>}, {pipeline_mode = #tpu.pipeline_mode<synchronous>, transform_indices = @transform_3, window_bounds = array<i64: 32, 128>}, {transform_indices = @transform_4, window_bounds = array<i64: 1, 24, 128>}, {transform_indices = @transform_5, window_bounds = array<i64: 1, 2, 256>}, {transform_indices = @transform_6, window_bounds = array<i64: 1, 128, 384>}, {transform_indices = @transform_7, window_bounds = array<i64: 1, 128, 128>}, {transform_indices = @transform_8, window_bounds = array<i64: 1, 2, 128, 256>}, {transform_indices = @transform_9, window_bounds = array<i64: 1, 2, 256, 128>}, {transform_indices = @transform_10, window_bounds = array<i64: 1, 5, 128>}, {transform_indices = @transform_11, window_bounds = array<i64: 12>}, {transform_indices = @transform_12, window_bounds = array<i64: 2>}, {transform_indices = @transform_13, window_bounds = array<i64: 16, 128>}]} {
    %c0_i32 = arith.constant 0 : i32
    %0 = arith.cmpi eq, %arg1, %c0_i32 : i32
    %1 = arith.extui %0 : i1 to i32
    %c0_i32_0 = arith.constant 0 : i32
    %2 = arith.cmpi ne, %1, %c0_i32_0 : i32
    scf.if %2 {
      %c0_237 = arith.constant 0 : index
      %c0_238 = arith.constant 0 : index
      %638 = vector.load %arg2[%c0_237, %c0_238] : memref<16x16xf32, #tpu.memory_space<vmem>>, vector<16x16xf32>
      %639 = arith.truncf %638 : vector<16x16xf32> to vector<16x16xbf16>
      %c0_239 = arith.constant 0 : index
      %c0_240 = arith.constant 0 : index
      %640 = vector.load %arg3[%c0_239, %c0_240] : memref<16x128xbf16, #tpu.memory_space<vmem>>, vector<16x128xbf16>
      %cst_241 = arith.constant dense<0.000000e+00> : vector<16x128xf32>
      %641 = tpu.matmul %639, %640, %cst_241 {dimension_numbers = #tpu.dot_dimension_numbers<[1], [0], [0], [1], [0, 0, 1, 1], [], []>} : vector<16x16xbf16>, vector<16x128xbf16>, vector<16x128xf32> -> vector<16x128xf32>
      %c0_242 = arith.constant 0 : index
      %c0_243 = arith.constant 0 : index
      %642 = vector.load %arg4[%c0_242, %c0_243] : memref<3x128xf32, #tpu.memory_space<vmem>>, vector<1x128xf32>
      %643 = vector.broadcast %642 : vector<1x128xf32> to vector<16x128xf32>
      %644 = arith.addf %641, %643 : vector<16x128xf32>
      %c1_244 = arith.constant 1 : index
      %c0_245 = arith.constant 0 : index
      %645 = vector.load %arg4[%c1_244, %c0_245] : memref<3x128xf32, #tpu.memory_space<vmem>>, vector<1x128xf32>
      %c2_246 = arith.constant 2 : index
      %c0_247 = arith.constant 0 : index
      %646 = vector.load %arg4[%c2_246, %c0_247] : memref<3x128xf32, #tpu.memory_space<vmem>>, vector<1x128xf32>
      %cst_248 = arith.constant dense<0.000000e+00> : vector<16xf32>
      %647 = vector.multi_reduction <add>, %644, %cst_248 [1] : vector<16x128xf32> to vector<16xf32>
      %648 = vector.shape_cast %647 : vector<16xf32> to vector<16x1xf32>
      %cst_249 = arith.constant 1.280000e+02 : f32
      %649 = vector.broadcast %cst_249 : f32 to vector<16x1xf32>
      %650 = arith.divf %648, %649 : vector<16x1xf32>
      %651 = vector.broadcast %650 : vector<16x1xf32> to vector<16x128xf32>
      %652 = arith.subf %644, %651 : vector<16x128xf32>
      %653 = arith.mulf %652, %652 : vector<16x128xf32>
      %cst_250 = arith.constant dense<0.000000e+00> : vector<16xf32>
      %654 = vector.multi_reduction <add>, %653, %cst_250 [1] : vector<16x128xf32> to vector<16xf32>
      %655 = vector.shape_cast %654 : vector<16xf32> to vector<16x1xf32>
      %cst_251 = arith.constant 1.280000e+02 : f32
      %656 = vector.broadcast %cst_251 : f32 to vector<16x1xf32>
      %657 = arith.divf %655, %656 : vector<16x1xf32>
      %658 = vector.broadcast %650 : vector<16x1xf32> to vector<16x128xf32>
      %659 = arith.subf %644, %658 : vector<16x128xf32>
      %cst_252 = arith.constant 9.99999974E-6 : f32
      %660 = vector.broadcast %cst_252 : f32 to vector<16x1xf32>
      %661 = arith.addf %657, %660 : vector<16x1xf32>
      %662 = math.rsqrt %661 : vector<16x1xf32>
      %663 = vector.broadcast %662 : vector<16x1xf32> to vector<16x128xf32>
      %664 = arith.mulf %659, %663 : vector<16x128xf32>
      %665 = vector.broadcast %645 : vector<1x128xf32> to vector<16x128xf32>
      %666 = arith.mulf %664, %665 : vector<16x128xf32>
      %667 = vector.broadcast %646 : vector<1x128xf32> to vector<16x128xf32>
      %668 = arith.addf %666, %667 : vector<16x128xf32>
      %cst_253 = arith.constant 0.000000e+00 : f32
      %669 = vector.broadcast %cst_253 : f32 to vector<16x128xf32>
      %670 = arith.maximumf %668, %669 : vector<16x128xf32>
      %c0_254 = arith.constant 0 : index
      %c0_255 = arith.constant 0 : index
      %671 = vector.load %arg15[%c0_254, %c0_255] : memref<16x128xf32, #tpu.memory_space<vmem>>, vector<16x128xf32>
      tpu.vector_store %arg15[%c0_254, %c0_255], %670 {strides = array<i32>} : memref<16x128xf32, #tpu.memory_space<vmem>>, vector<16x128xf32>,
    } else {
    }
    %c0 = arith.constant 0 : index
    %c0_1 = arith.constant 0 : index
    %3 = vector.load %arg15[%c0, %c0_1] : memref<16x128xf32, #tpu.memory_space<vmem>>, vector<16x128xf32>
    %c0_2 = arith.constant 0 : index
    %c0_3 = arith.constant 0 : index
    %c0_4 = arith.constant 0 : index
    %4 = vector.load %arg6[%c0_2, %c0_3, %c0_4] : memref<1x24x128xf32, #tpu.memory_space<vmem>>, vector<1x1x128xf32>
    %5 = vector.shape_cast %4 : vector<1x1x128xf32> to vector<1x128xf32>
    %c0_5 = arith.constant 0 : index
    %c1 = arith.constant 1 : index
    %c0_6 = arith.constant 0 : index
    %6 = vector.load %arg6[%c0_5, %c1, %c0_6] : memref<1x24x128xf32, #tpu.memory_space<vmem>>, vector<1x1x128xf32>
    %7 = vector.shape_cast %6 : vector<1x1x128xf32> to vector<1x128xf32>
    %c0_7 = arith.constant 0 : index
    %c0_8 = arith.constant 0 : index
    %c0_9 = arith.constant 0 : index
    %c0_10 = arith.constant 0 : index
    %8 = vector.load %arg10[%c0_7, %c0_8, %c0_9, %c0_10] : memref<1x2x128x256xbf16, #tpu.memory_space<vmem>>, vector<1x1x128x256xbf16>
    %9 = vector.shape_cast %8 : vector<1x1x128x256xbf16> to vector<128x256xbf16>
    %c0_11 = arith.constant 0 : index
    %c0_12 = arith.constant 0 : index
    %c0_13 = arith.constant 0 : index
    %10 = vector.load %arg7[%c0_11, %c0_12, %c0_13] : memref<1x2x256xf32, #tpu.memory_space<vmem>>, vector<1x1x256xf32>
    %11 = vector.shape_cast %10 : vector<1x1x256xf32> to vector<1x256xf32>
    %c0_14 = arith.constant 0 : index
    %c0_15 = arith.constant 0 : index
    %c0_16 = arith.constant 0 : index
    %c0_17 = arith.constant 0 : index
    %12 = vector.load %arg11[%c0_14, %c0_15, %c0_16, %c0_17] : memref<1x2x256x128xbf16, #tpu.memory_space<vmem>>, vector<1x1x256x128xbf16>
    %13 = vector.shape_cast %12 : vector<1x1x256x128xbf16> to vector<256x128xbf16>
    %c0_18 = arith.constant 0 : index
    %c2 = arith.constant 2 : index
    %c0_19 = arith.constant 0 : index
    %14 = vector.load %arg6[%c0_18, %c2, %c0_19] : memref<1x24x128xf32, #tpu.memory_space<vmem>>, vector<1x1x128xf32>
    %15 = vector.shape_cast %14 : vector<1x1x128xf32> to vector<1x128xf32>
    %cst = arith.constant dense<0.000000e+00> : vector<16xf32>
    %16 = vector.multi_reduction <add>, %3, %cst [1] : vector<16x128xf32> to vector<16xf32>
    %17 = vector.shape_cast %16 : vector<16xf32> to vector<16x1xf32>
    %cst_20 = arith.constant 1.280000e+02 : f32
    %18 = vector.broadcast %cst_20 : f32 to vector<16x1xf32>
    %19 = arith.divf %17, %18 : vector<16x1xf32>
    %20 = vector.broadcast %19 : vector<16x1xf32> to vector<16x128xf32>
    %21 = arith.subf %3, %20 : vector<16x128xf32>
    %22 = arith.mulf %21, %21 : vector<16x128xf32>
    %cst_21 = arith.constant dense<0.000000e+00> : vector<16xf32>
    %23 = vector.multi_reduction <add>, %22, %cst_21 [1] : vector<16x128xf32> to vector<16xf32>
    %24 = vector.shape_cast %23 : vector<16xf32> to vector<16x1xf32>
    %cst_22 = arith.constant 1.280000e+02 : f32
    %25 = vector.broadcast %cst_22 : f32 to vector<16x1xf32>
    %26 = arith.divf %24, %25 : vector<16x1xf32>
    %27 = vector.broadcast %19 : vector<16x1xf32> to vector<16x128xf32>
    %28 = arith.subf %3, %27 : vector<16x128xf32>
    %cst_23 = arith.constant 9.99999974E-6 : f32
    %29 = vector.broadcast %cst_23 : f32 to vector<16x1xf32>
    %30 = arith.addf %26, %29 : vector<16x1xf32>
    %31 = math.rsqrt %30 : vector<16x1xf32>
    %32 = vector.broadcast %31 : vector<16x1xf32> to vector<16x128xf32>
    %33 = arith.mulf %28, %32 : vector<16x128xf32>
    %34 = vector.broadcast %5 : vector<1x128xf32> to vector<16x128xf32>
    %35 = arith.mulf %33, %34 : vector<16x128xf32>
    %36 = vector.broadcast %7 : vector<1x128xf32> to vector<16x128xf32>
    %37 = arith.addf %35, %36 : vector<16x128xf32>
    %38 = arith.truncf %37 : vector<16x128xf32> to vector<16x128xbf16>
    %cst_24 = arith.constant dense<0.000000e+00> : vector<16x256xf32>
    %39 = tpu.matmul %38, %9, %cst_24 {dimension_numbers = #tpu.dot_dimension_numbers<[1], [0], [0], [1], [0, 0, 1, 1], [], []>} : vector<16x128xbf16>, vector<128x256xbf16>, vector<16x256xf32> -> vector<16x256xf32>
    %40 = vector.broadcast %11 : vector<1x256xf32> to vector<16x256xf32>
    %41 = arith.addf %39, %40 : vector<16x256xf32>
    %cst_25 = arith.constant 0.000000e+00 : f32
    %42 = vector.broadcast %cst_25 : f32 to vector<16x256xf32>
    %43 = arith.maximumf %41, %42 : vector<16x256xf32>
    %44 = arith.truncf %43 : vector<16x256xf32> to vector<16x256xbf16>
    %cst_26 = arith.constant dense<0.000000e+00> : vector<16x128xf32>
    %45 = tpu.matmul %44, %13, %cst_26 {dimension_numbers = #tpu.dot_dimension_numbers<[1], [0], [0], [1], [0, 0, 1, 1], [], []>} : vector<16x256xbf16>, vector<256x128xbf16>, vector<16x128xf32> -> vector<16x128xf32>
    %46 = vector.broadcast %15 : vector<1x128xf32> to vector<16x128xf32>
    %47 = arith.addf %45, %46 : vector<16x128xf32>
    %cst_27 = arith.constant 5.000000e-01 : f32
    %48 = vector.broadcast %cst_27 : f32 to vector<16x128xf32>
    %49 = arith.mulf %48, %47 : vector<16x128xf32>
    %50 = arith.addf %3, %49 : vector<16x128xf32>
    %c0_28 = arith.constant 0 : index
    %c3 = arith.constant 3 : index
    %c0_29 = arith.constant 0 : index
    %51 = vector.load %arg6[%c0_28, %c3, %c0_29] : memref<1x24x128xf32, #tpu.memory_space<vmem>>, vector<1x1x128xf32>
    %52 = vector.shape_cast %51 : vector<1x1x128xf32> to vector<1x128xf32>
    %c0_30 = arith.constant 0 : index
    %c4 = arith.constant 4 : index
    %c0_31 = arith.constant 0 : index
    %53 = vector.load %arg6[%c0_30, %c4, %c0_31] : memref<1x24x128xf32, #tpu.memory_space<vmem>>, vector<1x1x128xf32>
    %54 = vector.shape_cast %53 : vector<1x1x128xf32> to vector<1x128xf32>
    %cst_32 = arith.constant dense<0.000000e+00> : vector<16xf32>
    %55 = vector.multi_reduction <add>, %50, %cst_32 [1] : vector<16x128xf32> to vector<16xf32>
    %56 = vector.shape_cast %55 : vector<16xf32> to vector<16x1xf32>
    %cst_33 = arith.constant 1.280000e+02 : f32
    %57 = vector.broadcast %cst_33 : f32 to vector<16x1xf32>
    %58 = arith.divf %56, %57 : vector<16x1xf32>
    %59 = vector.broadcast %58 : vector<16x1xf32> to vector<16x128xf32>
    %60 = arith.subf %50, %59 : vector<16x128xf32>
    %61 = arith.mulf %60, %60 : vector<16x128xf32>
    %cst_34 = arith.constant dense<0.000000e+00> : vector<16xf32>
    %62 = vector.multi_reduction <add>, %61, %cst_34 [1] : vector<16x128xf32> to vector<16xf32>
    %63 = vector.shape_cast %62 : vector<16xf32> to vector<16x1xf32>
    %cst_35 = arith.constant 1.280000e+02 : f32
    %64 = vector.broadcast %cst_35 : f32 to vector<16x1xf32>
    %65 = arith.divf %63, %64 : vector<16x1xf32>
    %66 = vector.broadcast %58 : vector<16x1xf32> to vector<16x128xf32>
    %67 = arith.subf %50, %66 : vector<16x128xf32>
    %cst_36 = arith.constant 9.99999974E-6 : f32
    %68 = vector.broadcast %cst_36 : f32 to vector<16x1xf32>
    %69 = arith.addf %65, %68 : vector<16x1xf32>
    %70 = math.rsqrt %69 : vector<16x1xf32>
    %71 = vector.broadcast %70 : vector<16x1xf32> to vector<16x128xf32>
    %72 = arith.mulf %67, %71 : vector<16x128xf32>
    %73 = vector.broadcast %52 : vector<1x128xf32> to vector<16x128xf32>
    %74 = arith.mulf %72, %73 : vector<16x128xf32>
    %75 = vector.broadcast %54 : vector<1x128xf32> to vector<16x128xf32>
    %76 = arith.addf %74, %75 : vector<16x128xf32>
    %77 = arith.truncf %76 : vector<16x128xf32> to vector<16x128xbf16>
    %c0_37 = arith.constant 0 : index
    %c0_38 = arith.constant 0 : index
    %c0_39 = arith.constant 0 : index
    %78 = vector.load %arg8[%c0_37, %c0_38, %c0_39] : memref<1x128x384xbf16, #tpu.memory_space<vmem>>, vector<1x128x384xbf16>
    %79 = vector.shape_cast %78 : vector<1x128x384xbf16> to vector<128x384xbf16>
    %cst_40 = arith.constant dense<0.000000e+00> : vector<16x384xf32>
    %80 = tpu.matmul %77, %79, %cst_40 {dimension_numbers = #tpu.dot_dimension_numbers<[1], [0], [0], [1], [0, 0, 1, 1], [], []>} : vector<16x128xbf16>, vector<128x384xbf16>, vector<16x384xf32> -> vector<16x384xf32>
    %81 = vector.extract_strided_slice %80 {offsets = [0, 0], sizes = [16, 128], strides = [1, 1]} : vector<16x384xf32> to vector<16x128xf32>
    %c0_41 = arith.constant 0 : index
    %c5 = arith.constant 5 : index
    %c0_42 = arith.constant 0 : index
    %82 = vector.load %arg6[%c0_41, %c5, %c0_42] : memref<1x24x128xf32, #tpu.memory_space<vmem>>, vector<1x1x128xf32>
    %83 = vector.shape_cast %82 : vector<1x1x128xf32> to vector<1x128xf32>
    %84 = vector.broadcast %83 : vector<1x128xf32> to vector<16x128xf32>
    %85 = arith.addf %81, %84 : vector<16x128xf32>
    %86 = arith.truncf %85 : vector<16x128xf32> to vector<16x128xbf16>
    %87 = vector.extract_strided_slice %80 {offsets = [0, 128], sizes = [16, 128], strides = [1, 1]} : vector<16x384xf32> to vector<16x128xf32>
    %c0_43 = arith.constant 0 : index
    %c6 = arith.constant 6 : index
    %c0_44 = arith.constant 0 : index
    %88 = vector.load %arg6[%c0_43, %c6, %c0_44] : memref<1x24x128xf32, #tpu.memory_space<vmem>>, vector<1x1x128xf32>
    %89 = vector.shape_cast %88 : vector<1x1x128xf32> to vector<1x128xf32>
    %90 = vector.broadcast %89 : vector<1x128xf32> to vector<16x128xf32>
    %91 = arith.addf %87, %90 : vector<16x128xf32>
    %92 = arith.truncf %91 : vector<16x128xf32> to vector<16x128xbf16>
    %93 = vector.extract_strided_slice %80 {offsets = [0, 256], sizes = [16, 128], strides = [1, 1]} : vector<16x384xf32> to vector<16x128xf32>
    %c0_45 = arith.constant 0 : index
    %c7 = arith.constant 7 : index
    %c0_46 = arith.constant 0 : index
    %94 = vector.load %arg6[%c0_45, %c7, %c0_46] : memref<1x24x128xf32, #tpu.memory_space<vmem>>, vector<1x1x128xf32>
    %95 = vector.shape_cast %94 : vector<1x1x128xf32> to vector<1x128xf32>
    %96 = vector.broadcast %95 : vector<1x128xf32> to vector<16x128xf32>
    %97 = arith.addf %93, %96 : vector<16x128xf32>
    %98 = arith.truncf %97 : vector<16x128xf32> to vector<16x128xbf16>
    %c0_47 = arith.constant 0 : index
    %c0_48 = arith.constant 0 : index
    %99 = vector.load %arg5[%c0_47, %c0_48] : memref<32x128xbf16, #tpu.memory_space<vmem>>, vector<32x128xbf16>
    %c2_i32 = arith.constant 2 : i32
    %100 = arith.muli %arg0, %c2_i32 : i32
    %c0_i32_49 = arith.constant 0 : i32
    %101 = arith.addi %100, %c0_i32_49 : i32
    %102 = arith.index_cast %101 : i32 to index
    %103 = memref.load %arg14[%102] : memref<2xi32, #tpu.memory_space<smem>>
    %104 = tpu.iota {dimensions = array<i32: 1>} : vector<1x8xi32>
    %105 = vector.broadcast %103 : i32 to vector<1x8xi32>
    %106 = arith.cmpi slt, %104, %105 : vector<1x8xi32>
    %c1_i32 = arith.constant 1 : i32
    %107 = arith.addi %100, %c1_i32 : i32
    %108 = arith.index_cast %107 : i32 to index
    %109 = memref.load %arg14[%108] : memref<2xi32, #tpu.memory_space<smem>>
    %110 = tpu.iota {dimensions = array<i32: 1>} : vector<1x8xi32>
    %111 = vector.broadcast %109 : i32 to vector<1x8xi32>
    %112 = arith.cmpi slt, %110, %111 : vector<1x8xi32>
    %113 = vector.extract_strided_slice %86 {offsets = [0, 0], sizes = [16, 32], strides = [1, 1]} : vector<16x128xbf16> to vector<16x32xbf16>
    %114 = vector.extract_strided_slice %92 {offsets = [0, 0], sizes = [16, 32], strides = [1, 1]} : vector<16x128xbf16> to vector<16x32xbf16>
    %115 = vector.extract_strided_slice %98 {offsets = [0, 0], sizes = [16, 32], strides = [1, 1]} : vector<16x128xbf16> to vector<16x32xbf16>
    %cst_50 = arith.constant dense<0.000000e+00> : vector<16x128xf32>
    %116 = tpu.matmul %113, %99, %cst_50 {dimension_numbers = #tpu.dot_dimension_numbers<[1], [0], [0], [1], [0, 0, 1, 1], [], []>} : vector<16x32xbf16>, vector<32x128xbf16>, vector<16x128xf32> -> vector<16x128xf32>
    %117 = vector.extract_strided_slice %113 {offsets = [0, 0], sizes = [8, 32], strides = [1, 1]} : vector<16x32xbf16> to vector<8x32xbf16>
    %118 = vector.extract_strided_slice %114 {offsets = [0, 0], sizes = [8, 32], strides = [1, 1]} : vector<16x32xbf16> to vector<8x32xbf16>
    %cst_51 = arith.constant dense<0.000000e+00> : vector<8x8xf32>
    %119 = tpu.matmul %117, %118, %cst_51 {dimension_numbers = #tpu.dot_dimension_numbers<[1], [1], [0], [0], [0, 0, 1, 0], [], []>} : vector<8x32xbf16>, vector<8x32xbf16>, vector<8x8xf32> -> vector<8x8xf32>
    %120 = vector.extract_strided_slice %116 {offsets = [0, 0], sizes = [8, 128], strides = [1, 1]} : vector<16x128xf32> to vector<8x128xf32>
    %c1_i32_52 = arith.constant 1 : i32
    %121 = tpu.dynamic_rotate %120 by %c1_i32_52 dim 1 {stride = 1 : si32, stride_dimension = 0 : si32} : vector<8x128xf32>, i32 -> vector<8x128xf32>
    %122 = vector.extract_strided_slice %121 {offsets = [0, 0], sizes = [8, 8], strides = [1, 1]} : vector<8x128xf32> to vector<8x8xf32>
    %123 = arith.addf %119, %122 : vector<8x8xf32>
    %cst_53 = arith.constant 0.176776692 : f32
    %124 = vector.broadcast %cst_53 : f32 to vector<8x8xf32>
    %125 = arith.mulf %123, %124 : vector<8x8xf32>
    %cst_54 = arith.constant -3.40282347E+38 : f32
    %126 = vector.shape_cast %106 : vector<1x8xi1> to vector<1x8xi1>
    %127 = vector.broadcast %126 : vector<1x8xi1> to vector<8x8xi1>
    %128 = vector.broadcast %cst_54 : f32 to vector<8x8xf32>
    %129 = arith.select %127, %125, %128 : vector<8x8xi1>, vector<8x8xf32>
    %cst_55 = arith.constant dense<0xFF800000> : vector<8xf32>
    %130 = vector.multi_reduction <maximumf>, %129, %cst_55 [1] : vector<8x8xf32> to vector<8xf32>
    %131 = vector.shape_cast %130 : vector<8xf32> to vector<8x1xf32>
    %132 = vector.broadcast %131 : vector<8x1xf32> to vector<8x8xf32>
    %133 = arith.subf %129, %132 : vector<8x8xf32>
    %134 = math.exp %133 : vector<8x8xf32>
    %cst_56 = arith.constant dense<0.000000e+00> : vector<8xf32>
    %135 = vector.multi_reduction <add>, %134, %cst_56 [1] : vector<8x8xf32> to vector<8xf32>
    %136 = vector.shape_cast %135 : vector<8xf32> to vector<8x1xf32>
    %137 = tpu.reciprocal %136 {approx = true} : vector<8x1xf32> -> vector<8x1xf32>
    %138 = vector.broadcast %137 : vector<8x1xf32> to vector<8x8xf32>
    %139 = arith.mulf %134, %138 : vector<8x8xf32>
    %cst_57 = arith.constant 0.000000e+00 : f32
    %140 = vector.shape_cast %106 : vector<1x8xi1> to vector<1x8xi1>
    %141 = vector.broadcast %140 : vector<1x8xi1> to vector<8x8xi1>
    %142 = vector.broadcast %cst_57 : f32 to vector<8x8xf32>
    %143 = arith.select %141, %139, %142 : vector<8x8xi1>, vector<8x8xf32>
    %144 = arith.truncf %143 : vector<8x8xf32> to vector<8x8xbf16>
    %145 = vector.extract_strided_slice %115 {offsets = [0, 0], sizes = [8, 32], strides = [1, 1]} : vector<16x32xbf16> to vector<8x32xbf16>
    %cst_58 = arith.constant dense<0.000000e+00> : vector<8x32xf32>
    %146 = tpu.matmul %144, %145, %cst_58 {dimension_numbers = #tpu.dot_dimension_numbers<[1], [0], [0], [1], [0, 0, 1, 1], [], []>} : vector<8x8xbf16>, vector<8x32xbf16>, vector<8x32xf32> -> vector<8x32xf32>
    %c0_59 = arith.constant 0 : index
    %c0_60 = arith.constant 0 : index
    %147 = vector.load %arg16[%c0_59, %c0_60] : memref<16x128xf32, #tpu.memory_space<vmem>>, vector<8x32xf32>
    tpu.vector_store %arg16[%c0_59, %c0_60], %146 {strides = array<i32>} : memref<16x128xf32, #tpu.memory_space<vmem>>, vector<8x32xf32>,
    %148 = vector.extract_strided_slice %113 {offsets = [8, 0], sizes = [8, 32], strides = [1, 1]} : vector<16x32xbf16> to vector<8x32xbf16>
    %149 = vector.extract_strided_slice %114 {offsets = [8, 0], sizes = [8, 32], strides = [1, 1]} : vector<16x32xbf16> to vector<8x32xbf16>
    %cst_61 = arith.constant dense<0.000000e+00> : vector<8x8xf32>
    %150 = tpu.matmul %148, %149, %cst_61 {dimension_numbers = #tpu.dot_dimension_numbers<[1], [1], [0], [0], [0, 0, 1, 0], [], []>} : vector<8x32xbf16>, vector<8x32xbf16>, vector<8x8xf32> -> vector<8x8xf32>
    %151 = vector.extract_strided_slice %116 {offsets = [8, 0], sizes = [8, 128], strides = [1, 1]} : vector<16x128xf32> to vector<8x128xf32>
    %c1_i32_62 = arith.constant 1 : i32
    %152 = tpu.dynamic_rotate %151 by %c1_i32_62 dim 1 {stride = 1 : si32, stride_dimension = 0 : si32} : vector<8x128xf32>, i32 -> vector<8x128xf32>
    %153 = vector.extract_strided_slice %152 {offsets = [0, 0], sizes = [8, 8], strides = [1, 1]} : vector<8x128xf32> to vector<8x8xf32>
    %154 = arith.addf %150, %153 : vector<8x8xf32>
    %cst_63 = arith.constant 0.176776692 : f32
    %155 = vector.broadcast %cst_63 : f32 to vector<8x8xf32>
    %156 = arith.mulf %154, %155 : vector<8x8xf32>
    %cst_64 = arith.constant -3.40282347E+38 : f32
    %157 = vector.shape_cast %112 : vector<1x8xi1> to vector<1x8xi1>
    %158 = vector.broadcast %157 : vector<1x8xi1> to vector<8x8xi1>
    %159 = vector.broadcast %cst_64 : f32 to vector<8x8xf32>
    %160 = arith.select %158, %156, %159 : vector<8x8xi1>, vector<8x8xf32>
    %cst_65 = arith.constant dense<0xFF800000> : vector<8xf32>
    %161 = vector.multi_reduction <maximumf>, %160, %cst_65 [1] : vector<8x8xf32> to vector<8xf32>
    %162 = vector.shape_cast %161 : vector<8xf32> to vector<8x1xf32>
    %163 = vector.broadcast %162 : vector<8x1xf32> to vector<8x8xf32>
    %164 = arith.subf %160, %163 : vector<8x8xf32>
    %165 = math.exp %164 : vector<8x8xf32>
    %cst_66 = arith.constant dense<0.000000e+00> : vector<8xf32>
    %166 = vector.multi_reduction <add>, %165, %cst_66 [1] : vector<8x8xf32> to vector<8xf32>
    %167 = vector.shape_cast %166 : vector<8xf32> to vector<8x1xf32>
    %168 = tpu.reciprocal %167 {approx = true} : vector<8x1xf32> -> vector<8x1xf32>
    %169 = vector.broadcast %168 : vector<8x1xf32> to vector<8x8xf32>
    %170 = arith.mulf %165, %169 : vector<8x8xf32>
    %cst_67 = arith.constant 0.000000e+00 : f32
    %171 = vector.shape_cast %112 : vector<1x8xi1> to vector<1x8xi1>
    %172 = vector.broadcast %171 : vector<1x8xi1> to vector<8x8xi1>
    %173 = vector.broadcast %cst_67 : f32 to vector<8x8xf32>
    %174 = arith.select %172, %170, %173 : vector<8x8xi1>, vector<8x8xf32>
    %175 = arith.truncf %174 : vector<8x8xf32> to vector<8x8xbf16>
    %176 = vector.extract_strided_slice %115 {offsets = [8, 0], sizes = [8, 32], strides = [1, 1]} : vector<16x32xbf16> to vector<8x32xbf16>
    %cst_68 = arith.constant dense<0.000000e+00> : vector<8x32xf32>
    %177 = tpu.matmul %175, %176, %cst_68 {dimension_numbers = #tpu.dot_dimension_numbers<[1], [0], [0], [1], [0, 0, 1, 1], [], []>} : vector<8x8xbf16>, vector<8x32xbf16>, vector<8x32xf32> -> vector<8x32xf32>
    %c8 = arith.constant 8 : index
    %c0_69 = arith.constant 0 : index
    %178 = vector.load %arg16[%c8, %c0_69] : memref<16x128xf32, #tpu.memory_space<vmem>>, vector<8x32xf32>
    tpu.vector_store %arg16[%c8, %c0_69], %177 {strides = array<i32>} : memref<16x128xf32, #tpu.memory_space<vmem>>, vector<8x32xf32>,
    %179 = vector.extract_strided_slice %86 {offsets = [0, 32], sizes = [16, 32], strides = [1, 1]} : vector<16x128xbf16> to vector<16x32xbf16>
    %180 = vector.extract_strided_slice %92 {offsets = [0, 32], sizes = [16, 32], strides = [1, 1]} : vector<16x128xbf16> to vector<16x32xbf16>
    %181 = vector.extract_strided_slice %98 {offsets = [0, 32], sizes = [16, 32], strides = [1, 1]} : vector<16x128xbf16> to vector<16x32xbf16>
    %cst_70 = arith.constant dense<0.000000e+00> : vector<16x128xf32>
    %182 = tpu.matmul %179, %99, %cst_70 {dimension_numbers = #tpu.dot_dimension_numbers<[1], [0], [0], [1], [0, 0, 1, 1], [], []>} : vector<16x32xbf16>, vector<32x128xbf16>, vector<16x128xf32> -> vector<16x128xf32>
    %183 = vector.extract_strided_slice %179 {offsets = [0, 0], sizes = [8, 32], strides = [1, 1]} : vector<16x32xbf16> to vector<8x32xbf16>
    %184 = vector.extract_strided_slice %180 {offsets = [0, 0], sizes = [8, 32], strides = [1, 1]} : vector<16x32xbf16> to vector<8x32xbf16>
    %cst_71 = arith.constant dense<0.000000e+00> : vector<8x8xf32>
    %185 = tpu.matmul %183, %184, %cst_71 {dimension_numbers = #tpu.dot_dimension_numbers<[1], [1], [0], [0], [0, 0, 1, 0], [], []>} : vector<8x32xbf16>, vector<8x32xbf16>, vector<8x8xf32> -> vector<8x8xf32>
    %186 = vector.extract_strided_slice %182 {offsets = [0, 0], sizes = [8, 128], strides = [1, 1]} : vector<16x128xf32> to vector<8x128xf32>
    %c1_i32_72 = arith.constant 1 : i32
    %187 = tpu.dynamic_rotate %186 by %c1_i32_72 dim 1 {stride = 1 : si32, stride_dimension = 0 : si32} : vector<8x128xf32>, i32 -> vector<8x128xf32>
    %188 = vector.extract_strided_slice %187 {offsets = [0, 0], sizes = [8, 8], strides = [1, 1]} : vector<8x128xf32> to vector<8x8xf32>
    %189 = arith.addf %185, %188 : vector<8x8xf32>
    %cst_73 = arith.constant 0.176776692 : f32
    %190 = vector.broadcast %cst_73 : f32 to vector<8x8xf32>
    %191 = arith.mulf %189, %190 : vector<8x8xf32>
    %cst_74 = arith.constant -3.40282347E+38 : f32
    %192 = vector.shape_cast %106 : vector<1x8xi1> to vector<1x8xi1>
    %193 = vector.broadcast %192 : vector<1x8xi1> to vector<8x8xi1>
    %194 = vector.broadcast %cst_74 : f32 to vector<8x8xf32>
    %195 = arith.select %193, %191, %194 : vector<8x8xi1>, vector<8x8xf32>
    %cst_75 = arith.constant dense<0xFF800000> : vector<8xf32>
    %196 = vector.multi_reduction <maximumf>, %195, %cst_75 [1] : vector<8x8xf32> to vector<8xf32>
    %197 = vector.shape_cast %196 : vector<8xf32> to vector<8x1xf32>
    %198 = vector.broadcast %197 : vector<8x1xf32> to vector<8x8xf32>
    %199 = arith.subf %195, %198 : vector<8x8xf32>
    %200 = math.exp %199 : vector<8x8xf32>
    %cst_76 = arith.constant dense<0.000000e+00> : vector<8xf32>
    %201 = vector.multi_reduction <add>, %200, %cst_76 [1] : vector<8x8xf32> to vector<8xf32>
    %202 = vector.shape_cast %201 : vector<8xf32> to vector<8x1xf32>
    %203 = tpu.reciprocal %202 {approx = true} : vector<8x1xf32> -> vector<8x1xf32>
    %204 = vector.broadcast %203 : vector<8x1xf32> to vector<8x8xf32>
    %205 = arith.mulf %200, %204 : vector<8x8xf32>
    %cst_77 = arith.constant 0.000000e+00 : f32
    %206 = vector.shape_cast %106 : vector<1x8xi1> to vector<1x8xi1>
    %207 = vector.broadcast %206 : vector<1x8xi1> to vector<8x8xi1>
    %208 = vector.broadcast %cst_77 : f32 to vector<8x8xf32>
    %209 = arith.select %207, %205, %208 : vector<8x8xi1>, vector<8x8xf32>
    %210 = arith.truncf %209 : vector<8x8xf32> to vector<8x8xbf16>
    %211 = vector.extract_strided_slice %181 {offsets = [0, 0], sizes = [8, 32], strides = [1, 1]} : vector<16x32xbf16> to vector<8x32xbf16>
    %cst_78 = arith.constant dense<0.000000e+00> : vector<8x32xf32>
    %212 = tpu.matmul %210, %211, %cst_78 {dimension_numbers = #tpu.dot_dimension_numbers<[1], [0], [0], [1], [0, 0, 1, 1], [], []>} : vector<8x8xbf16>, vector<8x32xbf16>, vector<8x32xf32> -> vector<8x32xf32>
    %c0_79 = arith.constant 0 : index
    %c32 = arith.constant 32 : index
    %213 = vector.load %arg16[%c0_79, %c32] : memref<16x128xf32, #tpu.memory_space<vmem>>, vector<8x32xf32>
    tpu.vector_store %arg16[%c0_79, %c32], %212 {strides = array<i32>} : memref<16x128xf32, #tpu.memory_space<vmem>>, vector<8x32xf32>,
    %214 = vector.extract_strided_slice %179 {offsets = [8, 0], sizes = [8, 32], strides = [1, 1]} : vector<16x32xbf16> to vector<8x32xbf16>
    %215 = vector.extract_strided_slice %180 {offsets = [8, 0], sizes = [8, 32], strides = [1, 1]} : vector<16x32xbf16> to vector<8x32xbf16>
    %cst_80 = arith.constant dense<0.000000e+00> : vector<8x8xf32>
    %216 = tpu.matmul %214, %215, %cst_80 {dimension_numbers = #tpu.dot_dimension_numbers<[1], [1], [0], [0], [0, 0, 1, 0], [], []>} : vector<8x32xbf16>, vector<8x32xbf16>, vector<8x8xf32> -> vector<8x8xf32>
    %217 = vector.extract_strided_slice %182 {offsets = [8, 0], sizes = [8, 128], strides = [1, 1]} : vector<16x128xf32> to vector<8x128xf32>
    %c1_i32_81 = arith.constant 1 : i32
    %218 = tpu.dynamic_rotate %217 by %c1_i32_81 dim 1 {stride = 1 : si32, stride_dimension = 0 : si32} : vector<8x128xf32>, i32 -> vector<8x128xf32>
    %219 = vector.extract_strided_slice %218 {offsets = [0, 0], sizes = [8, 8], strides = [1, 1]} : vector<8x128xf32> to vector<8x8xf32>
    %220 = arith.addf %216, %219 : vector<8x8xf32>
    %cst_82 = arith.constant 0.176776692 : f32
    %221 = vector.broadcast %cst_82 : f32 to vector<8x8xf32>
    %222 = arith.mulf %220, %221 : vector<8x8xf32>
    %cst_83 = arith.constant -3.40282347E+38 : f32
    %223 = vector.shape_cast %112 : vector<1x8xi1> to vector<1x8xi1>
    %224 = vector.broadcast %223 : vector<1x8xi1> to vector<8x8xi1>
    %225 = vector.broadcast %cst_83 : f32 to vector<8x8xf32>
    %226 = arith.select %224, %222, %225 : vector<8x8xi1>, vector<8x8xf32>
    %cst_84 = arith.constant dense<0xFF800000> : vector<8xf32>
    %227 = vector.multi_reduction <maximumf>, %226, %cst_84 [1] : vector<8x8xf32> to vector<8xf32>
    %228 = vector.shape_cast %227 : vector<8xf32> to vector<8x1xf32>
    %229 = vector.broadcast %228 : vector<8x1xf32> to vector<8x8xf32>
    %230 = arith.subf %226, %229 : vector<8x8xf32>
    %231 = math.exp %230 : vector<8x8xf32>
    %cst_85 = arith.constant dense<0.000000e+00> : vector<8xf32>
    %232 = vector.multi_reduction <add>, %231, %cst_85 [1] : vector<8x8xf32> to vector<8xf32>
    %233 = vector.shape_cast %232 : vector<8xf32> to vector<8x1xf32>
    %234 = tpu.reciprocal %233 {approx = true} : vector<8x1xf32> -> vector<8x1xf32>
    %235 = vector.broadcast %234 : vector<8x1xf32> to vector<8x8xf32>
    %236 = arith.mulf %231, %235 : vector<8x8xf32>
    %cst_86 = arith.constant 0.000000e+00 : f32
    %237 = vector.shape_cast %112 : vector<1x8xi1> to vector<1x8xi1>
    %238 = vector.broadcast %237 : vector<1x8xi1> to vector<8x8xi1>
    %239 = vector.broadcast %cst_86 : f32 to vector<8x8xf32>
    %240 = arith.select %238, %236, %239 : vector<8x8xi1>, vector<8x8xf32>
    %241 = arith.truncf %240 : vector<8x8xf32> to vector<8x8xbf16>
    %242 = vector.extract_strided_slice %181 {offsets = [8, 0], sizes = [8, 32], strides = [1, 1]} : vector<16x32xbf16> to vector<8x32xbf16>
    %cst_87 = arith.constant dense<0.000000e+00> : vector<8x32xf32>
    %243 = tpu.matmul %241, %242, %cst_87 {dimension_numbers = #tpu.dot_dimension_numbers<[1], [0], [0], [1], [0, 0, 1, 1], [], []>} : vector<8x8xbf16>, vector<8x32xbf16>, vector<8x32xf32> -> vector<8x32xf32>
    %c8_88 = arith.constant 8 : index
    %c32_89 = arith.constant 32 : index
    %244 = vector.load %arg16[%c8_88, %c32_89] : memref<16x128xf32, #tpu.memory_space<vmem>>, vector<8x32xf32>
    tpu.vector_store %arg16[%c8_88, %c32_89], %243 {strides = array<i32>} : memref<16x128xf32, #tpu.memory_space<vmem>>, vector<8x32xf32>,
    %245 = vector.extract_strided_slice %86 {offsets = [0, 64], sizes = [16, 32], strides = [1, 1]} : vector<16x128xbf16> to vector<16x32xbf16>
    %246 = vector.extract_strided_slice %92 {offsets = [0, 64], sizes = [16, 32], strides = [1, 1]} : vector<16x128xbf16> to vector<16x32xbf16>
    %247 = vector.extract_strided_slice %98 {offsets = [0, 64], sizes = [16, 32], strides = [1, 1]} : vector<16x128xbf16> to vector<16x32xbf16>
    %cst_90 = arith.constant dense<0.000000e+00> : vector<16x128xf32>
    %248 = tpu.matmul %245, %99, %cst_90 {dimension_numbers = #tpu.dot_dimension_numbers<[1], [0], [0], [1], [0, 0, 1, 1], [], []>} : vector<16x32xbf16>, vector<32x128xbf16>, vector<16x128xf32> -> vector<16x128xf32>
    %249 = vector.extract_strided_slice %245 {offsets = [0, 0], sizes = [8, 32], strides = [1, 1]} : vector<16x32xbf16> to vector<8x32xbf16>
    %250 = vector.extract_strided_slice %246 {offsets = [0, 0], sizes = [8, 32], strides = [1, 1]} : vector<16x32xbf16> to vector<8x32xbf16>
    %cst_91 = arith.constant dense<0.000000e+00> : vector<8x8xf32>
    %251 = tpu.matmul %249, %250, %cst_91 {dimension_numbers = #tpu.dot_dimension_numbers<[1], [1], [0], [0], [0, 0, 1, 0], [], []>} : vector<8x32xbf16>, vector<8x32xbf16>, vector<8x8xf32> -> vector<8x8xf32>
    %252 = vector.extract_strided_slice %248 {offsets = [0, 0], sizes = [8, 128], strides = [1, 1]} : vector<16x128xf32> to vector<8x128xf32>
    %c1_i32_92 = arith.constant 1 : i32
    %253 = tpu.dynamic_rotate %252 by %c1_i32_92 dim 1 {stride = 1 : si32, stride_dimension = 0 : si32} : vector<8x128xf32>, i32 -> vector<8x128xf32>
    %254 = vector.extract_strided_slice %253 {offsets = [0, 0], sizes = [8, 8], strides = [1, 1]} : vector<8x128xf32> to vector<8x8xf32>
    %255 = arith.addf %251, %254 : vector<8x8xf32>
    %cst_93 = arith.constant 0.176776692 : f32
    %256 = vector.broadcast %cst_93 : f32 to vector<8x8xf32>
    %257 = arith.mulf %255, %256 : vector<8x8xf32>
    %cst_94 = arith.constant -3.40282347E+38 : f32
    %258 = vector.shape_cast %106 : vector<1x8xi1> to vector<1x8xi1>
    %259 = vector.broadcast %258 : vector<1x8xi1> to vector<8x8xi1>
    %260 = vector.broadcast %cst_94 : f32 to vector<8x8xf32>
    %261 = arith.select %259, %257, %260 : vector<8x8xi1>, vector<8x8xf32>
    %cst_95 = arith.constant dense<0xFF800000> : vector<8xf32>
    %262 = vector.multi_reduction <maximumf>, %261, %cst_95 [1] : vector<8x8xf32> to vector<8xf32>
    %263 = vector.shape_cast %262 : vector<8xf32> to vector<8x1xf32>
    %264 = vector.broadcast %263 : vector<8x1xf32> to vector<8x8xf32>
    %265 = arith.subf %261, %264 : vector<8x8xf32>
    %266 = math.exp %265 : vector<8x8xf32>
    %cst_96 = arith.constant dense<0.000000e+00> : vector<8xf32>
    %267 = vector.multi_reduction <add>, %266, %cst_96 [1] : vector<8x8xf32> to vector<8xf32>
    %268 = vector.shape_cast %267 : vector<8xf32> to vector<8x1xf32>
    %269 = tpu.reciprocal %268 {approx = true} : vector<8x1xf32> -> vector<8x1xf32>
    %270 = vector.broadcast %269 : vector<8x1xf32> to vector<8x8xf32>
    %271 = arith.mulf %266, %270 : vector<8x8xf32>
    %cst_97 = arith.constant 0.000000e+00 : f32
    %272 = vector.shape_cast %106 : vector<1x8xi1> to vector<1x8xi1>
    %273 = vector.broadcast %272 : vector<1x8xi1> to vector<8x8xi1>
    %274 = vector.broadcast %cst_97 : f32 to vector<8x8xf32>
    %275 = arith.select %273, %271, %274 : vector<8x8xi1>, vector<8x8xf32>
    %276 = arith.truncf %275 : vector<8x8xf32> to vector<8x8xbf16>
    %277 = vector.extract_strided_slice %247 {offsets = [0, 0], sizes = [8, 32], strides = [1, 1]} : vector<16x32xbf16> to vector<8x32xbf16>
    %cst_98 = arith.constant dense<0.000000e+00> : vector<8x32xf32>
    %278 = tpu.matmul %276, %277, %cst_98 {dimension_numbers = #tpu.dot_dimension_numbers<[1], [0], [0], [1], [0, 0, 1, 1], [], []>} : vector<8x8xbf16>, vector<8x32xbf16>, vector<8x32xf32> -> vector<8x32xf32>
    %c0_99 = arith.constant 0 : index
    %c64 = arith.constant 64 : index
    %279 = vector.load %arg16[%c0_99, %c64] : memref<16x128xf32, #tpu.memory_space<vmem>>, vector<8x32xf32>
    tpu.vector_store %arg16[%c0_99, %c64], %278 {strides = array<i32>} : memref<16x128xf32, #tpu.memory_space<vmem>>, vector<8x32xf32>,
    %280 = vector.extract_strided_slice %245 {offsets = [8, 0], sizes = [8, 32], strides = [1, 1]} : vector<16x32xbf16> to vector<8x32xbf16>
    %281 = vector.extract_strided_slice %246 {offsets = [8, 0], sizes = [8, 32], strides = [1, 1]} : vector<16x32xbf16> to vector<8x32xbf16>
    %cst_100 = arith.constant dense<0.000000e+00> : vector<8x8xf32>
    %282 = tpu.matmul %280, %281, %cst_100 {dimension_numbers = #tpu.dot_dimension_numbers<[1], [1], [0], [0], [0, 0, 1, 0], [], []>} : vector<8x32xbf16>, vector<8x32xbf16>, vector<8x8xf32> -> vector<8x8xf32>
    %283 = vector.extract_strided_slice %248 {offsets = [8, 0], sizes = [8, 128], strides = [1, 1]} : vector<16x128xf32> to vector<8x128xf32>
    %c1_i32_101 = arith.constant 1 : i32
    %284 = tpu.dynamic_rotate %283 by %c1_i32_101 dim 1 {stride = 1 : si32, stride_dimension = 0 : si32} : vector<8x128xf32>, i32 -> vector<8x128xf32>
    %285 = vector.extract_strided_slice %284 {offsets = [0, 0], sizes = [8, 8], strides = [1, 1]} : vector<8x128xf32> to vector<8x8xf32>
    %286 = arith.addf %282, %285 : vector<8x8xf32>
    %cst_102 = arith.constant 0.176776692 : f32
    %287 = vector.broadcast %cst_102 : f32 to vector<8x8xf32>
    %288 = arith.mulf %286, %287 : vector<8x8xf32>
    %cst_103 = arith.constant -3.40282347E+38 : f32
    %289 = vector.shape_cast %112 : vector<1x8xi1> to vector<1x8xi1>
    %290 = vector.broadcast %289 : vector<1x8xi1> to vector<8x8xi1>
    %291 = vector.broadcast %cst_103 : f32 to vector<8x8xf32>
    %292 = arith.select %290, %288, %291 : vector<8x8xi1>, vector<8x8xf32>
    %cst_104 = arith.constant dense<0xFF800000> : vector<8xf32>
    %293 = vector.multi_reduction <maximumf>, %292, %cst_104 [1] : vector<8x8xf32> to vector<8xf32>
    %294 = vector.shape_cast %293 : vector<8xf32> to vector<8x1xf32>
    %295 = vector.broadcast %294 : vector<8x1xf32> to vector<8x8xf32>
    %296 = arith.subf %292, %295 : vector<8x8xf32>
    %297 = math.exp %296 : vector<8x8xf32>
    %cst_105 = arith.constant dense<0.000000e+00> : vector<8xf32>
    %298 = vector.multi_reduction <add>, %297, %cst_105 [1] : vector<8x8xf32> to vector<8xf32>
    %299 = vector.shape_cast %298 : vector<8xf32> to vector<8x1xf32>
    %300 = tpu.reciprocal %299 {approx = true} : vector<8x1xf32> -> vector<8x1xf32>
    %301 = vector.broadcast %300 : vector<8x1xf32> to vector<8x8xf32>
    %302 = arith.mulf %297, %301 : vector<8x8xf32>
    %cst_106 = arith.constant 0.000000e+00 : f32
    %303 = vector.shape_cast %112 : vector<1x8xi1> to vector<1x8xi1>
    %304 = vector.broadcast %303 : vector<1x8xi1> to vector<8x8xi1>
    %305 = vector.broadcast %cst_106 : f32 to vector<8x8xf32>
    %306 = arith.select %304, %302, %305 : vector<8x8xi1>, vector<8x8xf32>
    %307 = arith.truncf %306 : vector<8x8xf32> to vector<8x8xbf16>
    %308 = vector.extract_strided_slice %247 {offsets = [8, 0], sizes = [8, 32], strides = [1, 1]} : vector<16x32xbf16> to vector<8x32xbf16>
    %cst_107 = arith.constant dense<0.000000e+00> : vector<8x32xf32>
    %309 = tpu.matmul %307, %308, %cst_107 {dimension_numbers = #tpu.dot_dimension_numbers<[1], [0], [0], [1], [0, 0, 1, 1], [], []>} : vector<8x8xbf16>, vector<8x32xbf16>, vector<8x32xf32> -> vector<8x32xf32>
    %c8_108 = arith.constant 8 : index
    %c64_109 = arith.constant 64 : index
    %310 = vector.load %arg16[%c8_108, %c64_109] : memref<16x128xf32, #tpu.memory_space<vmem>>, vector<8x32xf32>
    tpu.vector_store %arg16[%c8_108, %c64_109], %309 {strides = array<i32>} : memref<16x128xf32, #tpu.memory_space<vmem>>, vector<8x32xf32>,
    %311 = vector.extract_strided_slice %86 {offsets = [0, 96], sizes = [16, 32], strides = [1, 1]} : vector<16x128xbf16> to vector<16x32xbf16>
    %312 = vector.extract_strided_slice %92 {offsets = [0, 96], sizes = [16, 32], strides = [1, 1]} : vector<16x128xbf16> to vector<16x32xbf16>
    %313 = vector.extract_strided_slice %98 {offsets = [0, 96], sizes = [16, 32], strides = [1, 1]} : vector<16x128xbf16> to vector<16x32xbf16>
    %cst_110 = arith.constant dense<0.000000e+00> : vector<16x128xf32>
    %314 = tpu.matmul %311, %99, %cst_110 {dimension_numbers = #tpu.dot_dimension_numbers<[1], [0], [0], [1], [0, 0, 1, 1], [], []>} : vector<16x32xbf16>, vector<32x128xbf16>, vector<16x128xf32> -> vector<16x128xf32>
    %315 = vector.extract_strided_slice %311 {offsets = [0, 0], sizes = [8, 32], strides = [1, 1]} : vector<16x32xbf16> to vector<8x32xbf16>
    %316 = vector.extract_strided_slice %312 {offsets = [0, 0], sizes = [8, 32], strides = [1, 1]} : vector<16x32xbf16> to vector<8x32xbf16>
    %cst_111 = arith.constant dense<0.000000e+00> : vector<8x8xf32>
    %317 = tpu.matmul %315, %316, %cst_111 {dimension_numbers = #tpu.dot_dimension_numbers<[1], [1], [0], [0], [0, 0, 1, 0], [], []>} : vector<8x32xbf16>, vector<8x32xbf16>, vector<8x8xf32> -> vector<8x8xf32>
    %318 = vector.extract_strided_slice %314 {offsets = [0, 0], sizes = [8, 128], strides = [1, 1]} : vector<16x128xf32> to vector<8x128xf32>
    %c1_i32_112 = arith.constant 1 : i32
    %319 = tpu.dynamic_rotate %318 by %c1_i32_112 dim 1 {stride = 1 : si32, stride_dimension = 0 : si32} : vector<8x128xf32>, i32 -> vector<8x128xf32>
    %320 = vector.extract_strided_slice %319 {offsets = [0, 0], sizes = [8, 8], strides = [1, 1]} : vector<8x128xf32> to vector<8x8xf32>
    %321 = arith.addf %317, %320 : vector<8x8xf32>
    %cst_113 = arith.constant 0.176776692 : f32
    %322 = vector.broadcast %cst_113 : f32 to vector<8x8xf32>
    %323 = arith.mulf %321, %322 : vector<8x8xf32>
    %cst_114 = arith.constant -3.40282347E+38 : f32
    %324 = vector.shape_cast %106 : vector<1x8xi1> to vector<1x8xi1>
    %325 = vector.broadcast %324 : vector<1x8xi1> to vector<8x8xi1>
    %326 = vector.broadcast %cst_114 : f32 to vector<8x8xf32>
    %327 = arith.select %325, %323, %326 : vector<8x8xi1>, vector<8x8xf32>
    %cst_115 = arith.constant dense<0xFF800000> : vector<8xf32>
    %328 = vector.multi_reduction <maximumf>, %327, %cst_115 [1] : vector<8x8xf32> to vector<8xf32>
    %329 = vector.shape_cast %328 : vector<8xf32> to vector<8x1xf32>
    %330 = vector.broadcast %329 : vector<8x1xf32> to vector<8x8xf32>
    %331 = arith.subf %327, %330 : vector<8x8xf32>
    %332 = math.exp %331 : vector<8x8xf32>
    %cst_116 = arith.constant dense<0.000000e+00> : vector<8xf32>
    %333 = vector.multi_reduction <add>, %332, %cst_116 [1] : vector<8x8xf32> to vector<8xf32>
    %334 = vector.shape_cast %333 : vector<8xf32> to vector<8x1xf32>
    %335 = tpu.reciprocal %334 {approx = true} : vector<8x1xf32> -> vector<8x1xf32>
    %336 = vector.broadcast %335 : vector<8x1xf32> to vector<8x8xf32>
    %337 = arith.mulf %332, %336 : vector<8x8xf32>
    %cst_117 = arith.constant 0.000000e+00 : f32
    %338 = vector.shape_cast %106 : vector<1x8xi1> to vector<1x8xi1>
    %339 = vector.broadcast %338 : vector<1x8xi1> to vector<8x8xi1>
    %340 = vector.broadcast %cst_117 : f32 to vector<8x8xf32>
    %341 = arith.select %339, %337, %340 : vector<8x8xi1>, vector<8x8xf32>
    %342 = arith.truncf %341 : vector<8x8xf32> to vector<8x8xbf16>
    %343 = vector.extract_strided_slice %313 {offsets = [0, 0], sizes = [8, 32], strides = [1, 1]} : vector<16x32xbf16> to vector<8x32xbf16>
    %cst_118 = arith.constant dense<0.000000e+00> : vector<8x32xf32>
    %344 = tpu.matmul %342, %343, %cst_118 {dimension_numbers = #tpu.dot_dimension_numbers<[1], [0], [0], [1], [0, 0, 1, 1], [], []>} : vector<8x8xbf16>, vector<8x32xbf16>, vector<8x32xf32> -> vector<8x32xf32>
    %c0_119 = arith.constant 0 : index
    %c96 = arith.constant 96 : index
    %345 = vector.load %arg16[%c0_119, %c96] : memref<16x128xf32, #tpu.memory_space<vmem>>, vector<8x32xf32>
    tpu.vector_store %arg16[%c0_119, %c96], %344 {strides = array<i32>} : memref<16x128xf32, #tpu.memory_space<vmem>>, vector<8x32xf32>,
    %346 = vector.extract_strided_slice %311 {offsets = [8, 0], sizes = [8, 32], strides = [1, 1]} : vector<16x32xbf16> to vector<8x32xbf16>
    %347 = vector.extract_strided_slice %312 {offsets = [8, 0], sizes = [8, 32], strides = [1, 1]} : vector<16x32xbf16> to vector<8x32xbf16>
    %cst_120 = arith.constant dense<0.000000e+00> : vector<8x8xf32>
    %348 = tpu.matmul %346, %347, %cst_120 {dimension_numbers = #tpu.dot_dimension_numbers<[1], [1], [0], [0], [0, 0, 1, 0], [], []>} : vector<8x32xbf16>, vector<8x32xbf16>, vector<8x8xf32> -> vector<8x8xf32>
    %349 = vector.extract_strided_slice %314 {offsets = [8, 0], sizes = [8, 128], strides = [1, 1]} : vector<16x128xf32> to vector<8x128xf32>
    %c1_i32_121 = arith.constant 1 : i32
    %350 = tpu.dynamic_rotate %349 by %c1_i32_121 dim 1 {stride = 1 : si32, stride_dimension = 0 : si32} : vector<8x128xf32>, i32 -> vector<8x128xf32>
    %351 = vector.extract_strided_slice %350 {offsets = [0, 0], sizes = [8, 8], strides = [1, 1]} : vector<8x128xf32> to vector<8x8xf32>
    %352 = arith.addf %348, %351 : vector<8x8xf32>
    %cst_122 = arith.constant 0.176776692 : f32
    %353 = vector.broadcast %cst_122 : f32 to vector<8x8xf32>
    %354 = arith.mulf %352, %353 : vector<8x8xf32>
    %cst_123 = arith.constant -3.40282347E+38 : f32
    %355 = vector.shape_cast %112 : vector<1x8xi1> to vector<1x8xi1>
    %356 = vector.broadcast %355 : vector<1x8xi1> to vector<8x8xi1>
    %357 = vector.broadcast %cst_123 : f32 to vector<8x8xf32>
    %358 = arith.select %356, %354, %357 : vector<8x8xi1>, vector<8x8xf32>
    %cst_124 = arith.constant dense<0xFF800000> : vector<8xf32>
    %359 = vector.multi_reduction <maximumf>, %358, %cst_124 [1] : vector<8x8xf32> to vector<8xf32>
    %360 = vector.shape_cast %359 : vector<8xf32> to vector<8x1xf32>
    %361 = vector.broadcast %360 : vector<8x1xf32> to vector<8x8xf32>
    %362 = arith.subf %358, %361 : vector<8x8xf32>
    %363 = math.exp %362 : vector<8x8xf32>
    %cst_125 = arith.constant dense<0.000000e+00> : vector<8xf32>
    %364 = vector.multi_reduction <add>, %363, %cst_125 [1] : vector<8x8xf32> to vector<8xf32>
    %365 = vector.shape_cast %364 : vector<8xf32> to vector<8x1xf32>
    %366 = tpu.reciprocal %365 {approx = true} : vector<8x1xf32> -> vector<8x1xf32>
    %367 = vector.broadcast %366 : vector<8x1xf32> to vector<8x8xf32>
    %368 = arith.mulf %363, %367 : vector<8x8xf32>
    %cst_126 = arith.constant 0.000000e+00 : f32
    %369 = vector.shape_cast %112 : vector<1x8xi1> to vector<1x8xi1>
    %370 = vector.broadcast %369 : vector<1x8xi1> to vector<8x8xi1>
    %371 = vector.broadcast %cst_126 : f32 to vector<8x8xf32>
    %372 = arith.select %370, %368, %371 : vector<8x8xi1>, vector<8x8xf32>
    %373 = arith.truncf %372 : vector<8x8xf32> to vector<8x8xbf16>
    %374 = vector.extract_strided_slice %313 {offsets = [8, 0], sizes = [8, 32], strides = [1, 1]} : vector<16x32xbf16> to vector<8x32xbf16>
    %cst_127 = arith.constant dense<0.000000e+00> : vector<8x32xf32>
    %375 = tpu.matmul %373, %374, %cst_127 {dimension_numbers = #tpu.dot_dimension_numbers<[1], [0], [0], [1], [0, 0, 1, 1], [], []>} : vector<8x8xbf16>, vector<8x32xbf16>, vector<8x32xf32> -> vector<8x32xf32>
    %c8_128 = arith.constant 8 : index
    %c96_129 = arith.constant 96 : index
    %376 = vector.load %arg16[%c8_128, %c96_129] : memref<16x128xf32, #tpu.memory_space<vmem>>, vector<8x32xf32>
    tpu.vector_store %arg16[%c8_128, %c96_129], %375 {strides = array<i32>} : memref<16x128xf32, #tpu.memory_space<vmem>>, vector<8x32xf32>,
    %c0_130 = arith.constant 0 : index
    %c0_131 = arith.constant 0 : index
    %377 = vector.load %arg16[%c0_130, %c0_131] : memref<16x128xf32, #tpu.memory_space<vmem>>, vector<16x128xf32>
    %378 = arith.truncf %377 : vector<16x128xf32> to vector<16x128xbf16>
    %c0_132 = arith.constant 0 : index
    %c0_133 = arith.constant 0 : index
    %c0_134 = arith.constant 0 : index
    %379 = vector.load %arg9[%c0_132, %c0_133, %c0_134] : memref<1x128x128xbf16, #tpu.memory_space<vmem>>, vector<1x128x128xbf16>
    %380 = vector.shape_cast %379 : vector<1x128x128xbf16> to vector<128x128xbf16>
    %cst_135 = arith.constant dense<0.000000e+00> : vector<16x128xf32>
    %381 = tpu.matmul %378, %380, %cst_135 {dimension_numbers = #tpu.dot_dimension_numbers<[1], [0], [0], [1], [0, 0, 1, 1], [], []>} : vector<16x128xbf16>, vector<128x128xbf16>, vector<16x128xf32> -> vector<16x128xf32>
    %c0_136 = arith.constant 0 : index
    %c8_137 = arith.constant 8 : index
    %c0_138 = arith.constant 0 : index
    %382 = vector.load %arg6[%c0_136, %c8_137, %c0_138] : memref<1x24x128xf32, #tpu.memory_space<vmem>>, vector<1x1x128xf32>
    %383 = vector.shape_cast %382 : vector<1x1x128xf32> to vector<1x128xf32>
    %384 = vector.broadcast %383 : vector<1x128xf32> to vector<16x128xf32>
    %385 = arith.addf %381, %384 : vector<16x128xf32>
    %386 = arith.addf %50, %385 : vector<16x128xf32>
    %c0_139 = arith.constant 0 : index
    %c9 = arith.constant 9 : index
    %c0_140 = arith.constant 0 : index
    %387 = vector.load %arg6[%c0_139, %c9, %c0_140] : memref<1x24x128xf32, #tpu.memory_space<vmem>>, vector<1x1x128xf32>
    %388 = vector.shape_cast %387 : vector<1x1x128xf32> to vector<1x128xf32>
    %c0_141 = arith.constant 0 : index
    %c10 = arith.constant 10 : index
    %c0_142 = arith.constant 0 : index
    %389 = vector.load %arg6[%c0_141, %c10, %c0_142] : memref<1x24x128xf32, #tpu.memory_space<vmem>>, vector<1x1x128xf32>
    %390 = vector.shape_cast %389 : vector<1x1x128xf32> to vector<1x128xf32>
    %cst_143 = arith.constant dense<0.000000e+00> : vector<16xf32>
    %391 = vector.multi_reduction <add>, %386, %cst_143 [1] : vector<16x128xf32> to vector<16xf32>
    %392 = vector.shape_cast %391 : vector<16xf32> to vector<16x1xf32>
    %cst_144 = arith.constant 1.280000e+02 : f32
    %393 = vector.broadcast %cst_144 : f32 to vector<16x1xf32>
    %394 = arith.divf %392, %393 : vector<16x1xf32>
    %395 = vector.broadcast %394 : vector<16x1xf32> to vector<16x128xf32>
    %396 = arith.subf %386, %395 : vector<16x128xf32>
    %397 = arith.mulf %396, %396 : vector<16x128xf32>
    %cst_145 = arith.constant dense<0.000000e+00> : vector<16xf32>
    %398 = vector.multi_reduction <add>, %397, %cst_145 [1] : vector<16x128xf32> to vector<16xf32>
    %399 = vector.shape_cast %398 : vector<16xf32> to vector<16x1xf32>
    %cst_146 = arith.constant 1.280000e+02 : f32
    %400 = vector.broadcast %cst_146 : f32 to vector<16x1xf32>
    %401 = arith.divf %399, %400 : vector<16x1xf32>
    %402 = vector.broadcast %394 : vector<16x1xf32> to vector<16x128xf32>
    %403 = arith.subf %386, %402 : vector<16x128xf32>
    %cst_147 = arith.constant 9.99999974E-6 : f32
    %404 = vector.broadcast %cst_147 : f32 to vector<16x1xf32>
    %405 = arith.addf %401, %404 : vector<16x1xf32>
    %406 = math.rsqrt %405 : vector<16x1xf32>
    %407 = vector.broadcast %406 : vector<16x1xf32> to vector<16x128xf32>
    %408 = arith.mulf %403, %407 : vector<16x128xf32>
    %409 = vector.broadcast %388 : vector<1x128xf32> to vector<16x128xf32>
    %410 = arith.mulf %408, %409 : vector<16x128xf32>
    %411 = vector.broadcast %390 : vector<1x128xf32> to vector<16x128xf32>
    %412 = arith.addf %410, %411 : vector<16x128xf32>
    %c6_i32 = arith.constant 6 : i32
    %413 = arith.muli %arg1, %c6_i32 : i32
    %c0_i32_148 = arith.constant 0 : i32
    %414 = arith.addi %413, %c0_i32_148 : i32
    %415 = arith.index_cast %414 : i32 to index
    %416 = memref.load %arg13[%415] : memref<12xf32, #tpu.memory_space<smem>>
    %417 = vector.broadcast %416 : f32 to vector<16x128xf32>
    %418 = arith.mulf %412, %417 : vector<16x128xf32>
    %c2_i32_149 = arith.constant 2 : i32
    %419 = arith.addi %413, %c2_i32_149 : i32
    %420 = arith.index_cast %419 : i32 to index
    %421 = memref.load %arg13[%420] : memref<12xf32, #tpu.memory_space<smem>>
    %422 = vector.broadcast %421 : f32 to vector<16x128xf32>
    %423 = arith.addf %418, %422 : vector<16x128xf32>
    %c1_i32_150 = arith.constant 1 : i32
    %424 = arith.addi %413, %c1_i32_150 : i32
    %425 = arith.index_cast %424 : i32 to index
    %426 = memref.load %arg13[%425] : memref<12xf32, #tpu.memory_space<smem>>
    %427 = vector.broadcast %426 : f32 to vector<16x128xf32>
    %428 = arith.mulf %412, %427 : vector<16x128xf32>
    %c3_i32 = arith.constant 3 : i32
    %429 = arith.addi %413, %c3_i32 : i32
    %430 = arith.index_cast %429 : i32 to index
    %431 = memref.load %arg13[%430] : memref<12xf32, #tpu.memory_space<smem>>
    %432 = vector.broadcast %431 : f32 to vector<16x128xf32>
    %433 = arith.addf %428, %432 : vector<16x128xf32>
    %434 = arith.negf %433 : vector<16x128xf32>
    %435 = math.exp %434 : vector<16x128xf32>
    %cst_151 = arith.constant 1.000000e+00 : f32
    %436 = vector.broadcast %cst_151 : f32 to vector<16x128xf32>
    %437 = arith.addf %436, %435 : vector<16x128xf32>
    %438 = arith.divf %436, %437 : vector<16x128xf32>
    %439 = arith.mulf %423, %438 : vector<16x128xf32>
    %440 = tpu.iota {dimensions = array<i32: 0>} : vector<16x1xi32>
    %c8_i32 = arith.constant 8 : i32
    %c0_i32_152 = arith.constant 0 : i32
    %441 = arith.cmpi eq, %c8_i32, %c0_i32_152 : i32
    %c1_i32_153 = arith.constant 1 : i32
    %442 = arith.select %441, %c1_i32_153, %c8_i32 : i32
    %443 = vector.broadcast %442 : i32 to vector<16x1xi32>
    %444 = arith.remsi %440, %443 : vector<16x1xi32>
    %c0_i32_154 = arith.constant 0 : i32
    %445 = vector.broadcast %c0_i32_154 : i32 to vector<16x1xi32>
    %446 = arith.cmpi ne, %444, %445 : vector<16x1xi32>
    %c0_i32_155 = arith.constant 0 : i32
    %447 = vector.broadcast %c0_i32_155 : i32 to vector<16x1xi32>
    %448 = arith.cmpi slt, %444, %447 : vector<16x1xi32>
    %c0_i32_156 = arith.constant 0 : i32
    %449 = arith.cmpi slt, %442, %c0_i32_156 : i32
    %450 = vector.broadcast %449 : i1 to vector<16x1xi1>
    %451 = vector.broadcast %450 : vector<16x1xi1> to vector<16x1xi1>
    %452 = arith.xori %448, %451 : vector<16x1xi1>
    %453 = arith.andi %452, %446 : vector<16x1xi1>
    %454 = vector.broadcast %442 : i32 to vector<16x1xi32>
    %455 = arith.addi %444, %454 : vector<16x1xi32>
    %456 = arith.select %453, %455, %444 : vector<16x1xi1>, vector<16x1xi32>
    %cst_157 = arith.constant 0.000000e+00 : f32
    %457 = vector.broadcast %cst_157 : f32 to vector<16x128xf32>
    %c0_158 = arith.constant 0 : index
    %c11 = arith.constant 11 : index
    %c0_159 = arith.constant 0 : index
    %458 = vector.load %arg6[%c0_158, %c11, %c0_159] : memref<1x24x128xf32, #tpu.memory_space<vmem>>, vector<1x1x128xf32>
    %459 = vector.shape_cast %458 : vector<1x1x128xf32> to vector<1x128xf32>
    %460 = vector.broadcast %459 : vector<1x128xf32> to vector<16x128xf32>
    %461 = arith.addf %457, %460 : vector<16x128xf32>
    %c0_160 = arith.constant 0 : index
    %c0_161 = arith.constant 0 : index
    %c0_162 = arith.constant 0 : index
    %462 = vector.load %arg12[%c0_160, %c0_161, %c0_162] : memref<1x5x128xf32, #tpu.memory_space<vmem>>, vector<1x1x128xf32>
    %463 = vector.shape_cast %462 : vector<1x1x128xf32> to vector<1x128xf32>
    %c2_i32_163 = arith.constant 2 : i32
    %464 = tpu.dynamic_rotate %439 by %c2_i32_163 dim 0 : vector<16x128xf32>, i32 -> vector<16x128xf32>
    %c-2_i32 = arith.constant -2 : i32
    %465 = vector.broadcast %c-2_i32 : i32 to vector<16x1xi32>
    %466 = arith.addi %456, %465 : vector<16x1xi32>
    %c0_i32_164 = arith.constant 0 : i32
    %467 = vector.broadcast %c0_i32_164 : i32 to vector<16x1xi32>
    %468 = arith.cmpi sge, %466, %467 : vector<16x1xi32>
    %c-2_i32_165 = arith.constant -2 : i32
    %469 = vector.broadcast %c-2_i32_165 : i32 to vector<16x1xi32>
    %470 = arith.addi %456, %469 : vector<16x1xi32>
    %c8_i32_166 = arith.constant 8 : i32
    %471 = vector.broadcast %c8_i32_166 : i32 to vector<16x1xi32>
    %472 = arith.cmpi slt, %470, %471 : vector<16x1xi32>
    %473 = arith.andi %468, %472 : vector<16x1xi1>
    %cst_167 = arith.constant 0.000000e+00 : f32
    %474 = vector.shape_cast %473 : vector<16x1xi1> to vector<16x1xi1>
    %475 = vector.broadcast %474 : vector<16x1xi1> to vector<16x128xi1>
    %476 = vector.broadcast %cst_167 : f32 to vector<16x128xf32>
    %477 = arith.select %475, %464, %476 : vector<16x128xi1>, vector<16x128xf32>
    %478 = vector.broadcast %463 : vector<1x128xf32> to vector<16x128xf32>
    %479 = arith.mulf %477, %478 : vector<16x128xf32>
    %480 = arith.addf %461, %479 : vector<16x128xf32>
    %c0_168 = arith.constant 0 : index
    %c1_169 = arith.constant 1 : index
    %c0_170 = arith.constant 0 : index
    %481 = vector.load %arg12[%c0_168, %c1_169, %c0_170] : memref<1x5x128xf32, #tpu.memory_space<vmem>>, vector<1x1x128xf32>
    %482 = vector.shape_cast %481 : vector<1x1x128xf32> to vector<1x128xf32>
    %c1_i32_171 = arith.constant 1 : i32
    %483 = tpu.dynamic_rotate %439 by %c1_i32_171 dim 0 : vector<16x128xf32>, i32 -> vector<16x128xf32>
    %c-1_i32 = arith.constant -1 : i32
    %484 = vector.broadcast %c-1_i32 : i32 to vector<16x1xi32>
    %485 = arith.addi %456, %484 : vector<16x1xi32>
    %c0_i32_172 = arith.constant 0 : i32
    %486 = vector.broadcast %c0_i32_172 : i32 to vector<16x1xi32>
    %487 = arith.cmpi sge, %485, %486 : vector<16x1xi32>
    %c-1_i32_173 = arith.constant -1 : i32
    %488 = vector.broadcast %c-1_i32_173 : i32 to vector<16x1xi32>
    %489 = arith.addi %456, %488 : vector<16x1xi32>
    %c8_i32_174 = arith.constant 8 : i32
    %490 = vector.broadcast %c8_i32_174 : i32 to vector<16x1xi32>
    %491 = arith.cmpi slt, %489, %490 : vector<16x1xi32>
    %492 = arith.andi %487, %491 : vector<16x1xi1>
    %cst_175 = arith.constant 0.000000e+00 : f32
    %493 = vector.shape_cast %492 : vector<16x1xi1> to vector<16x1xi1>
    %494 = vector.broadcast %493 : vector<16x1xi1> to vector<16x128xi1>
    %495 = vector.broadcast %cst_175 : f32 to vector<16x128xf32>
    %496 = arith.select %494, %483, %495 : vector<16x128xi1>, vector<16x128xf32>
    %497 = vector.broadcast %482 : vector<1x128xf32> to vector<16x128xf32>
    %498 = arith.mulf %496, %497 : vector<16x128xf32>
    %499 = arith.addf %480, %498 : vector<16x128xf32>
    %c0_176 = arith.constant 0 : index
    %c2_177 = arith.constant 2 : index
    %c0_178 = arith.constant 0 : index
    %500 = vector.load %arg12[%c0_176, %c2_177, %c0_178] : memref<1x5x128xf32, #tpu.memory_space<vmem>>, vector<1x1x128xf32>
    %501 = vector.shape_cast %500 : vector<1x1x128xf32> to vector<1x128xf32>
    %502 = vector.broadcast %501 : vector<1x128xf32> to vector<16x128xf32>
    %503 = arith.mulf %439, %502 : vector<16x128xf32>
    %504 = arith.addf %499, %503 : vector<16x128xf32>
    %c0_179 = arith.constant 0 : index
    %c3_180 = arith.constant 3 : index
    %c0_181 = arith.constant 0 : index
    %505 = vector.load %arg12[%c0_179, %c3_180, %c0_181] : memref<1x5x128xf32, #tpu.memory_space<vmem>>, vector<1x1x128xf32>
    %506 = vector.shape_cast %505 : vector<1x1x128xf32> to vector<1x128xf32>
    %c15_i32 = arith.constant 15 : i32
    %507 = tpu.dynamic_rotate %439 by %c15_i32 dim 0 : vector<16x128xf32>, i32 -> vector<16x128xf32>
    %c1_i32_182 = arith.constant 1 : i32
    %508 = vector.broadcast %c1_i32_182 : i32 to vector<16x1xi32>
    %509 = arith.addi %456, %508 : vector<16x1xi32>
    %c0_i32_183 = arith.constant 0 : i32
    %510 = vector.broadcast %c0_i32_183 : i32 to vector<16x1xi32>
    %511 = arith.cmpi sge, %509, %510 : vector<16x1xi32>
    %c1_i32_184 = arith.constant 1 : i32
    %512 = vector.broadcast %c1_i32_184 : i32 to vector<16x1xi32>
    %513 = arith.addi %456, %512 : vector<16x1xi32>
    %c8_i32_185 = arith.constant 8 : i32
    %514 = vector.broadcast %c8_i32_185 : i32 to vector<16x1xi32>
    %515 = arith.cmpi slt, %513, %514 : vector<16x1xi32>
    %516 = arith.andi %511, %515 : vector<16x1xi1>
    %cst_186 = arith.constant 0.000000e+00 : f32
    %517 = vector.shape_cast %516 : vector<16x1xi1> to vector<16x1xi1>
    %518 = vector.broadcast %517 : vector<16x1xi1> to vector<16x128xi1>
    %519 = vector.broadcast %cst_186 : f32 to vector<16x128xf32>
    %520 = arith.select %518, %507, %519 : vector<16x128xi1>, vector<16x128xf32>
    %521 = vector.broadcast %506 : vector<1x128xf32> to vector<16x128xf32>
    %522 = arith.mulf %520, %521 : vector<16x128xf32>
    %523 = arith.addf %504, %522 : vector<16x128xf32>
    %c0_187 = arith.constant 0 : index
    %c4_188 = arith.constant 4 : index
    %c0_189 = arith.constant 0 : index
    %524 = vector.load %arg12[%c0_187, %c4_188, %c0_189] : memref<1x5x128xf32, #tpu.memory_space<vmem>>, vector<1x1x128xf32>
    %525 = vector.shape_cast %524 : vector<1x1x128xf32> to vector<1x128xf32>
    %c14_i32 = arith.constant 14 : i32
    %526 = tpu.dynamic_rotate %439 by %c14_i32 dim 0 : vector<16x128xf32>, i32 -> vector<16x128xf32>
    %c2_i32_190 = arith.constant 2 : i32
    %527 = vector.broadcast %c2_i32_190 : i32 to vector<16x1xi32>
    %528 = arith.addi %456, %527 : vector<16x1xi32>
    %c0_i32_191 = arith.constant 0 : i32
    %529 = vector.broadcast %c0_i32_191 : i32 to vector<16x1xi32>
    %530 = arith.cmpi sge, %528, %529 : vector<16x1xi32>
    %c2_i32_192 = arith.constant 2 : i32
    %531 = vector.broadcast %c2_i32_192 : i32 to vector<16x1xi32>
    %532 = arith.addi %456, %531 : vector<16x1xi32>
    %c8_i32_193 = arith.constant 8 : i32
    %533 = vector.broadcast %c8_i32_193 : i32 to vector<16x1xi32>
    %534 = arith.cmpi slt, %532, %533 : vector<16x1xi32>
    %535 = arith.andi %530, %534 : vector<16x1xi1>
    %cst_194 = arith.constant 0.000000e+00 : f32
    %536 = vector.shape_cast %535 : vector<16x1xi1> to vector<16x1xi1>
    %537 = vector.broadcast %536 : vector<16x1xi1> to vector<16x128xi1>
    %538 = vector.broadcast %cst_194 : f32 to vector<16x128xf32>
    %539 = arith.select %537, %526, %538 : vector<16x128xi1>, vector<16x128xf32>
    %540 = vector.broadcast %525 : vector<1x128xf32> to vector<16x128xf32>
    %541 = arith.mulf %539, %540 : vector<16x128xf32>
    %542 = arith.addf %523, %541 : vector<16x128xf32>
    %c0_195 = arith.constant 0 : index
    %c12 = arith.constant 12 : index
    %c0_196 = arith.constant 0 : index
    %543 = vector.load %arg6[%c0_195, %c12, %c0_196] : memref<1x24x128xf32, #tpu.memory_space<vmem>>, vector<1x1x128xf32>
    %544 = vector.shape_cast %543 : vector<1x1x128xf32> to vector<1x128xf32>
    %545 = vector.broadcast %544 : vector<1x128xf32> to vector<16x128xf32>
    %546 = arith.mulf %542, %545 : vector<16x128xf32>
    %c0_197 = arith.constant 0 : index
    %c13 = arith.constant 13 : index
    %c0_198 = arith.constant 0 : index
    %547 = vector.load %arg6[%c0_197, %c13, %c0_198] : memref<1x24x128xf32, #tpu.memory_space<vmem>>, vector<1x1x128xf32>
    %548 = vector.shape_cast %547 : vector<1x1x128xf32> to vector<1x128xf32>
    %549 = vector.broadcast %548 : vector<1x128xf32> to vector<16x128xf32>
    %550 = arith.addf %546, %549 : vector<16x128xf32>
    %cst_199 = arith.constant 0.000000e+00 : f32
    %551 = vector.broadcast %cst_199 : f32 to vector<16x128xf32>
    %552 = arith.maximumf %550, %551 : vector<16x128xf32>
    %c4_i32 = arith.constant 4 : i32
    %553 = arith.addi %413, %c4_i32 : i32
    %554 = arith.index_cast %553 : i32 to index
    %555 = memref.load %arg13[%554] : memref<12xf32, #tpu.memory_space<smem>>
    %556 = vector.broadcast %555 : f32 to vector<16x128xf32>
    %557 = arith.mulf %552, %556 : vector<16x128xf32>
    %c5_i32 = arith.constant 5 : i32
    %558 = arith.addi %413, %c5_i32 : i32
    %559 = arith.index_cast %558 : i32 to index
    %560 = memref.load %arg13[%559] : memref<12xf32, #tpu.memory_space<smem>>
    %561 = vector.broadcast %560 : f32 to vector<16x128xf32>
    %562 = arith.addf %557, %561 : vector<16x128xf32>
    %563 = arith.addf %386, %562 : vector<16x128xf32>
    %c0_200 = arith.constant 0 : index
    %c14 = arith.constant 14 : index
    %c0_201 = arith.constant 0 : index
    %564 = vector.load %arg6[%c0_200, %c14, %c0_201] : memref<1x24x128xf32, #tpu.memory_space<vmem>>, vector<1x1x128xf32>
    %565 = vector.shape_cast %564 : vector<1x1x128xf32> to vector<1x128xf32>
    %c0_202 = arith.constant 0 : index
    %c15 = arith.constant 15 : index
    %c0_203 = arith.constant 0 : index
    %566 = vector.load %arg6[%c0_202, %c15, %c0_203] : memref<1x24x128xf32, #tpu.memory_space<vmem>>, vector<1x1x128xf32>
    %567 = vector.shape_cast %566 : vector<1x1x128xf32> to vector<1x128xf32>
    %c0_204 = arith.constant 0 : index
    %c1_205 = arith.constant 1 : index
    %c0_206 = arith.constant 0 : index
    %c0_207 = arith.constant 0 : index
    %568 = vector.load %arg10[%c0_204, %c1_205, %c0_206, %c0_207] : memref<1x2x128x256xbf16, #tpu.memory_space<vmem>>, vector<1x1x128x256xbf16>
    %569 = vector.shape_cast %568 : vector<1x1x128x256xbf16> to vector<128x256xbf16>
    %c0_208 = arith.constant 0 : index
    %c1_209 = arith.constant 1 : index
    %c0_210 = arith.constant 0 : index
    %570 = vector.load %arg7[%c0_208, %c1_209, %c0_210] : memref<1x2x256xf32, #tpu.memory_space<vmem>>, vector<1x1x256xf32>
    %571 = vector.shape_cast %570 : vector<1x1x256xf32> to vector<1x256xf32>
    %c0_211 = arith.constant 0 : index
    %c1_212 = arith.constant 1 : index
    %c0_213 = arith.constant 0 : index
    %c0_214 = arith.constant 0 : index
    %572 = vector.load %arg11[%c0_211, %c1_212, %c0_213, %c0_214] : memref<1x2x256x128xbf16, #tpu.memory_space<vmem>>, vector<1x1x256x128xbf16>
    %573 = vector.shape_cast %572 : vector<1x1x256x128xbf16> to vector<256x128xbf16>
    %c0_215 = arith.constant 0 : index
    %c16 = arith.constant 16 : index
    %c0_216 = arith.constant 0 : index
    %574 = vector.load %arg6[%c0_215, %c16, %c0_216] : memref<1x24x128xf32, #tpu.memory_space<vmem>>, vector<1x1x128xf32>
    %575 = vector.shape_cast %574 : vector<1x1x128xf32> to vector<1x128xf32>
    %cst_217 = arith.constant dense<0.000000e+00> : vector<16xf32>
    %576 = vector.multi_reduction <add>, %563, %cst_217 [1] : vector<16x128xf32> to vector<16xf32>
    %577 = vector.shape_cast %576 : vector<16xf32> to vector<16x1xf32>
    %cst_218 = arith.constant 1.280000e+02 : f32
    %578 = vector.broadcast %cst_218 : f32 to vector<16x1xf32>
    %579 = arith.divf %577, %578 : vector<16x1xf32>
    %580 = vector.broadcast %579 : vector<16x1xf32> to vector<16x128xf32>
    %581 = arith.subf %563, %580 : vector<16x128xf32>
    %582 = arith.mulf %581, %581 : vector<16x128xf32>
    %cst_219 = arith.constant dense<0.000000e+00> : vector<16xf32>
    %583 = vector.multi_reduction <add>, %582, %cst_219 [1] : vector<16x128xf32> to vector<16xf32>
    %584 = vector.shape_cast %583 : vector<16xf32> to vector<16x1xf32>
    %cst_220 = arith.constant 1.280000e+02 : f32
    %585 = vector.broadcast %cst_220 : f32 to vector<16x1xf32>
    %586 = arith.divf %584, %585 : vector<16x1xf32>
    %587 = vector.broadcast %579 : vector<16x1xf32> to vector<16x128xf32>
    %588 = arith.subf %563, %587 : vector<16x128xf32>
    %cst_221 = arith.constant 9.99999974E-6 : f32
    %589 = vector.broadcast %cst_221 : f32 to vector<16x1xf32>
    %590 = arith.addf %586, %589 : vector<16x1xf32>
    %591 = math.rsqrt %590 : vector<16x1xf32>
    %592 = vector.broadcast %591 : vector<16x1xf32> to vector<16x128xf32>
    %593 = arith.mulf %588, %592 : vector<16x128xf32>
    %594 = vector.broadcast %565 : vector<1x128xf32> to vector<16x128xf32>
    %595 = arith.mulf %593, %594 : vector<16x128xf32>
    %596 = vector.broadcast %567 : vector<1x128xf32> to vector<16x128xf32>
    %597 = arith.addf %595, %596 : vector<16x128xf32>
    %598 = arith.truncf %597 : vector<16x128xf32> to vector<16x128xbf16>
    %cst_222 = arith.constant dense<0.000000e+00> : vector<16x256xf32>
    %599 = tpu.matmul %598, %569, %cst_222 {dimension_numbers = #tpu.dot_dimension_numbers<[1], [0], [0], [1], [0, 0, 1, 1], [], []>} : vector<16x128xbf16>, vector<128x256xbf16>, vector<16x256xf32> -> vector<16x256xf32>
    %600 = vector.broadcast %571 : vector<1x256xf32> to vector<16x256xf32>
    %601 = arith.addf %599, %600 : vector<16x256xf32>
    %cst_223 = arith.constant 0.000000e+00 : f32
    %602 = vector.broadcast %cst_223 : f32 to vector<16x256xf32>
    %603 = arith.maximumf %601, %602 : vector<16x256xf32>
    %604 = arith.truncf %603 : vector<16x256xf32> to vector<16x256xbf16>
    %cst_224 = arith.constant dense<0.000000e+00> : vector<16x128xf32>
    %605 = tpu.matmul %604, %573, %cst_224 {dimension_numbers = #tpu.dot_dimension_numbers<[1], [0], [0], [1], [0, 0, 1, 1], [], []>} : vector<16x256xbf16>, vector<256x128xbf16>, vector<16x128xf32> -> vector<16x128xf32>
    %606 = vector.broadcast %575 : vector<1x128xf32> to vector<16x128xf32>
    %607 = arith.addf %605, %606 : vector<16x128xf32>
    %cst_225 = arith.constant 5.000000e-01 : f32
    %608 = vector.broadcast %cst_225 : f32 to vector<16x128xf32>
    %609 = arith.mulf %608, %607 : vector<16x128xf32>
    %610 = arith.addf %563, %609 : vector<16x128xf32>
    %c0_226 = arith.constant 0 : index
    %c17 = arith.constant 17 : index
    %c0_227 = arith.constant 0 : index
    %611 = vector.load %arg6[%c0_226, %c17, %c0_227] : memref<1x24x128xf32, #tpu.memory_space<vmem>>, vector<1x1x128xf32>
    %612 = vector.shape_cast %611 : vector<1x1x128xf32> to vector<1x128xf32>
    %c0_228 = arith.constant 0 : index
    %c18 = arith.constant 18 : index
    %c0_229 = arith.constant 0 : index
    %613 = vector.load %arg6[%c0_228, %c18, %c0_229] : memref<1x24x128xf32, #tpu.memory_space<vmem>>, vector<1x1x128xf32>
    %614 = vector.shape_cast %613 : vector<1x1x128xf32> to vector<1x128xf32>
    %cst_230 = arith.constant dense<0.000000e+00> : vector<16xf32>
    %615 = vector.multi_reduction <add>, %610, %cst_230 [1] : vector<16x128xf32> to vector<16xf32>
    %616 = vector.shape_cast %615 : vector<16xf32> to vector<16x1xf32>
    %cst_231 = arith.constant 1.280000e+02 : f32
    %617 = vector.broadcast %cst_231 : f32 to vector<16x1xf32>
    %618 = arith.divf %616, %617 : vector<16x1xf32>
    %619 = vector.broadcast %618 : vector<16x1xf32> to vector<16x128xf32>
    %620 = arith.subf %610, %619 : vector<16x128xf32>
    %621 = arith.mulf %620, %620 : vector<16x128xf32>
    %cst_232 = arith.constant dense<0.000000e+00> : vector<16xf32>
    %622 = vector.multi_reduction <add>, %621, %cst_232 [1] : vector<16x128xf32> to vector<16xf32>
    %623 = vector.shape_cast %622 : vector<16xf32> to vector<16x1xf32>
    %cst_233 = arith.constant 1.280000e+02 : f32
    %624 = vector.broadcast %cst_233 : f32 to vector<16x1xf32>
    %625 = arith.divf %623, %624 : vector<16x1xf32>
    %626 = vector.broadcast %618 : vector<16x1xf32> to vector<16x128xf32>
    %627 = arith.subf %610, %626 : vector<16x128xf32>
    %cst_234 = arith.constant 9.99999974E-6 : f32
    %628 = vector.broadcast %cst_234 : f32 to vector<16x1xf32>
    %629 = arith.addf %625, %628 : vector<16x1xf32>
    %630 = math.rsqrt %629 : vector<16x1xf32>
    %631 = vector.broadcast %630 : vector<16x1xf32> to vector<16x128xf32>
    %632 = arith.mulf %627, %631 : vector<16x128xf32>
    %633 = vector.broadcast %612 : vector<1x128xf32> to vector<16x128xf32>
    %634 = arith.mulf %632, %633 : vector<16x128xf32>
    %635 = vector.broadcast %614 : vector<1x128xf32> to vector<16x128xf32>
    %636 = arith.addf %634, %635 : vector<16x128xf32>
    %c0_235 = arith.constant 0 : index
    %c0_236 = arith.constant 0 : index
    %637 = vector.load %arg15[%c0_235, %c0_236] : memref<16x128xf32, #tpu.memory_space<vmem>>, vector<16x128xf32>
    tpu.vector_store %arg15[%c0_235, %c0_236], %636 {strides = array<i32>} : memref<16x128xf32, #tpu.memory_space<vmem>>, vector<16x128xf32>,
    return
  }
  func.func @transform_0(%arg0: i32, %arg1: i32) -> (i32, i32) {
    %c0_i32 = arith.constant 0 : i32
    %c0_i32_0 = arith.constant 0 : i32
    return %arg0, %c0_i32 : i32, i32
  }
  func.func @transform_1(%arg0: i32, %arg1: i32) -> (i32, i32) {
    %c0_i32 = arith.constant 0 : i32
    %c0_i32_0 = arith.constant 0 : i32
    %c0_i32_1 = arith.constant 0 : i32
    return %c0_i32, %c0_i32_0 : i32, i32
  }
  func.func @transform_2(%arg0: i32, %arg1: i32) -> (i32, i32) {
    %c0_i32 = arith.constant 0 : i32
    %c0_i32_0 = arith.constant 0 : i32
    %c0_i32_1 = arith.constant 0 : i32
    return %c0_i32, %c0_i32_0 : i32, i32
  }
  func.func @transform_3(%arg0: i32, %arg1: i32) -> (i32, i32) {
    %c0_i32 = arith.constant 0 : i32
    %c0_i32_0 = arith.constant 0 : i32
    %c0_i32_1 = arith.constant 0 : i32
    return %c0_i32, %c0_i32_0 : i32, i32
  }
  func.func @transform_4(%arg0: i32, %arg1: i32) -> (i32, i32, i32) {
    %c0_i32 = arith.constant 0 : i32
    %c0_i32_0 = arith.constant 0 : i32
    %c0_i32_1 = arith.constant 0 : i32
    return %arg1, %c0_i32, %c0_i32_0 : i32, i32, i32
  }
  func.func @transform_5(%arg0: i32, %arg1: i32) -> (i32, i32, i32) {
    %c0_i32 = arith.constant 0 : i32
    %c0_i32_0 = arith.constant 0 : i32
    %c0_i32_1 = arith.constant 0 : i32
    return %arg1, %c0_i32, %c0_i32_0 : i32, i32, i32
  }
  func.func @transform_6(%arg0: i32, %arg1: i32) -> (i32, i32, i32) {
    %c0_i32 = arith.constant 0 : i32
    %c0_i32_0 = arith.constant 0 : i32
    %c0_i32_1 = arith.constant 0 : i32
    return %arg1, %c0_i32, %c0_i32_0 : i32, i32, i32
  }
  func.func @transform_7(%arg0: i32, %arg1: i32) -> (i32, i32, i32) {
    %c0_i32 = arith.constant 0 : i32
    %c0_i32_0 = arith.constant 0 : i32
    %c0_i32_1 = arith.constant 0 : i32
    return %arg1, %c0_i32, %c0_i32_0 : i32, i32, i32
  }
  func.func @transform_8(%arg0: i32, %arg1: i32) -> (i32, i32, i32, i32) {
    %c0_i32 = arith.constant 0 : i32
    %c0_i32_0 = arith.constant 0 : i32
    %c0_i32_1 = arith.constant 0 : i32
    %c0_i32_2 = arith.constant 0 : i32
    return %arg1, %c0_i32, %c0_i32_0, %c0_i32_1 : i32, i32, i32, i32
  }
  func.func @transform_9(%arg0: i32, %arg1: i32) -> (i32, i32, i32, i32) {
    %c0_i32 = arith.constant 0 : i32
    %c0_i32_0 = arith.constant 0 : i32
    %c0_i32_1 = arith.constant 0 : i32
    %c0_i32_2 = arith.constant 0 : i32
    return %arg1, %c0_i32, %c0_i32_0, %c0_i32_1 : i32, i32, i32, i32
  }
  func.func @transform_10(%arg0: i32, %arg1: i32) -> (i32, i32, i32) {
    %c0_i32 = arith.constant 0 : i32
    %c0_i32_0 = arith.constant 0 : i32
    %c0_i32_1 = arith.constant 0 : i32
    return %arg1, %c0_i32, %c0_i32_0 : i32, i32, i32
  }
  func.func @transform_11(%arg0: i32, %arg1: i32) -> i32 {
    %c0_i32 = arith.constant 0 : i32
    %c0_i32_0 = arith.constant 0 : i32
    return %c0_i32 : i32
  }
  func.func @transform_12(%arg0: i32, %arg1: i32) -> i32 {
    %c0_i32 = arith.constant 0 : i32
    %c0_i32_0 = arith.constant 0 : i32
    return %c0_i32 : i32
  }
  func.func @transform_13(%arg0: i32, %arg1: i32) -> (i32, i32) {
    %c0_i32 = arith.constant 0 : i32
    %c0_i32_0 = arith.constant 0 : i32
    return %arg0, %c0_i32 : i32, i32
  }
}

</mosaic_0001>

<bundles_post_ra>
// kernel: tpu_custom_call.1
= control target key start
LH: loop header
LB: loop body
LE: loop exit
PB: predicated region body
PF: predicated region fallthrough
CT: control target
= control target key end

     0   :  { %s5988_s0 = inlined_call_operand.vmem [shape: f32[16,16], index: 0, kind: input, shape index: {}]   ;;  %s5989_s1 = inlined_call_operand.hbm [shape: bf16[16,128], index: 1, kind: input, shape index: {}]   ;;  %s5990_s2 = inlined_call_operand.hbm [shape: f32[3,128], index: 2, kind: input, shape index: {}]   ;;  %s5991_s3 = inlined_call_operand.vmem [shape: bf16[32,128], index: 3, kind: input, shape index: {}]   ;;  %s5992_s4 = inlined_call_operand.hbm [shape: f32[2,24,128], index: 4, kind: input, shape index: {}]   ;;  %s5993_s5 = inlined_call_operand.hbm [shape: f32[2,2,256], index: 5, kind: input, shape index: {}]   ;;  %s5994_s6 = inlined_call_operand.hbm [shape: bf16[2,128,384], index: 6, kind: input, shape index: {}]   ;;  %s5995_s7 = inlined_call_operand.hbm [shape: bf16[2,128,128], index: 7, kind: input, shape index: {}]   ;;  %s5996_s8 = inlined_call_operand.hbm [shape: bf16[2,2,128,256], index: 8, kind: input, shape index: {}]   ;;  %s5997_s9 = inlined_call_operand.hbm [shape: bf16[2,2,256,128], index: 9, kind: input, shape index: {}]   ;;  %s5998_s10 = inlined_call_operand.vmem [shape: f32[2,5,128], index: 10, kind: input, shape index: {}]   ;;  %s5999_s11 = inlined_call_operand.vmem [shape: f32[12], index: 11, kind: input, shape index: {}]   ;;  %s6000_s12 = inlined_call_operand.vmem [shape: s32[2], index: 12, kind: input, shape index: {}]   ;;  %s6001_s13 = inlined_call_operand.hbm [shape: f32[16,128], index: 13, kind: output, shape index: {}]  }
   0x1   :  { %6031 = sst [smem:[#allocation31_spill]] %s5988_s0 }
   0x2   :  { %6032 = sst [smem:[#allocation32_spill]] %s5989_s1 }
   0x3   :  { %6033 = sst [smem:[#allocation33_spill]] %s5991_s3 }
   0x4   :  { %6034 = sst [smem:[#allocation34_spill]] %s5992_s4 }
   0x5   :  { %6035 = sst [smem:[#allocation35_spill]] %s5993_s5 }
   0x6   :  { %6036 = sst [smem:[#allocation36_spill]] %s5994_s6 }
   0x7   :  { %6037 = sst [smem:[#allocation37_spill]] %s5995_s7 }
   0x8   :  { %6038 = sst [smem:[#allocation38_spill]] %s5998_s10 }
   0x9   :  { %6039 = sst [smem:[#allocation39_spill]] %s6001_s13 }
   0xa   :  { %18 = vsyncpa [#allocation4], 0 }
   0xb   :  { %19 = vsyncpa [#allocation8], 0 }
   0xc   :  { %20 = vsyncpa [#allocation6], 0 }
   0xd   :  { %21 = vsyncpa [#allocation17], 0 }
   0xe   :  { %22 = vsyncpa [#allocation5], 0  ;;  %s5031_s25 = smov 0   ;;  %s5033_s26 = smov 0  }
   0xf   :  { %s5035_s27 = smov 0   ;;  %s5037_s28 = smov 0  }
  0x10   :  { %s5039_s29 = smov 0   ;;  %s5041_s30 = smov 0  }
  0x11 LB: > { %6040 = sst [smem:[#allocation25_spill]] %s4915_s26  ;;  %s5060_s14 = sadd.s32 4294967295, %s4931_s30   ;;  %s4931_s30 = sphi %s5041_s30, %s28_s30   ;;  %s4927_s29 = sphi %s5039_s29, %s6101_s29   ;;  %s4923_s28 = sphi %s5037_s28, %s6100_s28   ;;  %s4919_s27 = sphi %s5035_s27, %s6098_s27   ;;  %s4915_s26 = sphi %s5033_s26, %s6097_s26   ;;  %s4911_s25 = sphi %s5031_s25, %s6096_s25  }
  0x12   : > { %6041 = sst [smem:[#allocation26_spill]] %s4919_s27  ;;  %p143_p0 = scmp.ne.s32.totalorder %s4919_s27, %s4915_s26 }
  0x13   : > { %6042 = sst [smem:[#allocation27_spill]] %s4923_s28  ;;  %p144_p1 = scmp.eq.s32.totalorder %s4931_s30, 0 }
  0x14   : > { %p149_p2 = scmp.ne.s32.totalorder %s4915_s26, %s4911_s25  ;;  %p6005_p3 = scmp.eq.s32.totalorder %s5060_s14, 0 }
  0x15   : > { %p5068_p4 = por %p144_p1, %p143_p0  ;;  %p3710_p5 = scmp.ge.s32.totalorder %s4931_s30, 1 }
  0x16   : > { %p5075_p6 = por %p6005_p3, %p149_p2  ;;  %p384_p7 = scmp.lt.s32.totalorder %s4931_s30, 3 }
  0x17   : > { %s6043_s16 = scalar_select %p5068_p4, 1, 0 }
  0x18   : > { %s6044_s17 = scalar_select %p5075_p6, 1, 0 }
  0x19   : > { %p5080_p8 = pnand %p3710_p5, %p384_p7  ;;  %s4933_s19 = smov [#allocation3]  }
  0x1a   : > { %6045 = sst [smem:[#allocation28_spill]] %s6044_s17  ;;  %s405_s20 = sshll.u32 %s4933_s19, 4  ;;  %s406_s20 = int_to_ptr.vmem [resolvable:$true] %s405_s20 }
  0x1b   : > { %s6046_s18 = scalar_select %p5080_p8, 1, 0 }
  0x1c   : > { %p4269_p9 = pneg %p5080_p8  ;;  %s37_s22 = sadd.s32 1, %s4927_s29 }
  0x1d   : > { %p5094_p12 = scmp.ge.s32.totalorder %s37_s22, 2  ;;  %s6049_s1 = sld [smem:[#allocation32_spill]] }
  0x1e   : > { %p5088_p10 = pnand %p4269_p9, %p6005_p3 }
  0x1f   : > { %s6048_s23 = scalar_select %p5094_p12, 1, 0 }
  0x20   : > { %s6047_s21 = scalar_select %p5088_p10, 1, 0 }
  0x21   : > { %p5106_p0 = pneg %p5088_p10 }
  0x23   : > { %s4569_s15 = scalar_lea.hbm %s6049_s1, 128 }
  0x24   : > { %p4570_p13 = scmp.ne.s32.totalorder %s6049_s1, %s4569_s15  ;;  %p4576_p5 = scmp.lt.u32.totalorder %s4569_s15, %s6049_s1 }
  0x25   : > { %s6050_s3 = scalar_select %p5106_p0, 1, 0 }
  0x26   : > { %p4572_p1 = pnand %p5106_p0, %p4570_p13 }
  0x28   : > { %p4573_p2 = pneg %p4572_p1 }
  0x2a   : > { %p4578_p7 = pnand %p4576_p5, %p4573_p2 }
  0x2c   : > { %4581 = shalt.err (!%p4578_p7)
}
  0x2d   : > { %s4582_s24 = scalar_lea.vmem %s406_s20, 128  ;;  %p4590_p6 = scmp.lt.s32.totalorder %s406_s20, %s406_s20 }
  0x2e   : > { %p4583_p9 = scmp.ne.s32.totalorder %s406_s20, %s4582_s24  ;;  %p4591_p8 = scmp.lt.s32.totalorder %s4582_s24, %s4582_s24 }
  0x30   : > { %p4585_p3 = pnand %p4583_p9, %p5106_p0  ;;  %p4592_p4 = por %p4591_p8, %p4590_p6 }
  0x32   : > { %p4586_p11 = pneg %p4585_p3 }
  0x34   : > { %p4593_p12 = pnand %p4592_p4, %p4586_p11 }
  0x36   : > { %4596 = shalt.err (!%p4593_p12)
}
  0x37   : > { %s6012_s13 = smov 64   ;;  %s6014_s0 = smov 4  }
  0x38   : > { %4272 = dma.hbm_to_vmem [thread:$0]  (!%p5088_p10), %s6049_s1, 128, %s406_s20, [#allocation4], %s6012_s13, %s6012_s13, %s6014_s0  }
  0x39   : > { %p6051_p3 = scmp.ne.s32.totalorder %s6048_s23, 0  ;;  %s455_s25 = sand.u32 1, %s4931_s30  }
  0x3a   : > { %s5131_s19 = sand.u32 1, %s4919_s27   ;;  %s4232_s17 = smul.u32 384, %s4927_s29 }
  0x3b   : > { %s6103_s22 = smov (%p6051_p3, %s37_s22), 0  ;;  %s4231_s28 = smul.u32 24, %s5131_s19 }
  0x3c   : > { %6052 = sst [smem:[#allocation29_spill]] %s6103_s22  ;;  %s133_s24 = ssub.s32 %s4927_s29, %s6103_s22 }
  0x3d   : > { %p134_p4 = scmp.eq.s32.totalorder %s133_s24, 0  ;;  %p6053_p6 = scmp.ne.s32.totalorder %s6043_s16, 0 }
  0x3e   : > { %p6054_p8 = scmp.lt.s32.totalorder %s4931_s30, 2  ;;  %s6056_s20 = sadd.s32 1, %s4919_s27 }
  0x3f   : > { %s5148_s23 = scalar_select %p134_p4, %s4919_s27, %s6056_s20  }
  0x40   : > { %p5141_p11 = pnand %p6054_p8, %p6053_p6  ;;  %s6058_s4 = sld [smem:[#allocation34_spill]] }
  0x41   : > { %6057 = sst [smem:[#allocation30_spill]] %s5148_s23  ;;  %s459_s24 = scalar_lea.vmem [#allocation9], %s4231_s28 }
  0x42   : > { %s6055_s26 = scalar_select %p5141_p11, 1, 0 }
  0x43   : > { %s466_s16 = sshll.u32 %s459_s24, 4  ;;  %s3718_s0 = sshll.u32 %s5131_s19, 2  ;;  %s5155_s16 = int_to_ptr.vmem [resolvable:$true] %s466_s16 }
  0x44   : > { %s5158_s1 = scalar_lea.sflag [#allocation4], %s455_s25  ;;  %p5164_p13 = pneg %p5141_p11 }
  0x46   : > { %s5153_s13 = scalar_lea.hbm %s6058_s4, %s4232_s17  ;;  %s4602_s28 = scalar_lea.hbm %s6058_s4, 768 }
  0x47   : > { %s4597_s22 = scalar_lea.hbm %s5153_s13, 384  ;;  %p4603_p5 = scmp.lt.u32.totalorder %s5153_s13, %s6058_s4 }
  0x48   : > { %p4598_p12 = scmp.ne.s32.totalorder %s5153_s13, %s4597_s22  ;;  %p4604_p7 = scmp.lt.u32.totalorder %s4602_s28, %s4597_s22 }
  0x49   : > { %s6059_s20 = scalar_select %p5164_p13, 1, 0 }
  0x4a   : > { %p4600_p1 = pnand %p5164_p13, %p4598_p12  ;;  %p4605_p9 = por %p4604_p7, %p4603_p5 }
  0x4b   : > { %p4606_p3 = scmp.lt.u32.totalorder %s4597_s22, %s5153_s13 }
  0x4c   : > { %p4601_p2 = pneg %p4600_p1 }
  0x4d   : > { %p4607_p4 = por %p4606_p3, %p4605_p9 }
  0x4f   : > { %p4608_p6 = pnand %p4607_p4, %p4601_p2 }
  0x51   : > { %4611 = shalt.err (!%p4608_p6)
}
  0x52   : > { %s4612_s25 = scalar_lea.vmem %s5155_s16, 384  ;;  %s4936_s17 = smov [#allocation9]  }
  0x53   : > { %p4613_p8 = scmp.ne.s32.totalorder %s5155_s16, %s4612_s25  ;;  %s4617_s10 = sshll.u32 %s4936_s17, 4  ;;  %s4618_s10 = int_to_ptr.vmem [resolvable:$false] %s4617_s10 }
  0x54   : > { %s4619_s15 = scalar_lea.vmem %s4618_s10, 768  ;;  %p4620_p10 = scmp.lt.s32.totalorder %s5155_s16, %s4618_s10 }
  0x55   : > { %p4615_p12 = pnand %p4613_p8, %p5164_p13  ;;  %p4621_p0 = scmp.lt.s32.totalorder %s4619_s15, %s4612_s25 }
  0x57   : > { %p4616_p1 = pneg %p4615_p12  ;;  %p4622_p5 = por %p4621_p0, %p4620_p10 }
  0x59   : > { %p4623_p7 = pnand %p4622_p5, %p4616_p1 }
  0x5b   : > { %4626 = shalt.err (!%p4623_p7)
}
  0x5c   : > { %s6022_s22 = smov 128   ;;  %s6025_s28 = smov 8  }
  0x5d   : > { %4285 = dma.hbm_to_vmem [thread:$0]  (!%p5141_p11), %s5153_s13, 384, %s5155_s16, %s5158_s1, %s6022_s22, %s6022_s22, %s6025_s28  }
  0x5e   : > { %s3945_s24 = sshll.u32 %s4927_s29, 6  ;;  %s6060_s5 = sld [smem:[#allocation35_spill]] }
  0x5f   : > { %s480_s15 = scalar_lea.vmem [#allocation10], %s3718_s0  ;;  %s4233_s23 = smul.u32 192, %s5131_s19 }
  0x60   : > { %s488_s4 = sshll.u32 %s480_s15, 4  ;;  %s489_s4 = int_to_ptr.vmem [resolvable:$true] %s488_s4 }
  0x64   : > { %s5195_s10 = scalar_lea.hbm %s6060_s5, %s3945_s24  ;;  %s4632_s25 = scalar_lea.hbm %s6060_s5, 128 }
  0x65   : > { %s4627_s27 = scalar_lea.hbm %s5195_s10, 64  ;;  %p4633_p9 = scmp.lt.u32.totalorder %s5195_s10, %s6060_s5 }
  0x66   : > { %p4628_p10 = scmp.ne.s32.totalorder %s5195_s10, %s4627_s27  ;;  %p4634_p3 = scmp.lt.u32.totalorder %s4632_s25, %s4627_s27 }
  0x67   : > { %p4636_p6 = scmp.lt.u32.totalorder %s4627_s27, %s5195_s10 }
  0x68   : > { %p4630_p0 = pnand %p4628_p10, %p5164_p13  ;;  %p4635_p4 = por %p4634_p3, %p4633_p9 }
  0x6a   : > { %p4631_p2 = pneg %p4630_p0  ;;  %p4637_p8 = por %p4636_p6, %p4635_p4 }
  0x6c   : > { %p4638_p12 = pnand %p4637_p8, %p4631_p2 }
  0x6e   : > { %4641 = shalt.err (!%p4638_p12)
}
  0x6f   : > { %s4642_s0 = scalar_lea.vmem %s489_s4, 64  ;;  %s4939_s15 = smov [#allocation10]  }
  0x70   : > { %p4643_p1 = scmp.ne.s32.totalorder %s489_s4, %s4642_s0  ;;  %s4647_s22 = sshll.u32 %s4939_s15, 4  ;;  %s4648_s22 = int_to_ptr.vmem [resolvable:$false] %s4647_s22 }
  0x71   : > { %s4649_s13 = scalar_lea.vmem %s4648_s22, 128  ;;  %p4650_p10 = scmp.lt.s32.totalorder %s489_s4, %s4648_s22 }
  0x72   : > { %p4645_p5 = pnand %p4643_p1, %p5164_p13  ;;  %p4651_p0 = scmp.lt.s32.totalorder %s4649_s13, %s4642_s0 }
  0x74   : > { %p4646_p7 = pneg %p4645_p5  ;;  %p4652_p11 = por %p4651_p0, %p4650_p10 }
  0x76   : > { %p4653_p3 = pnand %p4652_p11, %p4646_p7 }
  0x78   : > { %4656 = shalt.err (!%p4653_p3)
}
  0x79   : > { %p6061_p9 = scmp.ne.s32.totalorder %s6055_s26, 0  ;;  %s4234_s27 = smul.u32 3072, %s4927_s29 }
  0x7a   : > { %s499_s16 = scalar_lea.vmem [#allocation11], %s4233_s23  ;;  %s6062_s6 = sld [smem:[#allocation36_spill]] }
  0x7b   : > { %4288 = dma.hbm_to_vmem [thread:$0]  (!%p6061_p9), %s5195_s10, 64, %s489_s4, %s5158_s1  }
  0x7c   : > { %s506_s25 = sshll.u32 %s499_s16, 4  ;;  %s3722_s22 = sshll.u32 %s5131_s19, 6  ;;  %s5224_s25 = int_to_ptr.vmem [resolvable:$true] %s506_s25 }
  0x80   : > { %s5222_s15 = scalar_lea.hbm %s6062_s6, %s4234_s27  ;;  %s4662_s10 = scalar_lea.hbm %s6062_s6, 6144 }
  0x81   : > { %s4657_s0 = scalar_lea.hbm %s5222_s15, 3072  ;;  %p4663_p6 = scmp.lt.u32.totalorder %s5222_s15, %s6062_s6 }
  0x82   : > { %p4658_p11 = scmp.ne.s32.totalorder %s5222_s15, %s4657_s0  ;;  %p4664_p8 = scmp.lt.u32.totalorder %s4662_s10, %s4657_s0 }
  0x83   : > { %p4666_p1 = scmp.lt.u32.totalorder %s4657_s0, %s5222_s15 }
  0x84   : > { %p4660_p2 = pnand %p4658_p11, %p5164_p13  ;;  %p4665_p12 = por %p4664_p8, %p4663_p6 }
  0x86   : > { %p4661_p4 = pneg %p4660_p2  ;;  %p4667_p5 = por %p4666_p1, %p4665_p12 }
  0x88   : > { %p4668_p7 = pnand %p4667_p5, %p4661_p4 }
  0x8a   : > { %4671 = shalt.err (!%p4668_p7)
}
  0x8b   : > { %s4672_s27 = scalar_lea.vmem %s5224_s25, 3072  ;;  %s4940_s24 = smov [#allocation11]  }
  0x8c   : > { %p4673_p10 = scmp.ne.s32.totalorder %s5224_s25, %s4672_s27  ;;  %s4677_s17 = sshll.u32 %s4940_s24, 4  ;;  %s4678_s17 = int_to_ptr.vmem [resolvable:$false] %s4677_s17 }
  0x8d   : > { %s4679_s4 = scalar_lea.vmem %s4678_s17, 6144  ;;  %p4680_p11 = scmp.lt.s32.totalorder %s5224_s25, %s4678_s17 }
  0x8e   : > { %p4675_p0 = pnand %p4673_p10, %p5164_p13  ;;  %p4681_p2 = scmp.lt.s32.totalorder %s4679_s4, %s4672_s27 }
  0x90   : > { %p4676_p3 = pneg %p4675_p0  ;;  %p4682_p6 = por %p4681_p2, %p4680_p11 }
  0x92   : > { %p4683_p8 = pnand %p4682_p6, %p4676_p3 }
  0x94   : > { %4686 = shalt.err (!%p4683_p8)
}
  0x95   : > { %s4941_s0 = smov 192   ;;  %s4942_s23 = smov 12  }
  0x96   : > { %4291 = dma.hbm_to_vmem [thread:$0]  (!%p6061_p9), %s5222_s15, 3072, %s5224_s25, %s5158_s1, %s4941_s0, %s4941_s0, %s4942_s23  }
  0x97   : > { %s3946_s10 = sshll.u32 %s4927_s29, 10  ;;  %s6063_s7 = sld [smem:[#allocation37_spill]] }
  0x98   : > { %s520_s24 = scalar_lea.vmem [#allocation12], %s3722_s22  ;;  %s6026_s4 = sshll.u32 %s5131_s19, 8 }
  0x99   : > { %s527_s17 = sshll.u32 %s520_s24, 4  ;;  %s5257_s17 = int_to_ptr.vmem [resolvable:$true] %s527_s17 }
  0x9d   : > { %s5253_s27 = scalar_lea.hbm %s6063_s7, %s3946_s10  ;;  %s4692_s0 = scalar_lea.hbm %s6063_s7, 2048 }
  0x9e   : > { %s4687_s28 = scalar_lea.hbm %s5253_s27, 1024  ;;  %p4693_p5 = scmp.lt.u32.totalorder %s5253_s27, %s6063_s7 }
  0x9f   : > { %p4688_p4 = scmp.ne.s32.totalorder %s5253_s27, %s4687_s28  ;;  %p4694_p7 = scmp.lt.u32.totalorder %s4692_s0, %s4687_s28 }
  0xa0   : > { %p4696_p0 = scmp.lt.u32.totalorder %s4687_s28, %s5253_s27 }
  0xa1   : > { %p4690_p12 = pnand %p4688_p4, %p5164_p13  ;;  %p4695_p10 = por %p4694_p7, %p4693_p5 }
  0xa3   : > { %p4691_p1 = pneg %p4690_p12  ;;  %p4697_p3 = por %p4696_p0, %p4695_p10 }
  0xa5   : > { %p4698_p11 = pnand %p4697_p3, %p4691_p1 }
  0xa7   : > { %4701 = shalt.err (!%p4698_p11)
}
  0xa8   : > { %s4702_s22 = scalar_lea.vmem %s5257_s17, 1024  ;;  %s4943_s13 = smov [#allocation12]  }
  0xa9   : > { %p4703_p2 = scmp.ne.s32.totalorder %s5257_s17, %s4702_s22  ;;  %s4707_s16 = sshll.u32 %s4943_s13, 4  ;;  %s4708_s16 = int_to_ptr.vmem [resolvable:$false] %s4707_s16 }
  0xaa   : > { %s4709_s24 = scalar_lea.vmem %s4708_s16, 2048  ;;  %p4710_p4 = scmp.lt.s32.totalorder %s5257_s17, %s4708_s16 }
  0xab   : > { %p4705_p6 = pnand %p4703_p2, %p5164_p13  ;;  %p4711_p12 = scmp.lt.s32.totalorder %s4709_s24, %s4702_s22 }
  0xad   : > { %p4706_p8 = pneg %p4705_p6  ;;  %p4712_p5 = por %p4711_p12, %p4710_p4 }
  0xaf   : > { %p4713_p7 = pnand %p4712_p5, %p4706_p8 }
  0xb1   : > { %4716 = shalt.err (!%p4713_p7)
}
  0xb2   : > { %s6064_s28 = smov 4   ;;  %s6065_s25 = smov 64  }
  0xb3   : > { %4294 = dma.hbm_to_vmem [thread:$0]  (!%p6061_p9), %s5253_s27, 1024, %s5257_s17, %s5158_s1, %s6065_s25, %s6065_s25, %s6064_s28  }
  0xb4   : > { %s6027_s15 = sshll.u32 %s4927_s29, 12  ;;  %s541_s22 = scalar_lea.vmem [#allocation13], %s6026_s4 }
  0xb5   : > { %s5291_s10 = scalar_lea.hbm %s5996_s8, %s6027_s15  ;;  %s548_s13 = sshll.u32 %s541_s22, 4  ;;  %s5295_s13 = int_to_ptr.vmem [resolvable:$true] %s548_s13 }
  0xb6   : > { %s4717_s16 = scalar_lea.hbm %s5291_s10, 4096  ;;  %s4722_s24 = scalar_lea.hbm %s5996_s8, 8192 }
  0xb7   : > { %p4718_p1 = scmp.ne.s32.totalorder %s5291_s10, %s4717_s16  ;;  %p4723_p3 = scmp.lt.u32.totalorder %s5291_s10, %s5996_s8 }
  0xb8   : > { %p4724_p11 = scmp.lt.u32.totalorder %s4722_s24, %s4717_s16  ;;  %p4726_p6 = scmp.lt.u32.totalorder %s4717_s16, %s5291_s10 }
  0xb9   : > { %p4720_p10 = pnand %p4718_p1, %p5164_p13 }
  0xba   : > { %p4725_p2 = por %p4724_p11, %p4723_p3 }
  0xbb   : > { %p4721_p0 = pneg %p4720_p10 }
  0xbc   : > { %p4727_p8 = por %p4726_p6, %p4725_p2 }
  0xbe   : > { %p4728_p4 = pnand %p4727_p8, %p4721_p0 }
  0xc0   : > { %4731 = shalt.err (!%p4728_p4)
}
  0xc1   : > { %s4732_s22 = scalar_lea.vmem %s5295_s13, 4096  ;;  %s4944_s27 = smov [#allocation13]  }
  0xc2   : > { %p4733_p12 = scmp.ne.s32.totalorder %s5295_s13, %s4732_s22  ;;  %s4737_s17 = sshll.u32 %s4944_s27, 4  ;;  %s4738_s17 = int_to_ptr.vmem [resolvable:$false] %s4737_s17 }
  0xc3   : > { %s4739_s0 = scalar_lea.vmem %s4738_s17, 8192  ;;  %p4740_p1 = scmp.lt.s32.totalorder %s5295_s13, %s4738_s17 }
  0xc4   : > { %p4735_p5 = pnand %p4733_p12, %p5164_p13  ;;  %p4741_p10 = scmp.lt.s32.totalorder %s4739_s0, %s4732_s22 }
  0xc6   : > { %p4736_p7 = pneg %p4735_p5  ;;  %p4742_p3 = por %p4741_p10, %p4740_p1 }
  0xc8   : > { %p4743_p11 = pnand %p4742_p3, %p4736_p7 }
  0xca   : > { %4746 = shalt.err (!%p4743_p11)
}
  0xcb   : > { %s6066_s16 = smov 8   ;;  %s6067_s24 = smov 128  }
  0xcc   : > { %4297 = dma.hbm_to_vmem [thread:$0]  (!%p6061_p9), %s5291_s10, 4096, %s5295_s13, %s5158_s1, %s6067_s24, %s6067_s24, %s6066_s16  }
  0xcd   : > { %s4945_s23 = smov [#allocation7]   ;;  %s433_s17 = sshll.u32 %s5999_s11, 4  ;;  %s5325_s17 = int_to_ptr.vmem [resolvable:$true] %s433_s17 }
  0xce   : > { %s419_s4 = sshll.u32 %s4945_s23, 4  ;;  %s4747_s5 = scalar_lea.hbm %s5990_s2, 64  ;;  %s420_s4 = int_to_ptr.vmem [resolvable:$true] %s419_s4 }
  0xcf   : > { %p4748_p0 = scmp.ne.s32.totalorder %s5990_s2, %s4747_s5  ;;  %p6068_p2 = scmp.ne.s32.totalorder %s6050_s3, 0 }
  0xd0   : > { %p4754_p4 = scmp.lt.u32.totalorder %s4747_s5, %s5990_s2 }
  0xd1   : > { %p4750_p6 = pnand %p4748_p0, %p6068_p2 }
  0xd3   : > { %p4751_p8 = pneg %p4750_p6 }
  0xd5   : > { %p4756_p12 = pnand %p4754_p4, %p4751_p8 }
  0xd7   : > { %4759 = shalt.err (!%p4756_p12)
}
  0xd8   : > { %s4760_s15 = scalar_lea.vmem %s420_s4, 64  ;;  %p4768_p10 = scmp.lt.s32.totalorder %s420_s4, %s420_s4 }
  0xd9   : > { %p4761_p5 = scmp.ne.s32.totalorder %s420_s4, %s4760_s15  ;;  %p4769_p3 = scmp.lt.s32.totalorder %s4760_s15, %s4760_s15 }
  0xdb   : > { %p4763_p7 = pnand %p4761_p5, %p6068_p2  ;;  %p4770_p11 = por %p4769_p3, %p4768_p10 }
  0xdd   : > { %p4764_p1 = pneg %p4763_p7 }
  0xdf   : > { %p4771_p9 = pnand %p4770_p11, %p4764_p1 }
  0xe1   : > { %4774 = shalt.err (!%p4771_p9)
}
  0xe2   : > { %p6069_p0 = scmp.ne.s32.totalorder %s6047_s21, 0  ;;  %s444_s24 = sshll.u32 %s6000_s12, 4  ;;  %s445_s24 = int_to_ptr.vmem [resolvable:$true] %s444_s24 }
  0xe3   : > { %s4775_s23 = scalar_lea.vmem %s5325_s17, 16  ;;  %p4783_p9 = scmp.lt.s32.totalorder %s5325_s17, %s5325_s17 }
  0xe4   : > { %4275 = dma.hbm_to_vmem [thread:$0]  (!%p6069_p0), %s5990_s2, 64, %s420_s4, [#allocation8]  }
  0xe5   : > { %p4776_p6 = scmp.ne.s32.totalorder %s5325_s17, %s4775_s23  ;;  %p4784_p12 = scmp.lt.s32.totalorder %s4775_s23, %s4775_s23 }
  0xe7   : > { %p4778_p8 = pnand %p4776_p6, %p6068_p2  ;;  %p4785_p5 = por %p4784_p12, %p4783_p9 }
  0xe9   : > { %p4779_p4 = pneg %p4778_p8 }
  0xeb   : > { %p4786_p7 = pnand %p4785_p5, %p4779_p4 }
  0xed   : > { %4789 = shalt.err (!%p4786_p7)
}
  0xee   : > { %s4946_s27 = smov [#allocation15]   ;;  %s4790_s4 = scalar_lea.vmem %s445_s24, 16 }
  0xef   : > { %4278 = dma.vmem_to_smem (!%p6069_p0), %s5325_s17, 16, %s4946_s27, [#allocation6]  }
  0xf0   : > { %p4791_p1 = scmp.ne.s32.totalorder %s445_s24, %s4790_s4  ;;  %p4798_p11 = scmp.lt.s32.totalorder %s445_s24, %s445_s24 }
  0xf1   : > { %p4799_p6 = scmp.lt.s32.totalorder %s4790_s4, %s4790_s4 }
  0xf2   : > { %p4793_p10 = pnand %p4791_p1, %p6068_p2 }
  0xf3   : > { %p4800_p8 = por %p4799_p6, %p4798_p11 }
  0xf4   : > { %p4794_p3 = pneg %p4793_p10 }
  0xf6   : > { %p4801_p13 = pnand %p4800_p8, %p4794_p3 }
  0xf8   : > { %4804 = shalt.err (!%p4801_p13)
}
  0xf9   : > { %s4947_s22 = smov [#allocation16]   ;;  %s6070_s0 = sshll.u32 %s4927_s29, 12 }
  0xfa   : > { %4281 = dma.vmem_to_smem (!%p6069_p0), %s445_s24, 16, %s4947_s22, [#allocation17]  }
  0xfb   : > { %s5366_s13 = scalar_lea.hbm %s5997_s9, %s6070_s0  ;;  %s6071_s3 = sshll.u32 %s5131_s19, 8 }
  0xfc   : > { %s562_s15 = scalar_lea.vmem [#allocation14], %s6071_s3  ;;  %s4805_s21 = scalar_lea.hbm %s5366_s13, 4096 }
  0xfd   : > { %s569_s6 = sshll.u32 %s562_s15, 4  ;;  %p4806_p13 = scmp.ne.s32.totalorder %s5366_s13, %s4805_s21  ;;  %s5370_s6 = int_to_ptr.vmem [resolvable:$true] %s569_s6 }
  0xfe   : > { %p6072_p2 = scmp.ne.s32.totalorder %s6059_s20, 0  ;;  %s4810_s16 = scalar_lea.hbm %s5997_s9, 8192 }
  0xff   : > { %p4811_p9 = scmp.lt.u32.totalorder %s5366_s13, %s5997_s9  ;;  %p4812_p12 = scmp.lt.u32.totalorder %s4810_s16, %s4805_s21 }
 0x100   : > { %p4808_p4 = pnand %p4806_p13, %p6072_p2  ;;  %p4814_p7 = scmp.lt.u32.totalorder %s4805_s21, %s5366_s13 }
 0x101   : > { %p4813_p5 = por %p4812_p12, %p4811_p9 }
 0x102   : > { %p4809_p0 = pneg %p4808_p4 }
 0x103   : > { %p4815_p1 = por %p4814_p7, %p4813_p5 }
 0x105   : > { %p4816_p10 = pnand %p4815_p1, %p4809_p0 }
 0x107   : > { %4819 = shalt.err (!%p4816_p10)
}
 0x108   : > { %s4820_s19 = scalar_lea.vmem %s5370_s6, 4096  ;;  %s4948_s27 = smov [#allocation14]  }
 0x109   : > { %p4821_p3 = scmp.ne.s32.totalorder %s5370_s6, %s4820_s19  ;;  %s4825_s4 = sshll.u32 %s4948_s27, 4  ;;  %s4826_s4 = int_to_ptr.vmem [resolvable:$false] %s4825_s4 }
 0x10a   : > { %s4827_s22 = scalar_lea.vmem %s4826_s4, 8192  ;;  %p4828_p8 = scmp.lt.s32.totalorder %s5370_s6, %s4826_s4 }
 0x10b   : > { %p4823_p11 = pnand %p4821_p3, %p6072_p2  ;;  %p4829_p13 = scmp.lt.s32.totalorder %s4827_s22, %s4820_s19 }
 0x10d   : > { %p4824_p6 = pneg %p4823_p11  ;;  %p4830_p4 = por %p4829_p13, %p4828_p8 }
 0x10f   : > { %p4831_p9 = pnand %p4830_p4, %p4824_p6 }
 0x111   : > { %4834 = shalt.err (!%p4831_p9)
}
 0x112   : > { %p6073_p0 = scmp.ne.s32.totalorder %s6055_s26, 0  ;;  %p6074_p2 = scmp.ne.s32.totalorder %s6046_s18, 0 }
 0x113   : > { %p6075_p12 = scmp.eq.s32.totalorder (!%p6074_p2), %s5060_s14, 0 }
 0x114   : > { %4300 = dma.hbm_to_vmem [thread:$0]  (!%p6073_p0), %s5366_s13, 4096, %s5370_s6, %s5158_s1, %s6065_s25, %s6065_s25, %s6064_s28  }
 0x115   : > { %588 = sbr.rel (%p6074_p2) target bundleno = 7019 (0x1b6b), region = 72 }
 0x11c   : > { %4886 = dma.done.wait (%p6075_p12), [#allocation4], 128   ;;  %p6076_p5 = pmov %p6075_p12 }
 0x11e   : > { %4888 = vsyncadd (%p6076_p5), [#allocation4], 4294967168  ;;  %p6077_p7 = pmov %p6076_p5 }
 0x11f   : > { %p6078_p1 = pmov %p6076_p5 }
 0x120   : > { %4890 = dma.done.wait (%p6077_p7), [#allocation8], 64  }
 0x121   : > { %4892 = vsyncadd (%p6078_p1), [#allocation8], 4294967232  ;;  %s6079_s26 = sld [smem:[#allocation25_spill]]  ;;  %s6080_s20 = sld [smem:[#allocation28_spill]] }
 0x122   : > { %s598_s0 = sand.u32 1, %s5060_s14  }
 0x123   : > { %s599_s18 = scalar_lea.sflag [#allocation4], %s598_s0 }
 0x127   : > { %s600_s1 = sand.u32 1, %s6079_s26   ;;  %p6081_p10 = scmp.ne.s32.totalorder %s6080_s20, 0 }
 0x128   : > { %s4235_s28 = smul.u32 24, %s600_s1 }
 0x12a   : > { %s5409_s25 = scalar_lea.vmem [#allocation9], %s4235_s28 }
 0x12b   : > { %4894 = dma.done.wait (%p6081_p10), %s599_s18, 12736  }
 0x12c   : > { %4896 = vsyncadd (%p6081_p10), %s599_s18, 4294954560  ;;  %s3734_s17 = sshll.u32 %s600_s1, 2  ;;  %s4236_s10 = smul.u32 192, %s600_s1 }
 0x12d   : > { %s3735_s13 = sshll.u32 %s600_s1, 6  ;;  %s3736_s3 = sshll.u32 %s600_s1, 8 }
 0x12e   : > { %s5415_s15 = scalar_lea.vmem [#allocation10], %s3734_s17  ;;  %s5417_s6 = scalar_lea.vmem [#allocation11], %s4236_s10 }
 0x12f   : > { %s5419_s21 = scalar_lea.vmem [#allocation12], %s3735_s13  ;;  %s5421_s7 = scalar_lea.vmem [#allocation13], %s3736_s3 }
 0x130   : > { %s5423_s5 = scalar_lea.vmem [#allocation14], %s3736_s3  ;;  %p6082_p3 = pmov %p6078_p1 }
 0x131   : > { %p6083_p11 = pmov %p6078_p1 }
 0x132   : > { %4898 = dma.done.wait (%p6082_p3), [#allocation6], 16  }
 0x133   : > { %4900 = vsyncadd (%p6083_p11), [#allocation6], 4294967280  ;;  %p6084_p6 = pmov %p6078_p1 }
 0x134   : > { %p6085_p8 = pmov %p6078_p1 }
 0x135   : > { %4902 = dma.done.wait (%p6084_p6), [#allocation17], 16  }
 0x136   : > { %4904 = vsyncadd (%p6085_p8), [#allocation17], 4294967280 }
 0x137   : > { %660 = sfence }
 0x138   : > { %s6086_s16 = sld [smem:[#allocation27_spill]]  ;;  %s6087_s4 = sld [smem:[#allocation38_spill]] }
 0x13e   : > { %p734_p13 = scmp.lt.s32.totalorder %s6086_s16, 1  ;;  %p3741_p4 = scmp.ne.s32.totalorder %s6086_s16, 0 }
 0x13f   : > { %v4382_v0 = vld [vmem:[#allocation3] sm:$0xff] (!%p3741_p4)   ;;  %v4949_v1 = vmov (!%p3741_p4), 0.0   ;;  %s6088_s0 = sld [smem:[#allocation31_spill]] (!%p3741_p4)  ;;  %vm4950_vm0 = vmmov (!%p3741_p4), 0   ;;  %vm760_vm1 = vcmask (!%p3741_p4), 130048  }
 0x140   : > { %s735_s24 = scalar_select %p734_p13, %s6086_s16, 1 }
 0x141   : > { %743 = sbr.rel (%p3741_p4) target bundleno = 860 (0x35c), region = 116  ;;  %4057 = vmatprep.subr.bf16.mxu0 (!%p3741_p4), %v4949_v1  ;;  %4059 = vmatprep.mubr.msk.bf16.mxu0 (!%p3741_p4), %vm4950_vm0, %v4949_v1  ;;  %v3742_v5 = vld [vmem:[#allocation7] ss:$0 sm:$0xff] (!%p3741_p4)  ;;  %v3745_v27 = vld [vmem:[#allocation7 + $0x1] ss:$0 sm:$0xff] (!%p3741_p4) }
 0x142   : > { %s3740_s23 = sshll.u32 %s735_s24, 3  ;;  %4058 = vmatpush3.bf16.msra.mxu0 (!%p3741_p4), %v4382_v0  ;;  %v3746_v29 = vld [vmem:[#allocation7 + $0x2] ss:$0 sm:$0xff] (!%p3741_p4) }
 0x143   : > { %s5438_s22 = scalar_lea.vmem %s6087_s4, %s3740_s23 }
 0x145   : > { %v744_v2 = vld [vmem:[%s6088_s0] sm:$0xff] (!%p3741_p4)  ;;  %v745_v3 = vld [vmem:[%s6088_s0 + $0x8] sm:$0xff] (!%p3741_p4) }
 0x146   : > { %v746_v4 = vpack.c.bf16 (!%p3741_p4), %v745_v3, %v744_v2 }
 0x148   : > { %4060 = vmatmul.mubr.msk.bf16.vlgmr.msra.gmra.mrb[0].mxu0 %vm760_vm1, %v746_v4 }
 0x21b   : > { %v798_v6 = vpop.f32.mrb[0].mxu0 }
 0x21c   : > { %v799_v7 = vadd.f32 %v3742_v5, %v798_v6  ;;  %v4061_v8 = vpop.f32.mrb[1].mxu0 }
 0x21d   : > { %v801_v9 = vpop.f32.mrb[2].mxu0 }
 0x21e   : > { %807 = vadd.xlane.f32.xlu0 %v799_v7  ;;  %v4062_v10 = vpop.f32.mrb[3].mxu0  ;;  %v802_v11 = vadd.f32 %v3742_v5, %v801_v9 }
 0x222   : > { %809 = vadd.xlane.f32.xlu0 %v802_v11 }
 0x2ab   : > { %v808_v12 = vpop.xlane.xlu0 %807 }
 0x2ac   : > { %v812_v13 = vmul.f32 0.0078125, %v808_v12 }
 0x2ae   : > { %v814_v14 = vsub.f32 %v799_v7, %v812_v13 }
 0x2af   : > { %v810_v15 = vpop.xlane.xlu0 %809 }
 0x2b0   : > { %v813_v16 = vmul.f32 0.0078125, %v810_v15  ;;  %v816_v17 = vmul.f32 %v814_v14, %v814_v14 }
 0x2b2   : > { %v815_v18 = vsub.f32 %v802_v11, %v813_v16  ;;  %818 = vadd.xlane.f32.xlu1 %v816_v17 }
 0x2b4   : > { %v817_v19 = vmul.f32 %v815_v18, %v815_v18 }
 0x2b6   : > { %820 = vadd.xlane.f32.xlu1 %v817_v19 }
 0x33f   : > { %v819_v20 = vpop.xlane.xlu1 %818 }
 0x340   : > { %v822_v21 = vmul.f32 0.0078125, %v819_v20 }
 0x342   : > { %v824_v22 = vadd.f32 1e-05, %v822_v21 }
 0x343   : > { %v821_v23 = vpop.xlane.xlu1 %820 }
 0x344   : > { %4383 = vrsqrt.f32 %v824_v22  ;;  %v823_v24 = vmul.f32 0.0078125, %v821_v23 }
 0x346   : > { %v825_v25 = vadd.f32 1e-05, %v823_v24 }
 0x348   : > { %4385 = vrsqrt.f32 %v825_v25 }
 0x34e   : > { %v4384_v26 = vpop.eup %4383 }
 0x34f   : > { %v828_v28 = vmul.f32 %v4384_v26, %v814_v14 }
 0x351   : > { %v834_v30 = vmul.f32 %v3745_v27, %v828_v28 }
 0x352   : > { %v4386_v31 = vpop.eup %4385 }
 0x353   : > { %v840_v32 = vadd.f32 %v3746_v29, %v834_v30  ;;  %v829_v33 = vmul.f32 %v4386_v31, %v815_v18 }
 0x355   : > { %v842_v34 = vmax.f32 %v840_v32, 0.0  ;;  %v835_v35 = vmul.f32 %v3745_v27, %v829_v33 }
 0x357   : > { %844 = vst [vmem:[#allocation18] sm:$0xff] %v842_v34  ;;  %v841_v36 = vadd.f32 %v3746_v29, %v835_v35 }
 0x359   : > { %v843_v37 = vmax.f32 %v841_v36, 0.0 }
 0x35b   : > { %845 = vst [vmem:[#allocation18 + $0x8] sm:$0xff] %v843_v37 }
 0x35c PF: > { %v4387_v40 = vld [vmem:[%s5421_s7 + $0x4] ss:$8 sps:$4 sm:$0xff]   ;;  %v4389_v41 = vld [vmem:[%s5421_s7] ss:$8 sps:$4 sm:$0xff]   ;;  %v4390_v42 = vld [vmem:[%s5421_s7 + $0x14] ss:$8 sps:$4 sm:$0xff]   ;;  %v937_v34 = vlaneseq }
 0x35d   : > { %1027 = vmatprep.subr.bf16.mxu0 %v4387_v40  ;;  %v4392_v51 = vld [vmem:[%s5421_s7 + $0x10] ss:$8 sps:$4 sm:$0xff]   ;;  %v4393_v52 = vld [vmem:[%s5421_s7 + $0x24] ss:$8 sps:$4 sm:$0xff]   ;;  %v4395_v53 = vld [vmem:[%s5421_s7 + $0x20] ss:$8 sps:$4 sm:$0xff]  }
 0x35e   : > { %v5447_v38 = vld [vmem:[#allocation18] sm:$0xff]  ;;  %1028 = vmatpush1.bf16.msra.mxu0 %v4389_v41  ;;  %v4396_v54 = vld [vmem:[%s5421_s7 + $0x34] ss:$8 sps:$4 sm:$0xff]   ;;  %v4398_v55 = vld [vmem:[%s5421_s7 + $0x30] ss:$8 sps:$4 sm:$0xff]   ;;  %v4951_v59 = vmov 0  }
 0x35f   : > { %900 = vadd.xlane.f32.xlu0 %v5447_v38  ;;  %1029 = vmatprep.subr.bf16.mxu0 %v4390_v42  ;;  %v4399_v56 = vld [vmem:[%s5421_s7 + $0x44] ss:$8 sps:$4 sm:$0xff]   ;;  %v4401_v57 = vld [vmem:[%s5421_s7 + $0x40] ss:$8 sps:$4 sm:$0xff]   ;;  %v4402_v58 = vld [vmem:[%s5421_s7 + $0x54] ss:$8 sps:$4 sm:$0xff]  }
 0x360   : > { %1059 = vmatprep.mubr.bf16.mxu0 %v4951_v59  ;;  %v4404_v60 = vld [vmem:[%s5421_s7 + $0x50] ss:$8 sps:$4 sm:$0xff]   ;;  %v4405_v61 = vld [vmem:[%s5421_s7 + $0x64] ss:$8 sps:$4 sm:$0xff]   ;;  %v4407_v62 = vld [vmem:[%s5421_s7 + $0x60] ss:$8 sps:$4 sm:$0xff]  }
 0x361   : > { %v4408_v63 = vld [vmem:[%s5421_s7 + $0x74] ss:$8 sps:$4 sm:$0xff]   ;;  %v4410_v0 = vld [vmem:[%s5421_s7 + $0x70] ss:$8 sps:$4 sm:$0xff]   ;;  %v4411_v1 = vld [vmem:[%s5423_s5 + $0x40] sm:$0xff]   ;;  %v5502_v35 = vshrl.u32 %v937_v34, 7 }
 0x362   : > { %v5449_v39 = vld [vmem:[#allocation18 + $0x8] sm:$0xff]  ;;  %1030 = vmatpush1.bf16.msra.mxu0 %v4392_v51  ;;  %v4412_v2 = vld [vmem:[%s5423_s5] sm:$0xff]   ;;  %3951 = vmatprep.subr.bf16.mxu1 %v4411_v1  ;;  %v4415_v5 = vld [vmem:[%s5423_s5 + $0x50] sm:$0xff]   ;;  %vm4953_vm2 = vmmov 0   ;;  %s6089_s10 = sld [smem:[#allocation33_spill]]  ;;  %vm1552_vm3 = vcmask 261120  }
 0x363   : > { %902 = vadd.xlane.f32.xlu0 %v5449_v39  ;;  %1031 = vmatprep.subr.bf16.mxu0 %v4393_v52  ;;  %v4413_v3 = vld [vmem:[%s5423_s5 + $0x48] sm:$0xff]   ;;  %v4416_v6 = vld [vmem:[%s5423_s5 + $0x10] sm:$0xff]   ;;  %v4417_v7 = vld [vmem:[%s5423_s5 + $0x58] sm:$0xff]   ;;  %v939_v36 = vsub.s32 0, %v5502_v35  ;;  %v943_v40 = vsub.s32 1, %v5502_v35  ;;  %vm1665_vm4 = vcmask 1043456  }
 0x364   : > { %3952 = vmatpush3.bf16.msra.mxu1 %v4412_v2  ;;  %v4414_v4 = vld [vmem:[%s5423_s5 + $0x8] sm:$0xff]   ;;  %v4418_v8 = vld [vmem:[%s5423_s5 + $0x18] sm:$0xff]   ;;  %v4419_v9 = vld [vmem:[%s5423_s5 + $0x60] sm:$0xff]   ;;  %s1531_s16 = sld [smem:[#allocation16]]  ;;  %vm1648_vm6 = vcmask 64512   ;;  %s4955_s24 = smov 96  }
 0x365   : > { %3953 = vmatprep.subr.bf16.mxu1 %v4413_v3  ;;  %v4420_v10 = vld [vmem:[%s5423_s5 + $0x20] sm:$0xff]   ;;  %v4421_v11 = vld [vmem:[%s5423_s5 + $0x68] sm:$0xff]   ;;  %v4423_v30 = vld [vmem:[%s5423_s5 + $0x70] sm:$0xff]   ;;  %s3811_s23 = sld [smem:[#allocation16 + $0x1]]  ;;  %s4956_s19 = smov 64   ;;  %vm1992_vm8 = vcmask 523520  }
 0x366   : > { %1032 = vmatpush1.bf16.msra.mxu0 %v4395_v53  ;;  %v3747_v20 = vld [vmem:[%s5409_s25] ss:$0 sm:$0xff]  ;;  %v3748_v24 = vld [vmem:[%s5409_s25 + $0x1] ss:$0 sm:$0xff]  ;;  %v4424_v31 = vld [vmem:[%s5423_s5 + $0x30] sm:$0xff]   ;;  %s4957_s27 = smov 32  }
 0x367   : > { %1033 = vmatprep.subr.bf16.mxu0 %v4396_v54  ;;  %v4422_v29 = vld [vmem:[%s5423_s5 + $0x28] sm:$0xff]   ;;  %v4425_v32 = vld [vmem:[%s5423_s5 + $0x78] sm:$0xff]   ;;  %vm2278_vm9 = vcmask 785920   ;;  %vm2564_vm10 = vcmask 1048320   ;;  %vm2909_vm11 = vcmp.lt.s32.totalorder %v5502_v35, 2  ;;  %vm2937_vm12 = vcmp.lt.s32.totalorder %v5502_v35, 1 }
 0x368   : > { %3954 = vmatpush3.bf16.msra.mxu1 %v4414_v4  ;;  %v4426_v33 = vld [vmem:[%s5423_s5 + $0x38] sm:$0xff]   ;;  %vm2974_vm15 = vcmp.lt.s32.totalorder %v5502_v35, 7  ;;  %vm3002_vm0 = vcmp.lt.s32.totalorder %v5502_v35, 6  ;;  %p4310_p9 = scmp.eq.s32.totalorder %s5060_s14, 1 }
 0x369   : > { %3955 = vmatprep.subr.bf16.mxu1 %v4415_v5  ;;  %v866_v37 = vld [vmem:[%s5415_s15] ss:$2 sm:$0x3] }
 0x36a   : > { %1034 = vmatpush1.bf16.msra.mxu0 %v4398_v55  ;;  %v940_v41 = vrot.slane %v866_v37, %v939_v36  ;;  %v944_v42 = vrot.slane %v866_v37, %v943_v40  ;;  %v4454_v37 = vld [vmem:[%s5417_s6 + $0x98] ss:$12 sps:$4 sm:$0xff]  }
 0x36b   : > { %1035 = vmatprep.subr.bf16.mxu0 %v4399_v56 }
 0x36c   : > { %3956 = vmatpush3.bf16.msra.mxu1 %v4416_v6 }
 0x36d   : > { %3957 = vmatprep.subr.bf16.mxu1 %v4417_v7  ;;  %v4427_v7 = vld [vmem:[%s5417_s6] ss:$12 sps:$4 sm:$0xff]  }
 0x36e   : > { %1036 = vmatpush1.bf16.msra.mxu0 %v4401_v57 }
 0x36f   : > { %1037 = vmatprep.subr.bf16.mxu0 %v4402_v58  ;;  %v3765_v58 = vld [vmem:[%s5409_s25 + $0x2] ss:$0 sm:$0xff] }
 0x370   : > { %3958 = vmatpush3.bf16.msra.mxu1 %v4418_v8  ;;  %v4429_v8 = vld [vmem:[%s5417_s6 + $0x4] ss:$12 sps:$4 sm:$0xff]  }
 0x371   : > { %3959 = vmatprep.subr.bf16.mxu1 %v4419_v9  ;;  %v4952_v9 = vmov 0.0  }
 0x372   : > { %1038 = vmatpush1.bf16.msra.mxu0 %v4404_v60 }
 0x373   : > { %1039 = vmatprep.subr.bf16.mxu0 %v4405_v61 }
 0x374   : > { %3960 = vmatpush3.bf16.msra.mxu1 %v4420_v10  ;;  %v4430_v10 = vld [vmem:[%s5417_s6 + $0x8] ss:$12 sps:$4 sm:$0xff]  }
 0x375   : > { %3961 = vmatprep.subr.bf16.mxu1 %v4421_v11  ;;  %v4433_v11 = vld [vmem:[%s5417_s6 + $0x1c] ss:$12 sps:$4 sm:$0xff]  }
 0x376   : > { %1040 = vmatpush1.bf16.msra.mxu0 %v4407_v62 }
 0x377   : > { %1041 = vmatprep.subr.bf16.mxu0 %v4408_v63 }
 0x378   : > { %3962 = vmatpush3.bf16.msra.mxu1 %v4422_v29  ;;  %v4449_v29 = vld [vmem:[%s5417_s6 + $0x7c] ss:$12 sps:$4 sm:$0xff]  }
 0x379   : > { %3963 = vmatprep.subr.bf16.mxu1 %v4423_v30  ;;  %v4447_v30 = vld [vmem:[%s5417_s6 + $0x78] ss:$12 sps:$4 sm:$0xff]  }
 0x37a   : > { %1042 = vmatpush1.bf16.msra.mxu0 %v4410_v0 }
 0x37b   : > { %1418 = vmatprep.subr.bf16.mxu0 %v4429_v8 }
 0x37c   : > { %3964 = vmatpush3.bf16.msra.mxu1 %v4424_v31  ;;  %v4450_v31 = vld [vmem:[%s5417_s6 + $0x80] ss:$12 sps:$4 sm:$0xff]  }
 0x37d   : > { %3965 = vmatprep.subr.bf16.mxu1 %v4425_v32  ;;  %v4453_v32 = vld [vmem:[%s5417_s6 + $0x94] ss:$12 sps:$4 sm:$0xff]  }
 0x380   : > { %3966 = vmatpush3.bf16.msra.mxu1 %v4426_v33  ;;  %v4451_v33 = vld [vmem:[%s5417_s6 + $0x90] ss:$12 sps:$4 sm:$0xff]  }
 0x381   : > { %4063 = vmatprep.subr.bf16.mxu1 %v4952_v9 }
 0x3ec   : > { %v901_v43 = vpop.xlane.xlu0 %900 }
 0x3ed   : > { %v905_v44 = vmul.f32 0.0078125, %v901_v43 }
 0x3ef   : > { %v5457_v45 = vsub.f32 %v5447_v38, %v905_v44 }
 0x3f0   : > { %v903_v46 = vpop.xlane.xlu0 %902 }
 0x3f1   : > { %v906_v47 = vmul.f32 0.0078125, %v903_v46  ;;  %v909_v48 = vmul.f32 %v5457_v45, %v5457_v45 }
 0x3f3   : > { %v5462_v49 = vsub.f32 %v5449_v39, %v906_v47  ;;  %911 = vadd.xlane.f32.xlu1 %v909_v48 }
 0x3f5   : > { %v910_v50 = vmul.f32 %v5462_v49, %v5462_v49 }
 0x3f7   : > { %913 = vadd.xlane.f32.xlu1 %v910_v50 }
 0x480   : > { %v912_v12 = vpop.xlane.xlu1 %911 }
 0x481   : > { %v915_v13 = vmul.f32 0.0078125, %v912_v12  ;;  %v4431_v12 = vld [vmem:[%s5417_s6 + $0x18] ss:$12 sps:$4 sm:$0xff]  }
 0x483   : > { %v917_v14 = vadd.f32 1e-05, %v915_v13 }
 0x484   : > { %v914_v15 = vpop.xlane.xlu1 %913 }
 0x485   : > { %4509 = vrsqrt.f32 %v917_v14  ;;  %v916_v16 = vmul.f32 0.0078125, %v914_v15 }
 0x487   : > { %v918_v17 = vadd.f32 1e-05, %v916_v16 }
 0x489   : > { %4511 = vrsqrt.f32 %v918_v17 }
 0x48f   : > { %v4510_v18 = vpop.eup %4509 }
 0x490   : > { %v921_v19 = vmul.f32 %v4510_v18, %v5457_v45 }
 0x492   : > { %v927_v23 = vmul.f32 %v3747_v20, %v921_v19 }
 0x493   : > { %v4512_v21 = vpop.eup %4511 }
 0x494   : > { %v922_v22 = vmul.f32 %v4512_v21, %v5462_v49  ;;  %v933_v26 = vadd.f32 %v3748_v24, %v927_v23  ;;  %v4435_v21 = vld [vmem:[%s5417_s6 + $0x30] ss:$12 sps:$4 sm:$0xff]   ;;  %v4441_v23 = vld [vmem:[%s5417_s6 + $0x4c] ss:$12 sps:$4 sm:$0xff]  }
 0x496   : > { %v928_v25 = vmul.f32 %v3747_v20, %v922_v22  ;;  %v4437_v20 = vld [vmem:[%s5417_s6 + $0x34] ss:$12 sps:$4 sm:$0xff]   ;;  %v4438_v22 = vld [vmem:[%s5417_s6 + $0x38] ss:$12 sps:$4 sm:$0xff]  }
 0x498   : > { %v934_v27 = vadd.f32 %v3748_v24, %v928_v25  ;;  %v4439_v24 = vld [vmem:[%s5417_s6 + $0x48] ss:$12 sps:$4 sm:$0xff]   ;;  %v4442_v25 = vld [vmem:[%s5417_s6 + $0x50] ss:$12 sps:$4 sm:$0xff]  }
 0x49a   : > { %v935_v28 = vpack.c.bf16 %v934_v27, %v933_v26  ;;  %v4445_v26 = vld [vmem:[%s5417_s6 + $0x64] ss:$12 sps:$4 sm:$0xff]   ;;  %v4443_v27 = vld [vmem:[%s5417_s6 + $0x60] ss:$12 sps:$4 sm:$0xff]  }
 0x49c   : > { %1060 = vmatmul.mubr.bf16.vlgmr.msra.gmra.mrb[0].mxu0 %v935_v28  ;;  %v4446_v28 = vld [vmem:[%s5417_s6 + $0x68] ss:$12 sps:$4 sm:$0xff]  }
 0x49d   : > { %1450 = vmatprep.mubr.bf16.mxu0 %v4951_v59  ;;  %1419 = vmatpush1.bf16.msra.mxu0 %v4427_v7  ;;  %v3809_v7 = vld [vmem:[%s5409_s25 + $0x6] ss:$0 sm:$0xff] }
 0x49e   : > { %1420 = vmatprep.subr.bf16.mxu0 %v4433_v11 }
 0x4a1   : > { %1421 = vmatpush1.bf16.msra.mxu0 %v4431_v12 }
 0x4a2   : > { %1422 = vmatprep.subr.bf16.mxu0 %v4437_v20 }
 0x4a5   : > { %1423 = vmatpush1.bf16.msra.mxu0 %v4435_v21 }
 0x4a6   : > { %1424 = vmatprep.subr.bf16.mxu0 %v4441_v23 }
 0x4a9   : > { %1425 = vmatpush1.bf16.msra.mxu0 %v4439_v24 }
 0x4aa   : > { %1426 = vmatprep.subr.bf16.mxu0 %v4445_v26 }
 0x4ad   : > { %1427 = vmatpush1.bf16.msra.mxu0 %v4443_v27 }
 0x4ae   : > { %1428 = vmatprep.subr.bf16.mxu0 %v4449_v29 }
 0x4b1   : > { %1429 = vmatpush1.bf16.msra.mxu0 %v4447_v30 }
 0x4b2   : > { %1430 = vmatprep.subr.bf16.mxu0 %v4453_v32 }
 0x4b5   : > { %1431 = vmatpush1.bf16.msra.mxu0 %v4451_v33  ;;  %v1533_v33 = vand.u32 127, %v937_v34 }
 0x56f   : > { %v1061_v43 = vpop.f32.mrb[0].mxu0 }
 0x570   : > { %v1062_v44 = vadd.f32 %v1061_v43, %v940_v41  ;;  %v1063_v45 = vpop.f32.mrb[1].mxu0  ;;  %v4458_v43 = vld [vmem:[%s5417_s6 + $0xb0] ss:$12 sps:$4 sm:$0xff]  }
 0x571   : > { %v1064_v46 = vadd.f32 %v1063_v45, %v944_v42  ;;  %v1065_v47 = vpop.f32.mrb[2].mxu0 }
 0x572   : > { %v1066_v48 = vadd.f32 %v1065_v47, %v940_v41  ;;  %v1067_v49 = vpop.f32.mrb[3].mxu0  ;;  %v1070_v51 = vmax.f32 %v1062_v44, 0.0  ;;  %v4457_v41 = vld [vmem:[%s5417_s6 + $0xac] ss:$12 sps:$4 sm:$0xff]  }
 0x573   : > { %v1068_v50 = vadd.f32 %v1067_v49, %v944_v42  ;;  %v1071_v53 = vmax.f32 %v1064_v46, 0.0  ;;  %v4455_v42 = vld [vmem:[%s5417_s6 + $0xa8] ss:$12 sps:$4 sm:$0xff]   ;;  %1432 = vmatprep.subr.bf16.mxu0 %v4457_v41 }
 0x574   : > { %v1072_v52 = vmax.f32 %v1066_v48, 0.0  ;;  %1433 = vmatpush1.bf16.msra.mxu0 %v4455_v42 }
 0x575   : > { %v1073_v54 = vmax.f32 %v1068_v50, 0.0  ;;  %4109 = vmatprep.subr.bf16.mxu0 %v4952_v9 }
 0x576   : > { %v1074_v55 = vpack.c.bf16 %v1072_v52, %v1070_v51  ;;  %v3782_v51 = vld [vmem:[%s5409_s25 + $0x3] ss:$0 sm:$0xff] }
 0x577   : > { %v1075_v56 = vpack.c.bf16 %v1073_v54, %v1071_v53 }
 0x579   : > { %1208 = vmatprep.mubr.bf16.mxu1 %v1075_v56  ;;  %v3783_v56 = vld [vmem:[%s5409_s25 + $0x4] ss:$0 sm:$0xff] }
 0x57a   : > { %1209 = vmatmul.mubr.bf16.vlgmr.msra.gmra.mrb[0].mxu1 %v1074_v55 }
 0x57b   : > { %4064 = vmatpush3.bf16.msra.mxu1 %v4430_v10  ;;  %4079 = vmatprep.mubr.msk.bf16.mxu1 %vm4953_vm2, %v4952_v9 }
 0x57c   : > { %4065 = vmatprep.subr.bf16.mxu1 %v4952_v9 }
 0x64d   : > { %v3967_v57 = vpop.f32.mrb[0].mxu1 }
 0x64e   : > { %v3968_v60 = vpop.f32.mrb[1].mxu1 }
 0x64f   : > { %v3969_v61 = vadd.f32 %v3968_v60, %v3967_v57  ;;  %v3970_v62 = vpop.f32.mrb[2].mxu1 }
 0x650   : > { %v3971_v63 = vpop.f32.mrb[3].mxu1 }
 0x651   : > { %v1211_v0 = vadd.f32 %v3969_v61, %v3765_v58  ;;  %v3972_v1 = vadd.f32 %v3971_v63, %v3970_v62  ;;  %v5563_v61 = vld [vmem:[%s6089_s10] sm:$0xff]   ;;  %v5574_v63 = vld [vmem:[%s6089_s10 + $0x8] sm:$0xff]  }
 0x653   : > { %v1217_v2 = vmul.f32 0.5, %v1211_v0  ;;  %v1214_v3 = vadd.f32 %v3972_v1, %v3765_v58  ;;  %v3808_v1 = vld [vmem:[%s5409_s25 + $0x5] ss:$0 sm:$0xff] }
 0x655   : > { %v1218_v4 = vmul.f32 0.5, %v1214_v3  ;;  %v5513_v5 = vadd.f32 %v1217_v2, %v5447_v38  ;;  %v4434_v38 = vld [vmem:[%s5417_s6 + $0x20] ss:$12 sps:$4 sm:$0xff]   ;;  %s4954_s6 = smov 257  }
 0x656   : > { %4066 = vmatpush3.bf16.msra.mxu1 %v4434_v38  ;;  %v3810_v3 = vld [vmem:[%s5409_s25 + $0x7] ss:$0 sm:$0xff] }
 0x657   : > { %1223 = vadd.xlane.f32.xlu0 %v5513_v5  ;;  %v5517_v6 = vadd.f32 %v1218_v4, %v5449_v39  ;;  %4067 = vmatprep.subr.bf16.mxu1 %v4952_v9 }
 0x659   : > { %1225 = vadd.xlane.f32.xlu1 %v5517_v6 }
 0x65a   : > { %4068 = vmatpush3.bf16.msra.mxu1 %v4438_v22 }
 0x65b   : > { %4069 = vmatprep.subr.bf16.mxu1 %v4952_v9 }
 0x65e   : > { %4070 = vmatpush3.bf16.msra.mxu1 %v4442_v25 }
 0x65f   : > { %4071 = vmatprep.subr.bf16.mxu1 %v4952_v9 }
 0x662   : > { %4072 = vmatpush3.bf16.msra.mxu1 %v4446_v28 }
 0x663   : > { %4073 = vmatprep.subr.bf16.mxu1 %v4952_v9 }
 0x666   : > { %4074 = vmatpush3.bf16.msra.mxu1 %v4450_v31 }
 0x667   : > { %4075 = vmatprep.subr.bf16.mxu1 %v4952_v9 }
 0x66a   : > { %4076 = vmatpush3.bf16.msra.mxu1 %v4454_v37  ;;  %v1534_v37 = vstv %s1531_s16 }
 0x66b   : > { %4077 = vmatprep.subr.bf16.mxu1 %v4952_v9  ;;  %vm5609_vm5 = vcmp.lt.s32.totalorder %v1533_v33, %v1534_v37 }
 0x66e   : > { %4078 = vmatpush3.bf16.msra.mxu1 %v4458_v43 }
 0x66f   : > { %4083 = vmatprep.subr.bf16.mxu1 %v4952_v9 }
 0x6e4   : > { %v1224_v39 = vpop.xlane.xlu0 %1223 }
 0x6e5   : > { %v1227_v13 = vmul.f32 0.0078125, %v1224_v39 }
 0x6e6   : > { %v1226_v14 = vpop.xlane.xlu1 %1225 }
 0x6e7   : > { %v1229_v15 = vsub.f32 %v5513_v5, %v1227_v13  ;;  %v1228_v16 = vmul.f32 0.0078125, %v1226_v14 }
 0x6e9   : > { %v1230_v17 = vsub.f32 %v5517_v6, %v1228_v16  ;;  %v1231_v18 = vmul.f32 %v1229_v15, %v1229_v15 }
 0x6eb   : > { %1233 = vadd.xlane.f32.xlu0 %v1231_v18  ;;  %v1232_v19 = vmul.f32 %v1230_v17, %v1230_v17 }
 0x6ed   : > { %1235 = vadd.xlane.f32.xlu1 %v1232_v19 }
 0x778   : > { %v1234_v44 = vpop.xlane.xlu0 %1233 }
 0x779   : > { %v1237_v45 = vmul.f32 0.0078125, %v1234_v44 }
 0x77a   : > { %v1236_v46 = vpop.xlane.xlu1 %1235 }
 0x77b   : > { %v1239_v47 = vadd.f32 1e-05, %v1237_v45  ;;  %v1238_v48 = vmul.f32 0.0078125, %v1236_v46 }
 0x77d   : > { %4513 = vrsqrt.f32 %v1239_v47  ;;  %v1240_v49 = vadd.f32 1e-05, %v1238_v48 }
 0x77f   : > { %4515 = vrsqrt.f32 %v1240_v49 }
 0x787   : > { %v4514_v50 = vpop.eup %4513 }
 0x788   : > { %v1243_v52 = vmul.f32 %v4514_v50, %v1229_v15 }
 0x789   : > { %v4516_v53 = vpop.eup %4515 }
 0x78a   : > { %v1244_v54 = vmul.f32 %v4516_v53, %v1230_v17  ;;  %v1249_v55 = vmul.f32 %v3782_v51, %v1243_v52 }
 0x78c   : > { %v1250_v57 = vmul.f32 %v3782_v51, %v1244_v54  ;;  %v1255_v58 = vadd.f32 %v3783_v56, %v1249_v55 }
 0x78e   : > { %v1256_v60 = vadd.f32 %v3783_v56, %v1250_v57 }
 0x790   : > { %v1257_v62 = vpack.c.bf16 %v1256_v60, %v1255_v58 }
 0x792   : > { %1451 = vmatmul.mubr.bf16.vlgmr.msra.gmra.mrb[4].mxu0 %v1257_v62  ;;  %4080 = vmatmul.mubr.bf16.vlgmr.msra.gmra.mrb[4].mxu1 %v1257_v62 }
 0x793   : > { %4084 = vmatpush3.bf16.msra.mxu1 %v5563_v61  ;;  %4087 = vmatprep.mubr.msk.bf16.mxu1 %vm4953_vm2, %v4952_v9 }
 0x794   : > { %4085 = vmatprep.subr.bf16.mxu1 %v4952_v9  ;;  %4111 = vmatprep.mubr.msk.bf16.mxu0 %vm4953_vm2, %v4952_v9 }
 0x797   : > { %4086 = vmatpush3.bf16.msra.mxu1 %v5574_v63 }
 0x798   : > { %4091 = vmatprep.subr.bf16.mxu1 %v4952_v9 }
 0x865   : > { %v1452_v0 = vpop.f32.mrb[4].mxu0  ;;  %v1495_v2 = vpop.f32.mrb[4].mxu1 }
 0x866   : > { %v1454_v4 = vpop.f32.mrb[5].mxu0  ;;  %v4081_v8 = vpop.f32.mrb[5].mxu1  ;;  %v1507_v12 = vadd.f32 %v3808_v1, %v1452_v0  ;;  %v1523_v38 = vadd.f32 %v3810_v3, %v1495_v2 }
 0x867   : > { %v1456_v10 = vpop.f32.mrb[6].mxu0  ;;  %v1498_v11 = vpop.f32.mrb[6].mxu1  ;;  %v1515_v16 = vadd.f32 %v3809_v7, %v1454_v4  ;;  %v1538_v4 = vstv %s3811_s23 }
 0x868   : > { %v1508_v39 = vadd.f32 %v3808_v1, %v1456_v10  ;;  %v1524_v13 = vadd.f32 %v3810_v3, %v1498_v11  ;;  %v1458_v14 = vpop.f32.mrb[7].mxu0  ;;  %v4082_v15 = vpop.f32.mrb[7].mxu1  ;;  %vm5646_vm7 = vcmp.lt.s32.totalorder %v1533_v33, %v1538_v4 }
 0x869   : > { %v1516_v17 = vadd.f32 %v3809_v7, %v1458_v14 }
 0x86a   : > { %v5581_v18 = vpack.c.bf16 %v1508_v39, %v1507_v12  ;;  %v5583_v19 = vpack.c.bf16 %v1524_v13, %v1523_v38  ;;  %v4464_v12 = vld [vmem:[%s5419_s21 + $0x18] sm:$0xff]  }
 0x86b   : > { %v5585_v20 = vpack.c.bf16 %v1516_v17, %v1515_v16 }
 0x86c   : > { %4088 = vmatmul.mubr.msk.bf16.vlgmr.msra.gmra.mrb[8].mxu1 %vm1552_vm3, %v5581_v18  ;;  %v5590_v21 = vrot.slane %v5583_v19, 4  ;;  %v1667_v24 = vsel %vm1665_vm4, %v5583_v19, 0  ;;  %v5632_v58 = vrot.slane %v5581_v18, 4 }
 0x86d   : > { %v1602_v22 = vsel %vm1552_vm3, %v5585_v20, 0  ;;  %4093 = vmatprep.mubr.msk.bf16.mxu1 %vm4953_vm2, %v4952_v9  ;;  %v5621_v54 = vrot.slane %v5585_v20, 4 }
 0x86e   : > { %4092 = vmatpush3.bf16.xpose.msra.mxu1 %v1602_v22  ;;  %v1787_v23 = vsel %vm1665_vm4, %v5590_v21, 0 }
 0x86f   : > { %4110 = vmatpush3.bf16.msra.mxu0 %v1787_v23  ;;  %4097 = vmatprep.subr.bf16.mxu1 %v4952_v9  ;;  %v1722_v57 = vsel %vm1552_vm3, %v5621_v54, 0 }
 0x870   : > { %4123 = vmatprep.subr.bf16.mxu0 %v4952_v9 }
 0x875   : > { %4094 = vmatmul.mubr.msk.bf16.vlgmr.msra.gmra.mrb[12].mxu1 %vm1552_vm3, %v5581_v18 }
 0x876   : > { %4098 = vmatpush3.bf16.msra.mxu1 %v1667_v24  ;;  %4099 = vmatprep.mubr.msk.bf16.mxu1 %vm4953_vm2, %v4952_v9 }
 0x877   : > { %4103 = vmatprep.subr.bf16.mxu1 %v4952_v9 }
 0x93f   : > { %v1590_v25 = vpop.f32.mrb[8].mxu1 }
 0x940   : > { %1599 = vrot.lane.b32.xlu0 %v1590_v25, %s4954_s6  ;;  %v4089_v26 = vpop.f32.mrb[9].mxu1 }
 0x941   : > { %v1593_v27 = vpop.f32.mrb[10].mxu1 }
 0x942   : > { %v4090_v28 = vpop.f32.mrb[11].mxu1 }
 0x948   : > { %v1638_v29 = vpop.f32.mrb[12].mxu1 }
 0x949   : > { %v4095_v30 = vpop.f32.mrb[13].mxu1 }
 0x94a   : > { %v1641_v31 = vpop.f32.mrb[14].mxu1 }
 0x94b   : > { %v4096_v32 = vpop.f32.mrb[15].mxu1 }
 0x9b2   : > { %v1600_v41 = vpop.permute.xlu0 %1599 }
 0x9b3   : > { %v1639_v42 = vadd.f32 %v1638_v29, %v1600_v41 }
 0x9b5   : > { %v1644_v44 = vmul.f32 0.17677669, %v1639_v42 }
 0x9b7   : > { %v1647_v45 = vsel %vm5609_vm5, %v1644_v44, -3.4028235e+38 }
 0x9b8   : > { %v1649_v46 = vsel %vm1648_vm6, %v1647_v45, -inf }
 0x9b9   : > { %1650 = vmax.xlane.f32.xlu1 %v1649_v46 }
 0xa46   : > { %v1651_v47 = vpop.xlane.xlu1 %1650 }
 0xa47   : > { %v1652_v48 = vsub.f32 %v1647_v45, %v1651_v47 }
 0xa49   : > { %v1653_v49 = vmul.f32 1.442695, %v1652_v48 }
 0xa4b   : > { %4517 = vpow2.f32 %v1653_v49 }
 0xa55   : > { %v4518_v34 = vpop.eup %4517 }
 0xa56   : > { %v1655_v50 = vsel %vm1648_vm6, %v4518_v34, 0.0 }
 0xa57   : > { %1656 = vadd.xlane.f32.xlu1 %v1655_v50 }
 0xa68   : > { %1712 = vrot.lane.b32.xlu1 %v1593_v27, %s4954_s6 }
 0xa6c   : > { %1830 = vrot.lane.b32.xlu1 %v5581_v18, %s4955_s24 }
 0xae4   : > { %v1657_v51 = vpop.xlane.xlu1 %1656 }
 0xae5   : > { %4519 = vrcp.f32 %v1657_v51 }
 0xae8   : > { %v1713_v60 = vpop.permute.xlu1 %1712 }
 0xaec   : > { %v1831_v62 = vpop.permute.xlu1 %1830 }
 0xaef   : > { %v4520_v52 = vpop.eup %4519 }
 0xaf0   : > { %v1659_v53 = vmul.f32 %v4520_v52, %v4518_v34 }
 0xaf2   : > { %v1660_v55 = vsel %vm5609_vm5, %v1659_v53, 0.0 }
 0xaf3   : > { %v1661_v56 = vpack.c.bf16 %v1660_v55, %v1660_v55 }
 0xaf5   : > { %4100 = vmatmul.mubr.msk.bf16.vlgmr.msra.gmra.mrb[16].mxu1 %vm1648_vm6, %v1661_v56 }
 0xaf6   : > { %4104 = vmatpush3.bf16.xpose.msra.mxu1 %v1722_v57  ;;  %4105 = vmatprep.mubr.msk.bf16.mxu1 %vm4953_vm2, %v4952_v9 }
 0xaf7   : > { %4115 = vmatprep.subr.bf16.mxu1 %v4952_v9 }
 0xafd   : > { %4106 = vmatmul.mubr.msk.bf16.vlgmr.msra.gmra.mrb[20].mxu1 %vm1552_vm3, %v5632_v58 }
 0xafe   : > { %4116 = vmatpush3.bf16.msra.mxu1 %v5563_v61  ;;  %4119 = vmatprep.mubr.msk.bf16.mxu1 %vm4953_vm2, %v4952_v9 }
 0xaff   : > { %4117 = vmatprep.subr.bf16.mxu1 %v4952_v9 }
 0xb02   : > { %4118 = vmatpush3.bf16.msra.mxu1 %v5574_v63 }
 0xb03   : > { %4129 = vmatprep.subr.bf16.mxu1 %v4952_v9 }
 0xb05   : > { %4120 = vmatmul.mubr.msk.bf16.vlgmr.msra.gmra.mrb[24].mxu1 %vm1552_vm3, %v1831_v62 }
 0xb06   : > { %4131 = vmatprep.mubr.msk.bf16.mxu1 %vm4953_vm2, %v4952_v9 }
 0xbc8   : > { %v1703_v0 = vpop.f32.mrb[16].mxu1 }
 0xbc9   : > { %1709 = vst.msk [vmem:[#allocation2] sm:$0xff] %vm1552_vm3, %v1703_v0  ;;  %v4101_v1 = vpop.f32.mrb[17].mxu1 }
 0xbca   : > { %v1706_v2 = vpop.f32.mrb[18].mxu1 }
 0xbcb   : > { %v4102_v3 = vpop.f32.mrb[19].mxu1 }
 0xbd0   : > { %v1758_v7 = vpop.f32.mrb[20].mxu1 }
 0xbd1   : > { %v1759_v8 = vadd.f32 %v1758_v7, %v1713_v60  ;;  %v4107_v10 = vpop.f32.mrb[21].mxu1 }
 0xbd2   : > { %v1761_v11 = vpop.f32.mrb[22].mxu1 }
 0xbd3   : > { %v1764_v38 = vmul.f32 0.17677669, %v1759_v8  ;;  %v4108_v39 = vpop.f32.mrb[23].mxu1 }
 0xbd5   : > { %v1767_v13 = vsel %vm5646_vm7, %v1764_v38, -3.4028235e+38 }
 0xbd6   : > { %v1768_v14 = vsel %vm1648_vm6, %v1767_v13, -inf }
 0xbd7   : > { %1769 = vmax.xlane.f32.xlu0 %v1768_v14 }
 0xbd8   : > { %v1869_v15 = vpop.f32.mrb[24].mxu1 }
 0xbd9   : > { %v4121_v16 = vpop.f32.mrb[25].mxu1 }
 0xbda   : > { %v1872_v17 = vpop.f32.mrb[26].mxu1 }
 0xbdb   : > { %v4122_v22 = vpop.f32.mrb[27].mxu1 }
 0xbed   : > { %1880 = vrot.lane.b32.xlu0 %v5585_v20, %s4955_s24 }
 0xbf1   : > { %1998 = vrot.lane.b32.xlu0 %v5632_v58, %s4955_s24 }
 0xbf5   : > { %1878 = vrot.lane.b32.xlu0 %v1869_v15, %s4954_s6 }
 0xc64   : > { %v1770_v23 = vpop.xlane.xlu0 %1769 }
 0xc65   : > { %v1771_v24 = vsub.f32 %v1767_v13, %v1770_v23 }
 0xc67   : > { %v1772_v25 = vmul.f32 1.442695, %v1771_v24 }
 0xc68   : > { %v1881_v31 = vpop.permute.xlu0 %1880 }
 0xc69   : > { %4521 = vpow2.f32 %v1772_v25  ;;  %v1883_v37 = vsel %vm1552_vm3, %v1881_v31, 0 }
 0xc6c   : > { %v1999_v44 = vpop.permute.xlu0 %1998 }
 0xc70   : > { %v1879_v49 = vpop.permute.xlu0 %1878 }
 0xc73   : > { %v4522_v26 = vpop.eup %4521 }
 0xc74   : > { %v1774_v27 = vsel %vm1648_vm6, %v4522_v26, 0.0 }
 0xc75   : > { %1775 = vadd.xlane.f32.xlu1 %v1774_v27 }
 0xc86   : > { %2000 = vrot.lane.b32.xlu1 %v5621_v54, %s4955_s24 }
 0xc8a   : > { %1996 = vrot.lane.b32.xlu1 %v1872_v17, %s4954_s6 }
 0xd02   : > { %v1776_v28 = vpop.xlane.xlu1 %1775 }
 0xd03   : > { %4523 = vrcp.f32 %v1776_v28 }
 0xd06   : > { %v2001_v41 = vpop.permute.xlu1 %2000 }
 0xd07   : > { %v2006_v42 = vsel %vm1552_vm3, %v2001_v41, 0 }
 0xd0a   : > { %v1997_v60 = vpop.permute.xlu1 %1996 }
 0xd0d   : > { %v4524_v29 = vpop.eup %4523 }
 0xd0e   : > { %v1778_v30 = vmul.f32 %v4524_v29, %v4522_v26 }
 0xd10   : > { %v1779_v32 = vsel %vm5646_vm7, %v1778_v30, 0.0 }
 0xd11   : > { %v1780_v33 = vpack.c.bf16 %v1779_v32, %v1779_v32 }
 0xd13   : > { %4112 = vmatmul.mubr.msk.bf16.vlgmr.msra.gmra.mrb[8].mxu0 %vm1648_vm6, %v1780_v33 }
 0xd14   : > { %4124 = vmatpush3.bf16.xpose.msra.mxu0 %v1883_v37  ;;  %4125 = vmatprep.mubr.msk.bf16.mxu0 %vm4953_vm2, %v4952_v9 }
 0xd15   : > { %4135 = vmatprep.subr.bf16.mxu0 %v4952_v9 }
 0xd1b   : > { %4126 = vmatmul.mubr.msk.bf16.vlgmr.msra.gmra.mrb[12].mxu0 %vm1552_vm3, %v1831_v62 }
 0xd1c   : > { %4136 = vmatpush3.bf16.xpose.msra.mxu0 %v2006_v42  ;;  %4137 = vmatprep.mubr.msk.bf16.mxu0 %vm4953_vm2, %v4952_v9 }
 0xd1d   : > { %4147 = vmatprep.subr.bf16.mxu0 %v4952_v9 }
 0xd23   : > { %4138 = vmatmul.mubr.msk.bf16.vlgmr.msra.gmra.mrb[16].mxu0 %vm1552_vm3, %v1999_v44 }
 0xd24   : > { %4148 = vmatpush3.bf16.msra.mxu0 %v5563_v61  ;;  %4151 = vmatprep.mubr.msk.bf16.mxu0 %vm4953_vm2, %v4952_v9 }
 0xd25   : > { %4149 = vmatprep.subr.bf16.mxu0 %v4952_v9 }
 0xd28   : > { %4150 = vmatpush3.bf16.msra.mxu0 %v5574_v63 }
 0xd29   : > { %4161 = vmatprep.subr.bf16.mxu0 %v4952_v9 }
 0xde6   : > { %v1823_v45 = vpop.f32.mrb[8].mxu0 }
 0xde7   : > { %1829 = vst.msk [vmem:[#allocation2 + $0x8] sm:$0xff] %vm1552_vm3, %v1823_v45  ;;  %v4113_v46 = vpop.f32.mrb[9].mxu0 }
 0xde8   : > { %v1826_v47 = vpop.f32.mrb[10].mxu0 }
 0xde9   : > { %v4114_v48 = vpop.f32.mrb[11].mxu0 }
 0xdee   : > { %v1919_v34 = vpop.f32.mrb[12].mxu0 }
 0xdef   : > { %v1920_v50 = vadd.f32 %v1919_v34, %v1879_v49  ;;  %v4127_v51 = vpop.f32.mrb[13].mxu0 }
 0xdf0   : > { %v1922_v52 = vpop.f32.mrb[14].mxu0 }
 0xdf1   : > { %v1925_v53 = vmul.f32 0.17677669, %v1920_v50  ;;  %v4128_v55 = vpop.f32.mrb[15].mxu0 }
 0xdf3   : > { %v1926_v56 = vsel %vm5609_vm5, %v1925_v53, -3.4028235e+38 }
 0xdf4   : > { %v1927_v57 = vsel %vm1648_vm6, %v1926_v56, -inf }
 0xdf5   : > { %1928 = vmax.xlane.f32.xlu0 %v1927_v57 }
 0xdf6   : > { %v2042_v62 = vpop.f32.mrb[16].mxu0 }
 0xdf7   : > { %v2043_v0 = vadd.f32 %v2042_v62, %v1997_v60  ;;  %v4139_v1 = vpop.f32.mrb[17].mxu0 }
 0xdf8   : > { %v2045_v2 = vpop.f32.mrb[18].mxu0 }
 0xdf9   : > { %v2048_v3 = vmul.f32 0.17677669, %v2043_v0  ;;  %v4140_v4 = vpop.f32.mrb[19].mxu0 }
 0xdfb   : > { %v2049_v7 = vsel %vm5646_vm7, %v2048_v3, -3.4028235e+38 }
 0xdfc   : > { %v2050_v8 = vsel %vm1648_vm6, %v2049_v7, -inf }
 0xdfd   : > { %2051 = vmax.xlane.f32.xlu1 %v2050_v8 }
 0xe0b   : > { %2116 = vrot.lane.b32.xlu0 %v5581_v18, %s4956_s19 }
 0xe0f   : > { %2063 = vrot.lane.b32.xlu0 %v5590_v21, %s4955_s24 }
 0xe13   : > { %2166 = vrot.lane.b32.xlu0 %v5585_v20, %s4956_s19 }
 0xe17   : > { %2286 = vrot.lane.b32.xlu0 %v5621_v54, %s4956_s19 }
 0xe82   : > { %v1929_v10 = vpop.xlane.xlu0 %1928 }
 0xe83   : > { %v1930_v11 = vsub.f32 %v1926_v56, %v1929_v10 }
 0xe85   : > { %v1931_v38 = vmul.f32 1.442695, %v1930_v11 }
 0xe86   : > { %v2117_v39 = vpop.permute.xlu0 %2116 }
 0xe87   : > { %4525 = vpow2.f32 %v1931_v38  ;;  %4152 = vmatmul.mubr.msk.bf16.vlgmr.msra.gmra.mrb[20].mxu0 %vm1552_vm3, %v2117_v39 }
 0xe88   : > { %4163 = vmatprep.mubr.msk.bf16.mxu0 %vm4953_vm2, %v4952_v9 }
 0xe8a   : > { %v2052_v13 = vpop.xlane.xlu1 %2051  ;;  %v2064_v30 = vpop.permute.xlu0 %2063 }
 0xe8b   : > { %v2053_v14 = vsub.f32 %v2049_v7, %v2052_v13  ;;  %v2069_v33 = vsel %vm1665_vm4, %v2064_v30, 0 }
 0xe8d   : > { %v2054_v15 = vmul.f32 1.442695, %v2053_v14 }
 0xe8e   : > { %v2167_v44 = vpop.permute.xlu0 %2166 }
 0xe8f   : > { %4527 = vpow2.f32 %v2054_v15  ;;  %v2169_v46 = vsel %vm1552_vm3, %v2167_v44, 0 }
 0xe91   : > { %v4526_v16 = vpop.eup %4525 }
 0xe92   : > { %v1933_v17 = vsel %vm1648_vm6, %v4526_v16, 0.0  ;;  %v2287_v47 = vpop.permute.xlu0 %2286 }
 0xe93   : > { %1934 = vadd.xlane.f32.xlu1 %v1933_v17  ;;  %v2292_v48 = vsel %vm1552_vm3, %v2287_v47, 0 }
 0xe99   : > { %v4528_v22 = vpop.eup %4527 }
 0xe9a   : > { %v2056_v23 = vsel %vm1648_vm6, %v4528_v22, 0.0 }
 0xe9b   : > { %2057 = vadd.xlane.f32.xlu1 %v2056_v23 }
 0xeac   : > { %1940 = vrot.lane.b32.xlu1 %v5583_v19, %s4955_s24 }
 0xeb0   : > { %2284 = vrot.lane.b32.xlu1 %v5632_v58, %s4956_s19 }
 0xf20   : > { %v1935_v24 = vpop.xlane.xlu1 %1934 }
 0xf21   : > { %4529 = vrcp.f32 %v1935_v24 }
 0xf28   : > { %v2058_v25 = vpop.xlane.xlu1 %2057 }
 0xf29   : > { %4531 = vrcp.f32 %v2058_v25 }
 0xf2b   : > { %v4530_v26 = vpop.eup %4529 }
 0xf2c   : > { %v1937_v27 = vmul.f32 %v4530_v26, %v4526_v16  ;;  %v1941_v28 = vpop.permute.xlu1 %1940 }
 0xf2d   : > { %v1946_v29 = vsel %vm1665_vm4, %v1941_v28, 0 }
 0xf2e   : > { %4130 = vmatpush3.bf16.msra.mxu1 %v1946_v29  ;;  %v1938_v31 = vsel %vm5609_vm5, %v1937_v27, 0.0 }
 0xf2f   : > { %v1939_v32 = vpack.c.bf16 %v1938_v31, %v1938_v31  ;;  %4141 = vmatprep.subr.bf16.mxu1 %v4952_v9 }
 0xf30   : > { %v2285_v49 = vpop.permute.xlu1 %2284 }
 0xf31   : > { %4132 = vmatmul.mubr.msk.bf16.vlgmr.msra.gmra.mrb[28].mxu1 %vm1648_vm6, %v1939_v32 }
 0xf32   : > { %4142 = vmatpush3.bf16.msra.mxu1 %v2069_v33  ;;  %4143 = vmatprep.mubr.msk.bf16.mxu1 %vm4953_vm2, %v4952_v9 }
 0xf33   : > { %v4532_v37 = vpop.eup %4531  ;;  %4155 = vmatprep.subr.bf16.mxu1 %v4952_v9 }
 0xf34   : > { %v2060_v41 = vmul.f32 %v4532_v37, %v4528_v22 }
 0xf36   : > { %v2061_v42 = vsel %vm5646_vm7, %v2060_v41, 0.0 }
 0xf37   : > { %v2062_v45 = vpack.c.bf16 %v2061_v42, %v2061_v42 }
 0xf39   : > { %4144 = vmatmul.mubr.msk.bf16.vlgmr.msra.gmra.mrb[32].mxu1 %vm1648_vm6, %v2062_v45 }
 0xf3a   : > { %4157 = vmatprep.mubr.msk.bf16.mxu1 %vm4953_vm2, %v4952_v9 }
 0xf3b   : > { %4156 = vmatpush3.bf16.xpose.msra.mxu1 %v2169_v46 }
 0xf3c   : > { %4167 = vmatprep.subr.bf16.mxu1 %v4952_v9 }
 0xf42   : > { %4158 = vmatmul.mubr.msk.bf16.vlgmr.msra.gmra.mrb[36].mxu1 %vm1552_vm3, %v2117_v39 }
 0xf43   : > { %4168 = vmatpush3.bf16.xpose.msra.mxu1 %v2292_v48  ;;  %4169 = vmatprep.mubr.msk.bf16.mxu1 %vm4953_vm2, %v4952_v9 }
 0xf44   : > { %4179 = vmatprep.subr.bf16.mxu1 %v4952_v9 }
 0xf4a   : > { %4170 = vmatmul.mubr.msk.bf16.vlgmr.msra.gmra.mrb[40].mxu1 %vm1552_vm3, %v2285_v49 }
 0xf4b   : > { %4180 = vmatpush3.bf16.msra.mxu1 %v5563_v61  ;;  %4183 = vmatprep.mubr.msk.bf16.mxu1 %vm4953_vm2, %v4952_v9 }
 0xf4c   : > { %4181 = vmatprep.subr.bf16.mxu1 %v4952_v9 }
 0xf4f   : > { %4182 = vmatpush3.bf16.msra.mxu1 %v5574_v63 }
 0xf50   : > { %4193 = vmatprep.subr.bf16.mxu1 %v4952_v9 }
 0xf5a   : > { %v2155_v34 = vpop.f32.mrb[20].mxu0 }
 0xf5b   : > { %2164 = vrot.lane.b32.xlu0 %v2155_v34, %s4954_s6  ;;  %v4153_v50 = vpop.f32.mrb[21].mxu0 }
 0xf5c   : > { %v2158_v51 = vpop.f32.mrb[22].mxu0 }
 0xf5d   : > { %v4154_v52 = vpop.f32.mrb[23].mxu0  ;;  %2282 = vrot.lane.b32.xlu1 %v2158_v51, %s4954_s6 }
 0xfcd   : > { %v2165_v0 = vpop.permute.xlu0 %2164 }
 0xfcf   : > { %v2283_v38 = vpop.permute.xlu1 %2282 }
0x1004   : > { %v5735_v53 = vpop.f32.mrb[28].mxu1 }
0x1005   : > { %v4133_v61 = vpop.f32.mrb[29].mxu1 }
0x1006   : > { %v1985_v55 = vpop.f32.mrb[30].mxu1 }
0x1007   : > { %v4134_v56 = vpop.f32.mrb[31].mxu1 }
0x100c   : > { %v5737_v57 = vpop.f32.mrb[32].mxu1 }
0x100d   : > { %v4145_v60 = vpop.f32.mrb[33].mxu1 }
0x100e   : > { %v2108_v62 = vpop.f32.mrb[34].mxu1 }
0x100f   : > { %v4146_v63 = vpop.f32.mrb[35].mxu1 }
0x1015   : > { %v2205_v1 = vpop.f32.mrb[36].mxu1 }
0x1016   : > { %v2206_v2 = vadd.f32 %v2205_v1, %v2165_v0  ;;  %v4159_v3 = vpop.f32.mrb[37].mxu1 }
0x1017   : > { %v2208_v4 = vpop.f32.mrb[38].mxu1 }
0x1018   : > { %v2211_v7 = vmul.f32 0.17677669, %v2206_v2  ;;  %v4160_v8 = vpop.f32.mrb[39].mxu1 }
0x101a   : > { %v2212_v10 = vsel %vm5609_vm5, %v2211_v7, -3.4028235e+38 }
0x101b   : > { %v2213_v11 = vsel %vm1648_vm6, %v2212_v10, -inf }
0x101c   : > { %2214 = vmax.xlane.f32.xlu0 %v2213_v11 }
0x101d   : > { %v2328_v39 = vpop.f32.mrb[40].mxu1 }
0x101e   : > { %v2329_v13 = vadd.f32 %v2328_v39, %v2283_v38  ;;  %v4171_v14 = vpop.f32.mrb[41].mxu1 }
0x101f   : > { %v2331_v15 = vpop.f32.mrb[42].mxu1 }
0x1020   : > { %v2334_v16 = vmul.f32 0.17677669, %v2329_v13  ;;  %v4172_v17 = vpop.f32.mrb[43].mxu1 }
0x1022   : > { %v2335_v22 = vsel %vm5646_vm7, %v2334_v16, -3.4028235e+38 }
0x1023   : > { %v2336_v23 = vsel %vm1648_vm6, %v2335_v22, -inf }
0x1024   : > { %2337 = vmax.xlane.f32.xlu1 %v2336_v23 }
0x1032   : > { %2402 = vrot.lane.b32.xlu0 %v5581_v18, %s4957_s27 }
0x1036   : > { %2349 = vrot.lane.b32.xlu0 %v5590_v21, %s4956_s19 }
0x103a   : > { %2452 = vrot.lane.b32.xlu0 %v5585_v20, %s4957_s27 }
0x103e   : > { %2572 = vrot.lane.b32.xlu0 %v5621_v54, %s4957_s27 }
0x10a9   : > { %v2215_v24 = vpop.xlane.xlu0 %2214 }
0x10aa   : > { %v2216_v25 = vsub.f32 %v2212_v10, %v2215_v24 }
0x10ac   : > { %v2217_v26 = vmul.f32 1.442695, %v2216_v25 }
0x10ad   : > { %v2403_v27 = vpop.permute.xlu0 %2402 }
0x10ae   : > { %4533 = vpow2.f32 %v2217_v26  ;;  %4184 = vmatmul.mubr.msk.bf16.vlgmr.msra.gmra.mrb[44].mxu1 %vm1552_vm3, %v2403_v27 }
0x10af   : > { %4195 = vmatprep.mubr.msk.bf16.mxu1 %vm4953_vm2, %v4952_v9 }
0x10b1   : > { %v2338_v18 = vpop.xlane.xlu1 %2337  ;;  %v2350_v45 = vpop.permute.xlu0 %2349 }
0x10b2   : > { %v2339_v28 = vsub.f32 %v2335_v22, %v2338_v18  ;;  %v2355_v48 = vsel %vm1665_vm4, %v2350_v45, 0 }
0x10b4   : > { %v2340_v29 = vmul.f32 1.442695, %v2339_v28 }
0x10b5   : > { %v2453_v50 = vpop.permute.xlu0 %2452 }
0x10b6   : > { %4535 = vpow2.f32 %v2340_v29  ;;  %v2455_v52 = vsel %vm1552_vm3, %v2453_v50, 0 }
0x10b8   : > { %v4534_v30 = vpop.eup %4533 }
0x10b9   : > { %v2219_v20 = vsel %vm1648_vm6, %v4534_v30, 0.0  ;;  %v2573_v61 = vpop.permute.xlu0 %2572 }
0x10ba   : > { %2220 = vadd.xlane.f32.xlu1 %v2219_v20  ;;  %v2578_v55 = vsel %vm1552_vm3, %v2573_v61, 0 }
0x10c0   : > { %v4536_v31 = vpop.eup %4535 }
0x10c1   : > { %v2342_v54 = vsel %vm1648_vm6, %v4536_v31, 0.0 }
0x10c2   : > { %2343 = vadd.xlane.f32.xlu1 %v2342_v54 }
0x10d3   : > { %2226 = vrot.lane.b32.xlu1 %v5583_v19, %s4956_s19 }
0x10d7   : > { %2570 = vrot.lane.b32.xlu1 %v5632_v58, %s4957_s27 }
0x1147   : > { %v2221_v32 = vpop.xlane.xlu1 %2220 }
0x1148   : > { %4537 = vrcp.f32 %v2221_v32 }
0x114f   : > { %v2344_v33 = vpop.xlane.xlu1 %2343 }
0x1150   : > { %4539 = vrcp.f32 %v2344_v33 }
0x1152   : > { %v4538_v37 = vpop.eup %4537 }
0x1153   : > { %v2223_v41 = vmul.f32 %v4538_v37, %v4534_v30  ;;  %v2227_v42 = vpop.permute.xlu1 %2226 }
0x1154   : > { %v2232_v44 = vsel %vm1665_vm4, %v2227_v42, 0 }
0x1155   : > { %4162 = vmatpush3.bf16.msra.mxu0 %v2232_v44  ;;  %v2224_v46 = vsel %vm5609_vm5, %v2223_v41, 0.0 }
0x1156   : > { %v2225_v47 = vpack.c.bf16 %v2224_v46, %v2224_v46  ;;  %4173 = vmatprep.subr.bf16.mxu0 %v4952_v9 }
0x1157   : > { %v2571_v56 = vpop.permute.xlu1 %2570 }
0x1158   : > { %4164 = vmatmul.mubr.msk.bf16.vlgmr.msra.gmra.mrb[24].mxu0 %vm1648_vm6, %v2225_v47 }
0x1159   : > { %4174 = vmatpush3.bf16.msra.mxu0 %v2355_v48  ;;  %4175 = vmatprep.mubr.msk.bf16.mxu0 %vm4953_vm2, %v4952_v9 }
0x115a   : > { %v4540_v58 = vpop.eup %4539  ;;  %4187 = vmatprep.subr.bf16.mxu0 %v4952_v9 }
0x115b   : > { %v2346_v49 = vmul.f32 %v4540_v58, %v4536_v31 }
0x115d   : > { %v2347_v34 = vsel %vm5646_vm7, %v2346_v49, 0.0 }
0x115e   : > { %v2348_v51 = vpack.c.bf16 %v2347_v34, %v2347_v34 }
0x1160   : > { %4176 = vmatmul.mubr.msk.bf16.vlgmr.msra.gmra.mrb[28].mxu0 %vm1648_vm6, %v2348_v51 }
0x1161   : > { %4189 = vmatprep.mubr.msk.bf16.mxu0 %vm4953_vm2, %v4952_v9 }
0x1162   : > { %4188 = vmatpush3.bf16.xpose.msra.mxu0 %v2455_v52 }
0x1163   : > { %4199 = vmatprep.subr.bf16.mxu0 %v4952_v9 }
0x1169   : > { %4190 = vmatmul.mubr.msk.bf16.vlgmr.msra.gmra.mrb[32].mxu0 %vm1552_vm3, %v2403_v27 }
0x116a   : > { %4200 = vmatpush3.bf16.xpose.msra.mxu0 %v2578_v55  ;;  %4201 = vmatprep.mubr.msk.bf16.mxu0 %vm4953_vm2, %v4952_v9 }
0x116b   : > { %4211 = vmatprep.subr.bf16.mxu0 %v4952_v9 }
0x1171   : > { %4202 = vmatmul.mubr.msk.bf16.vlgmr.msra.gmra.mrb[36].mxu0 %vm1552_vm3, %v2571_v56 }
0x1172   : > { %4227 = vmatprep.mubr.msk.bf16.mxu0 %vm4953_vm2, %v4952_v9 }
0x1181   : > { %v2441_v60 = vpop.f32.mrb[44].mxu1 }
0x1182   : > { %2450 = vrot.lane.b32.xlu0 %v2441_v60, %s4954_s6  ;;  %v4185_v62 = vpop.f32.mrb[45].mxu1 }
0x1183   : > { %v2444_v63 = vpop.f32.mrb[46].mxu1 }
0x1184   : > { %2568 = vrot.lane.b32.xlu1 %v2444_v63, %s4954_s6  ;;  %v4186_v0 = vpop.f32.mrb[47].mxu1  ;;  %v4461_v63 = vld [vmem:[%s5419_s21] sm:$0xff]  }
0x1185   : > { %4212 = vmatpush3.bf16.msra.mxu0 %v4461_v63  ;;  %v4462_v0 = vld [vmem:[%s5419_s21 + $0x8] sm:$0xff]  }
0x1186   : > { %4213 = vmatprep.subr.bf16.mxu0 %v4952_v9 }
0x1189   : > { %4214 = vmatpush3.bf16.msra.mxu0 %v4462_v0 }
0x118a   : > { %4215 = vmatprep.subr.bf16.mxu0 %v4952_v9 }
0x11f4   : > { %v2451_v38 = vpop.permute.xlu0 %2450 }
0x11f6   : > { %v2569_v24 = vpop.permute.xlu1 %2568 }
0x122b   : > { %v2268_v1 = vpop.f32.mrb[24].mxu0 }
0x122c   : > { %v4165_v2 = vpop.f32.mrb[25].mxu0 }
0x122d   : > { %v2271_v3 = vpop.f32.mrb[26].mxu0  ;;  %v4465_v2 = vld [vmem:[%s5419_s21 + $0x20] sm:$0xff]  }
0x122e   : > { %v4166_v4 = vpop.f32.mrb[27].mxu0  ;;  %v4467_v3 = vld [vmem:[%s5419_s21 + $0x30] sm:$0xff]  }
0x122f   : > { %v4468_v4 = vld [vmem:[%s5419_s21 + $0x38] sm:$0xff]  }
0x1233   : > { %v2391_v7 = vpop.f32.mrb[28].mxu0 }
0x1234   : > { %v4177_v8 = vpop.f32.mrb[29].mxu0 }
0x1235   : > { %v2394_v10 = vpop.f32.mrb[30].mxu0 }
0x1236   : > { %v4178_v11 = vpop.f32.mrb[31].mxu0 }
0x123c   : > { %v2491_v39 = vpop.f32.mrb[32].mxu0 }
0x123d   : > { %v2492_v13 = vadd.f32 %v2491_v39, %v2451_v38  ;;  %v4191_v14 = vpop.f32.mrb[33].mxu0 }
0x123e   : > { %v2494_v15 = vpop.f32.mrb[34].mxu0 }
0x123f   : > { %v2497_v16 = vmul.f32 0.17677669, %v2492_v13  ;;  %v4192_v17 = vpop.f32.mrb[35].mxu0 }
0x1241   : > { %v2498_v22 = vsel %vm5609_vm5, %v2497_v16, -3.4028235e+38 }
0x1242   : > { %v2499_v23 = vsel %vm1648_vm6, %v2498_v22, -inf }
0x1243   : > { %2500 = vmax.xlane.f32.xlu0 %v2499_v23  ;;  %v3834_v23 = vld [vmem:[%s5409_s25 + $0x8] ss:$0 sm:$0xff] }
0x1244   : > { %v2614_v25 = vpop.f32.mrb[36].mxu0 }
0x1245   : > { %v2615_v26 = vadd.f32 %v2614_v25, %v2569_v24  ;;  %v4203_v27 = vpop.f32.mrb[37].mxu0 }
0x1246   : > { %v2617_v18 = vpop.f32.mrb[38].mxu0 }
0x1247   : > { %v2620_v28 = vmul.f32 0.17677669, %v2615_v26  ;;  %v4204_v29 = vpop.f32.mrb[39].mxu0 }
0x1249   : > { %v2621_v30 = vsel %vm5646_vm7, %v2620_v28, -3.4028235e+38 }
0x124a   : > { %v2622_v20 = vsel %vm1648_vm6, %v2621_v30, -inf }
0x124b   : > { %2623 = vmax.xlane.f32.xlu1 %v2622_v20 }
0x125c   : > { %2635 = vrot.lane.b32.xlu1 %v5590_v21, %s4957_s27 }
0x1260   : > { %1989 = vrot.lane.b32.xlu1 %v5735_v53, %s4957_s27 }
0x1264   : > { %2112 = vrot.lane.b32.xlu1 %v5737_v57, %s4957_s27 }
0x1268   : > { %2398 = vrot.lane.b32.xlu1 %v2391_v7, %s4956_s19 }
0x12d0   : > { %v2501_v31 = vpop.xlane.xlu0 %2500 }
0x12d1   : > { %v2502_v54 = vsub.f32 %v2498_v22, %v2501_v31 }
0x12d3   : > { %v2503_v32 = vmul.f32 1.442695, %v2502_v54 }
0x12d5   : > { %4541 = vpow2.f32 %v2503_v32 }
0x12d8   : > { %v2624_v33 = vpop.xlane.xlu1 %2623 }
0x12d9   : > { %v2625_v37 = vsub.f32 %v2621_v30, %v2624_v33 }
0x12db   : > { %v2626_v41 = vmul.f32 1.442695, %v2625_v37 }
0x12dc   : > { %v2636_v42 = vpop.permute.xlu1 %2635 }
0x12dd   : > { %4543 = vpow2.f32 %v2626_v41  ;;  %v2641_v55 = vsel %vm1665_vm4, %v2636_v42, 0 }
0x12df   : > { %v4542_v44 = vpop.eup %4541 }
0x12e0   : > { %v1990_v21 = vpop.permute.xlu1 %1989  ;;  %v2505_v45 = vsel %vm1648_vm6, %v4542_v44, 0.0 }
0x12e1   : > { %1993 = vst.msk [vmem:[#allocation2] sm:$0xff] %vm1992_vm8, %v1990_v21  ;;  %2506 = vadd.xlane.f32.xlu0 %v2505_v45 }
0x12e4   : > { %v2113_v53 = vpop.permute.xlu1 %2112 }
0x12e5   : > { %2115 = vst.msk [vmem:[#allocation2 + $0x8] sm:$0xff] %vm1992_vm8, %v2113_v53 }
0x12e7   : > { %v4544_v57 = vpop.eup %4543 }
0x12e8   : > { %v2399_v46 = vpop.permute.xlu1 %2398  ;;  %v2628_v47 = vsel %vm1648_vm6, %v4544_v57, 0.0 }
0x12e9   : > { %2401 = vst.msk [vmem:[#allocation2 + $0x8] sm:$0xff] %vm2278_vm9, %v2399_v46  ;;  %2629 = vadd.xlane.f32.xlu0 %v2628_v47  ;;  %v3843_v46 = vld [vmem:[%s5409_s25 + $0x9] ss:$0 sm:$0xff] }
0x12ff   : > { %2512 = vrot.lane.b32.xlu0 %v5583_v19, %s4957_s27 }
0x1303   : > { %2275 = vrot.lane.b32.xlu0 %v2268_v1, %s4956_s19  ;;  %v4463_v1 = vld [vmem:[%s5419_s21 + $0x10] sm:$0xff]  }
0x1304   : > { %4216 = vmatpush3.bf16.msra.mxu0 %v4463_v1 }
0x1305   : > { %4217 = vmatprep.subr.bf16.mxu0 %v4952_v9 }
0x1308   : > { %4218 = vmatpush3.bf16.msra.mxu0 %v4464_v12 }
0x1309   : > { %4219 = vmatprep.subr.bf16.mxu0 %v4952_v9 }
0x130c   : > { %4220 = vmatpush3.bf16.msra.mxu0 %v4465_v2 }
0x130d   : > { %4221 = vmatprep.subr.bf16.mxu0 %v4952_v9 }
0x136e   : > { %v2507_v48 = vpop.xlane.xlu0 %2506 }
0x136f   : > { %4545 = vrcp.f32 %v2507_v48  ;;  %v3844_v48 = vld [vmem:[%s5409_s25 + $0xa] ss:$0 sm:$0xff] }
0x1376   : > { %v2630_v58 = vpop.xlane.xlu0 %2629 }
0x1377   : > { %4547 = vrcp.f32 %v2630_v58 }
0x1379   : > { %v4546_v49 = vpop.eup %4545 }
0x137a   : > { %v2509_v34 = vmul.f32 %v4546_v49, %v4542_v44  ;;  %v2513_v50 = vpop.permute.xlu0 %2512 }
0x137b   : > { %v2518_v51 = vsel %vm1665_vm4, %v2513_v50, 0 }
0x137c   : > { %4194 = vmatpush3.bf16.msra.mxu1 %v2518_v51  ;;  %v2510_v52 = vsel %vm5609_vm5, %v2509_v34, 0.0 }
0x137d   : > { %v2511_v61 = vpack.c.bf16 %v2510_v52, %v2510_v52  ;;  %4205 = vmatprep.subr.bf16.mxu1 %v4952_v9 }
0x137e   : > { %v2276_v19 = vpop.permute.xlu0 %2275 }
0x137f   : > { %2279 = vst.msk [vmem:[#allocation2] sm:$0xff] %vm2278_vm9, %v2276_v19  ;;  %4196 = vmatmul.mubr.msk.bf16.vlgmr.msra.gmra.mrb[48].mxu1 %vm1648_vm6, %v2511_v61 }
0x1380   : > { %4206 = vmatpush3.bf16.msra.mxu1 %v2641_v55  ;;  %4207 = vmatprep.mubr.msk.bf16.mxu1 %vm4953_vm2, %v4952_v9 }
0x1381   : > { %v4548_v43 = vpop.eup %4547 }
0x1382   : > { %v2632_v56 = vmul.f32 %v4548_v43, %v4544_v57 }
0x1384   : > { %v2633_v60 = vsel %vm5646_vm7, %v2632_v56, 0.0 }
0x1385   : > { %v2634_v62 = vpack.c.bf16 %v2633_v60, %v2633_v60 }
0x1387   : > { %4208 = vmatmul.mubr.msk.bf16.vlgmr.msra.gmra.mrb[52].mxu1 %vm1648_vm6, %v2634_v62 }
0x1388   : > { %3268 = vmatprep.mubr.bf16.mxu1 %v4951_v59  ;;  %v4466_v59 = vld [vmem:[%s5419_s21 + $0x28] sm:$0xff]   ;;  %s6094_s21 = sld [smem:[#allocation27_spill]] }
0x1389   : > { %4222 = vmatpush3.bf16.msra.mxu0 %v4466_v59 }
0x138a   : > { %4223 = vmatprep.subr.bf16.mxu0 %v4952_v9 }
0x138d   : > { %4224 = vmatpush3.bf16.msra.mxu0 %v4467_v3 }
0x138e   : > { %4225 = vmatprep.subr.bf16.mxu0 %v4952_v9  ;;  %s5849_s4 = smul.u32 6, %s6094_s21 }
0x1390   : > { %s2849_s26 = sadd.s32 1, %s5849_s4  ;;  %s2854_s20 = sadd.s32 3, %s5849_s4 }
0x1391   : > { %4226 = vmatpush3.bf16.msra.mxu0 %v4468_v4  ;;  %s2850_s1 = sld [smem:[#allocation15 + %s2849_s26]]  ;;  %s2844_s17 = sadd.s32 2, %s5849_s4 }
0x1392   : > { %s2855_s28 = sld [smem:[#allocation15 + %s2854_s20]]  ;;  %s3043_s3 = sadd.s32 4, %s5849_s4 }
0x1393   : > { %s2840_s18 = sld [smem:[#allocation15 + %s5849_s4]]  ;;  %s3048_s6 = sadd.s32 5, %s5849_s4 }
0x1394   : > { %s2845_s13 = sld [smem:[#allocation15 + %s2844_s17]] }
0x1395   : > { %s3044_s16 = sld [smem:[#allocation15 + %s3043_s3]] }
0x1397   : > { %v2851_v34 = vstv %s2850_s1 }
0x1398   : > { %v2856_v52 = vstv %s2855_s28 }
0x1399   : > { %v2841_v59 = vstv %s2840_s18 }
0x139a   : > { %v2846_v4 = vstv %s2845_s13 }
0x1452   : > { %v2554_v7 = vpop.f32.mrb[48].mxu1 }
0x1453   : > { %2561 = vrot.lane.b32.xlu0 %v2554_v7, %s4955_s24  ;;  %v4197_v8 = vpop.f32.mrb[49].mxu1  ;;  %v2875_v7 = vadd.s32 8, %v5502_v35 }
0x1454   : > { %v2557_v10 = vpop.f32.mrb[50].mxu1  ;;  %v2880_v8 = vand.u32 7, %v5502_v35  ;;  %v3922_v35 = vld [vmem:[%s5409_s25 + $0x10] ss:$0 sm:$0xff] }
0x1455   : > { %v4198_v11 = vpop.f32.mrb[51].mxu1 }
0x145a   : > { %v2677_v38 = vpop.f32.mrb[52].mxu1 }
0x145b   : > { %2684 = vrot.lane.b32.xlu1 %v2677_v38, %s4955_s24  ;;  %v4209_v39 = vpop.f32.mrb[53].mxu1 }
0x145c   : > { %v2680_v13 = vpop.f32.mrb[54].mxu1  ;;  %v2887_v39 = vand.u32 7, %v2875_v7 }
0x145d   : > { %v4210_v14 = vpop.f32.mrb[55].mxu1 }
0x145e   : > { %v2912_v14 = vadd.s32 4294967294, %v2880_v8 }
0x1460   : > { %vm2914_vm13 = vcmp.ge.s32.totalorder %v2912_v14, 0  ;;  %v3854_v14 = vld [vmem:[%s5409_s25 + $0xd] ss:$0 sm:$0xff] }
0x14c5   : > { %v2562_v15 = vpop.permute.xlu0 %2561 }
0x14c6   : > { %2565 = vst.msk [vmem:[#allocation2] sm:$0xff] %vm2564_vm10, %v2562_v15  ;;  %v2940_v15 = vadd.s32 4294967295, %v2880_v8 }
0x14c8   : > { %vm2942_vm14 = vcmp.ge.s32.totalorder %v2940_v15, 0 }
0x14cd   : > { %v2685_v16 = vpop.permute.xlu1 %2684  ;;  %v2688_v9 = vld [vmem:[#allocation2] sm:$0xff] }
0x14ce   : > { %2687 = vst.msk [vmem:[#allocation2 + $0x8] sm:$0xff] %vm2564_vm10, %v2685_v16 }
0x14d5   : > { %v2689_v17 = vld [vmem:[#allocation2 + $0x8] sm:$0xff] }
0x14d6   : > { %v2690_v22 = vpack.c.bf16 %v2689_v17, %v2688_v9  ;;  %v2977_v17 = vadd.s32 1, %v2880_v8 }
0x14d8   : > { %4228 = vmatmul.mubr.bf16.vlgmr.msra.gmra.mrb[40].mxu0 %v2690_v22  ;;  %vm2981_vm3 = vcmp.lt.s32.totalorder %v2977_v17, 8 }
0x15ab   : > { %v2794_v24 = vpop.f32.mrb[40].mxu0 }
0x15ac   : > { %v2795_v25 = vadd.f32 %v3834_v23, %v2794_v24  ;;  %v4229_v26 = vpop.f32.mrb[41].mxu0  ;;  %v2913_v24 = vadd.s32 4294967294, %v2887_v39 }
0x15ad   : > { %v2797_v27 = vpop.f32.mrb[42].mxu0  ;;  %v2941_v26 = vadd.s32 4294967295, %v2887_v39 }
0x15ae   : > { %v5839_v18 = vadd.f32 %v2795_v25, %v5513_v5  ;;  %v2798_v28 = vadd.f32 %v3834_v23, %v2797_v27  ;;  %v4230_v29 = vpop.f32.mrb[43].mxu0  ;;  %v3005_v23 = vadd.s32 2, %v2880_v8  ;;  %vm2915_vm1 = vcmp.ge.s32.totalorder %v2913_v24, 0 }
0x15af   : > { %vm2943_vm2 = vcmp.ge.s32.totalorder %v2941_v26, 0  ;;  %v3045_v24 = vstv %s3044_s16 }
0x15b0   : > { %v5842_v30 = vadd.f32 %v2798_v28, %v5517_v6  ;;  %2805 = vadd.xlane.f32.xlu0 %v5839_v18  ;;  %vm3009_vm4 = vcmp.lt.s32.totalorder %v3005_v23, 8 }
0x15b2   : > { %2807 = vadd.xlane.f32.xlu1 %v5842_v30 }
0x163d   : > { %v2806_v20 = vpop.xlane.xlu0 %2805 }
0x163e   : > { %v2809_v31 = vmul.f32 0.0078125, %v2806_v20 }
0x163f   : > { %v2808_v54 = vpop.xlane.xlu1 %2807 }
0x1640   : > { %v2811_v32 = vsub.f32 %v5839_v18, %v2809_v31  ;;  %v2810_v33 = vmul.f32 0.0078125, %v2808_v54  ;;  %v3848_v31 = vld [vmem:[%s5438_s22] ss:$0 sm:$0xff] }
0x1642   : > { %v2812_v37 = vsub.f32 %v5842_v30, %v2810_v33  ;;  %v2813_v5 = vmul.f32 %v2811_v32, %v2811_v32  ;;  %v3847_v33 = vld [vmem:[%s5409_s25 + $0xb] ss:$0 sm:$0xff] }
0x1644   : > { %2815 = vadd.xlane.f32.xlu0 %v2813_v5  ;;  %v2814_v41 = vmul.f32 %v2812_v37, %v2812_v37 }
0x1648   : > { %2817 = vadd.xlane.f32.xlu0 %v2814_v41 }
0x16d1   : > { %v2816_v6 = vpop.xlane.xlu0 %2815 }
0x16d2   : > { %v2819_v42 = vmul.f32 0.0078125, %v2816_v6 }
0x16d4   : > { %v2821_v44 = vadd.f32 1e-05, %v2819_v42  ;;  %v3849_v42 = vld [vmem:[%s5438_s22 + $0x1] ss:$0 sm:$0xff] }
0x16d5   : > { %v2818_v21 = vpop.xlane.xlu0 %2817 }
0x16d6   : > { %4549 = vrsqrt.f32 %v2821_v44  ;;  %v2820_v45 = vmul.f32 0.0078125, %v2818_v21 }
0x16d8   : > { %v2822_v53 = vadd.f32 1e-05, %v2820_v45 }
0x16da   : > { %4551 = vrsqrt.f32 %v2822_v53 }
0x16e0   : > { %v4550_v57 = vpop.eup %4549 }
0x16e1   : > { %v2825_v47 = vmul.f32 %v4550_v57, %v2811_v32  ;;  %v2978_v32 = vadd.s32 1, %v2887_v39  ;;  %v3006_v57 = vadd.s32 2, %v2887_v39 }
0x16e3   : > { %v2831_v58 = vmul.f32 %v3843_v46, %v2825_v47  ;;  %vm2982_vm5 = vcmp.lt.s32.totalorder %v2978_v32, 8  ;;  %vm3010_vm6 = vcmp.lt.s32.totalorder %v3006_v57, 8 }
0x16e4   : > { %v4552_v49 = vpop.eup %4551 }
0x16e5   : > { %v2837_v50 = vadd.f32 %v3844_v48, %v2831_v58  ;;  %v2826_v51 = vmul.f32 %v4552_v49, %v2812_v37 }
0x16e7   : > { %v2852_v61 = vmul.f32 %v2851_v34, %v2837_v50  ;;  %v2832_v19 = vmul.f32 %v3843_v46, %v2826_v51  ;;  %v2842_v3 = vmul.f32 %v2841_v59, %v2837_v50  ;;  %v3850_v46 = vld [vmem:[%s5438_s22 + $0x2] ss:$0 sm:$0xff] }
0x16e9   : > { %v2857_v55 = vadd.f32 %v2856_v52, %v2852_v61  ;;  %v2838_v43 = vadd.f32 %v3844_v48, %v2832_v19  ;;  %v2847_v38 = vadd.f32 %v2846_v4, %v2842_v3 }
0x16eb   : > { %v3845_v56 = vmul.f32 -1.442695, %v2857_v55  ;;  %v2853_v60 = vmul.f32 %v2851_v34, %v2838_v43  ;;  %v2843_v10 = vmul.f32 %v2841_v59, %v2838_v43 }
0x16ed   : > { %4553 = vpow2.f32 %v3845_v56  ;;  %v2858_v62 = vadd.f32 %v2856_v52, %v2853_v60  ;;  %v2848_v16 = vadd.f32 %v2846_v4, %v2843_v10  ;;  %v3851_v52 = vld [vmem:[%s5438_s22 + $0x3] ss:$0 sm:$0xff]  ;;  %v3852_v60 = vld [vmem:[%s5438_s22 + $0x4] ss:$0 sm:$0xff]  ;;  %s3049_s22 = sld [smem:[#allocation15 + %s3048_s6]] }
0x16ef   : > { %v3846_v63 = vmul.f32 -1.442695, %v2858_v62 }
0x16f1   : > { %4555 = vpow2.f32 %v3846_v63 }
0x16f3   : > { %v3050_v26 = vstv %s3049_s22 }
0x16f7   : > { %v4554_v0 = vpop.eup %4553 }
0x16f8   : > { %v2865_v1 = vadd.f32 1.0, %v4554_v0 }
0x16fa   : > { %4557 = vrcp.f32 %v2865_v1 }
0x16fb   : > { %v4556_v12 = vpop.eup %4555 }
0x16fc   : > { %v2866_v2 = vadd.f32 1.0, %v4556_v12 }
0x16fe   : > { %4559 = vrcp.f32 %v2866_v2 }
0x1704   : > { %v4558_v11 = vpop.eup %4557 }
0x1705   : > { %v2871_v13 = vmul.f32 %v4558_v11, %v2847_v38  ;;  %v3853_v11 = vld [vmem:[%s5409_s25 + $0xc] ss:$0 sm:$0xff] }
0x1707   : > { %v2907_v25 = vrot.slane %v2871_v13, 6  ;;  %v2935_v28 = vrot.slane %v2871_v13, 7  ;;  %v2972_v41 = vrot.slane %v2871_v13, 1  ;;  %v3000_v21 = vrot.slane %v2871_v13, 2 }
0x1708   : > { %v4560_v9 = vpop.eup %4559  ;;  %v2967_v56 = vmul.f32 %v3850_v46, %v2871_v13 }
0x1709   : > { %v2872_v22 = vmul.f32 %v4560_v9, %v2848_v16 }
0x170b   : > { %v2908_v27 = vrot.slane %v2872_v22, 6  ;;  %v2936_v29 = vrot.slane %v2872_v22, 7  ;;  %v2973_v20 = vrot.slane %v2872_v22, 1  ;;  %v3001_v54 = vrot.slane %v2872_v22, 2 }
0x170c   : > { %v2968_v4 = vmul.f32 %v3850_v46, %v2872_v22 }
0x170d   : > { %v2911_v37 = vsel %vm2909_vm11, %v2908_v27, %v2907_v25  ;;  %v2939_v5 = vsel %vm2937_vm12, %v2936_v29, %v2935_v28  ;;  %v2975_v53 = vsel %vm2974_vm15, %v2972_v41, %v2973_v20  ;;  %v3003_v47 = vsel %vm3002_vm0, %v3000_v21, %v3001_v54 }
0x170e   : > { %v2924_v6 = vsel %vm2914_vm13, %v2911_v37, 0.0  ;;  %v2952_v44 = vsel %vm2942_vm14, %v2939_v5, 0.0  ;;  %v2910_v48 = vsel %vm2909_vm11, %v2907_v25, %v2908_v27  ;;  %v2938_v58 = vsel %vm2937_vm12, %v2935_v28, %v2936_v29  ;;  %v4469_v37 = vld [vmem:[%s5421_s7 + $0x80] ss:$8 sps:$4 sm:$0xff]   ;;  %v4471_v5 = vld [vmem:[%s5421_s7 + $0x84] ss:$8 sps:$4 sm:$0xff]  }
0x170f   : > { %v2930_v45 = vmul.f32 %v3848_v31, %v2924_v6  ;;  %v2958_v34 = vmul.f32 %v3849_v42, %v2952_v44  ;;  %v2925_v50 = vsel %vm2915_vm1, %v2910_v48, 0.0  ;;  %v2953_v51 = vsel %vm2943_vm2, %v2938_v58, 0.0  ;;  %3236 = vmatprep.subr.bf16.mxu1 %v4471_v5  ;;  %v4472_v6 = vld [vmem:[%s5421_s7 + $0x90] ss:$8 sps:$4 sm:$0xff]   ;;  %v4480_v48 = vld [vmem:[%s5421_s7 + $0xb4] ss:$8 sps:$4 sm:$0xff]  }
0x1710   : > { %v2989_v61 = vsel %vm2981_vm3, %v2975_v53, 0.0  ;;  %v2931_v19 = vmul.f32 %v3848_v31, %v2925_v50  ;;  %v2976_v55 = vsel %vm2974_vm15, %v2973_v20, %v2972_v41  ;;  %v3017_v62 = vsel %vm3009_vm4, %v3003_v47, 0.0  ;;  %v4474_v41 = vld [vmem:[%s5421_s7 + $0x94] ss:$8 sps:$4 sm:$0xff]   ;;  %3237 = vmatpush1.bf16.msra.mxu1 %v4469_v37  ;;  %v4478_v58 = vld [vmem:[%s5421_s7 + $0xb0] ss:$8 sps:$4 sm:$0xff]  }
0x1711   : > { %v2932_v49 = vadd.f32 %v3847_v33, %v2930_v45  ;;  %v2959_v0 = vmul.f32 %v3849_v42, %v2953_v51  ;;  %v3004_v1 = vsel %vm3002_vm0, %v3001_v54, %v3000_v21  ;;  %v2995_v2 = vmul.f32 %v3851_v52, %v2989_v61  ;;  %3238 = vmatprep.subr.bf16.mxu1 %v4474_v41  ;;  %v4477_v42 = vld [vmem:[%s5421_s7 + $0xa4] ss:$8 sps:$4 sm:$0xff]   ;;  %v4486_v50 = vld [vmem:[%s5421_s7 + $0xd4] ss:$8 sps:$4 sm:$0xff]   ;;  %v4484_v51 = vld [vmem:[%s5421_s7 + $0xd0] ss:$8 sps:$4 sm:$0xff]  }
0x1712   : > { %v2933_v63 = vadd.f32 %v3847_v33, %v2931_v19  ;;  %v2990_v59 = vsel %vm2982_vm5, %v2976_v55, 0.0  ;;  %v3023_v8 = vmul.f32 %v3852_v60, %v3017_v62  ;;  %v3018_v10 = vsel %vm3010_vm6, %v3004_v1, 0.0  ;;  %v4487_v61 = vld [vmem:[%s5421_s7 + $0xe0] ss:$8 sps:$4 sm:$0xff]   ;;  %v4492_v19 = vld [vmem:[%s5421_s7 + $0xf4] ss:$8 sps:$4 sm:$0xff]  }
0x1713   : > { %v2960_v43 = vadd.f32 %v2958_v34, %v2932_v49  ;;  %v2996_v39 = vmul.f32 %v3851_v52, %v2990_v59  ;;  %v3024_v16 = vmul.f32 %v3852_v60, %v3018_v10  ;;  %v4483_v49 = vld [vmem:[%s5421_s7 + $0xc4] ss:$8 sps:$4 sm:$0xff]   ;;  %v4481_v34 = vld [vmem:[%s5421_s7 + $0xc0] ss:$8 sps:$4 sm:$0xff]   ;;  %v4490_v55 = vld [vmem:[%s5421_s7 + $0xf0] ss:$8 sps:$4 sm:$0xff]  }
0x1714   : > { %v2961_v3 = vadd.f32 %v2959_v0, %v2933_v63  ;;  %3239 = vmatpush1.bf16.msra.mxu1 %v4472_v6  ;;  %v4489_v52 = vld [vmem:[%s5421_s7 + $0xe4] ss:$8 sps:$4 sm:$0xff]   ;;  %v4497_v63 = vld [vmem:[%s5423_s5 + $0xd0] sm:$0xff]   ;;  %v4499_v1 = vld [vmem:[%s5423_s5 + $0xd8] sm:$0xff]  }
0x1715   : > { %v2969_v12 = vadd.f32 %v2967_v56, %v2960_v43  ;;  %3240 = vmatprep.subr.bf16.mxu1 %v4477_v42  ;;  %v4493_v43 = vld [vmem:[%s5423_s5 + $0xc0] sm:$0xff]   ;;  %v4495_v60 = vld [vmem:[%s5423_s5 + $0xc8] sm:$0xff]   ;;  %v4498_v0 = vld [vmem:[%s5423_s5 + $0x90] sm:$0xff]  }
0x1716   : > { %v2970_v38 = vadd.f32 %v2968_v4, %v2961_v3  ;;  %v4494_v56 = vld [vmem:[%s5423_s5 + $0x80] sm:$0xff]   ;;  %4035 = vmatprep.subr.bf16.mxu0 %v4493_v43  ;;  %v4496_v62 = vld [vmem:[%s5423_s5 + $0x88] sm:$0xff]  }
0x1717   : > { %v2997_v7 = vadd.f32 %v2995_v2, %v2969_v12  ;;  %4036 = vmatpush3.bf16.msra.mxu0 %v4494_v56  ;;  %v4500_v12 = vld [vmem:[%s5423_s5 + $0x98] sm:$0xff]   ;;  %v4501_v2 = vld [vmem:[%s5423_s5 + $0xe0] sm:$0xff]   ;;  %v4503_v3 = vld [vmem:[%s5423_s5 + $0xe8] sm:$0xff]  }
0x1718   : > { %v2998_v15 = vadd.f32 %v2996_v39, %v2970_v38  ;;  %4037 = vmatprep.subr.bf16.mxu0 %v4495_v60  ;;  %v4502_v59 = vld [vmem:[%s5423_s5 + $0xa0] sm:$0xff]  }
0x1719   : > { %v3025_v13 = vadd.f32 %v3023_v8, %v2997_v7 }
0x171a   : > { %v3026_v17 = vadd.f32 %v3024_v16, %v2998_v15  ;;  %v3905_v16 = vld [vmem:[%s5409_s25 + $0xf] ss:$0 sm:$0xff] }
0x171b   : > { %v3032_v9 = vmul.f32 %v3853_v11, %v3025_v13  ;;  %4038 = vmatpush3.bf16.msra.mxu0 %v4496_v62  ;;  %v3904_v13 = vld [vmem:[%s5409_s25 + $0xe] ss:$0 sm:$0xff] }
0x171c   : > { %v3033_v25 = vmul.f32 %v3853_v11, %v3026_v17  ;;  %4039 = vmatprep.subr.bf16.mxu0 %v4497_v63 }
0x171d   : > { %v3039_v23 = vadd.f32 %v3854_v14, %v3032_v9 }
0x171e   : > { %v3040_v27 = vadd.f32 %v3854_v14, %v3033_v25 }
0x171f   : > { %v3041_v22 = vmax.f32 %v3039_v23, 0.0  ;;  %4040 = vmatpush3.bf16.msra.mxu0 %v4498_v0 }
0x1720   : > { %v3042_v29 = vmax.f32 %v3040_v27, 0.0  ;;  %4041 = vmatprep.subr.bf16.mxu0 %v4499_v1  ;;  %v4505_v27 = vld [vmem:[%s5423_s5 + $0xf0] sm:$0xff]  }
0x1721   : > { %v3046_v28 = vmul.f32 %v3045_v24, %v3041_v22 }
0x1722   : > { %v3047_v31 = vmul.f32 %v3045_v24, %v3042_v29  ;;  %v4507_v29 = vld [vmem:[%s5423_s5 + $0xf8] sm:$0xff]  }
0x1723   : > { %v3051_v20 = vadd.f32 %v3050_v26, %v3046_v28  ;;  %4042 = vmatpush3.bf16.msra.mxu0 %v4500_v12  ;;  %v4506_v28 = vld [vmem:[%s5423_s5 + $0xb0] sm:$0xff]  }
0x1724   : > { %v3052_v32 = vadd.f32 %v3050_v26, %v3047_v31  ;;  %4043 = vmatprep.subr.bf16.mxu0 %v4501_v2  ;;  %v4504_v26 = vld [vmem:[%s5423_s5 + $0xa8] sm:$0xff]   ;;  %v3871_v31 = vld [vmem:[%s5415_s15 + $0x1] ss:$2 sm:$0x3]  ;;  %s4958_s15 = smov [#allocation18]  }
0x1725   : > { %v5894_v54 = vadd.f32 %v3051_v20, %v5839_v18  ;;  %v4475_v18 = vld [vmem:[%s5421_s7 + $0xa0] ss:$8 sps:$4 sm:$0xff]   ;;  %v4508_v20 = vld [vmem:[%s5423_s5 + $0xb8] sm:$0xff]   ;;  %v3153_v37 = vrot.slane %v3871_v31, %v943_v40  ;;  %s3477_s7 = sshll.u32 %s4958_s15, 4  ;;  %s3478_s7 = int_to_ptr.vmem [resolvable:$true] %s3477_s7 }
0x1726   : > { %v5898_v33 = vadd.f32 %v3052_v32, %v5842_v30  ;;  %3241 = vmatpush1.bf16.msra.mxu1 %v4475_v18  ;;  %v3149_v32 = vrot.slane %v3871_v31, %v939_v36  ;;  %s4835_s5 = scalar_lea.vmem %s3478_s7, 256  ;;  %p4842_p5 = scmp.lt.s32.totalorder %s3478_s7, %s3478_s7 }
0x1727   : > { %3110 = vadd.xlane.f32.xlu0 %v5894_v54  ;;  %3242 = vmatprep.subr.bf16.mxu1 %v4480_v48  ;;  %p4836_p0 = scmp.ne.s32.totalorder %s3478_s7, %s4835_s5  ;;  %p4843_p7 = scmp.lt.s32.totalorder %s4835_s5, %s4835_s5 }
0x1728   : > { %3112 = vadd.xlane.f32.xlu1 %v5898_v33  ;;  %4044 = vmatpush3.bf16.msra.mxu0 %v4502_v59 }
0x1729   : > { %4045 = vmatprep.subr.bf16.mxu0 %v4503_v3  ;;  %p4837_p2 = pnand %p4836_p0, %p4310_p9  ;;  %p4844_p1 = por %p4843_p7, %p4842_p5 }
0x172a   : > { %3243 = vmatpush1.bf16.msra.mxu1 %v4478_v58 }
0x172b   : > { %3244 = vmatprep.subr.bf16.mxu1 %v4483_v49  ;;  %p4838_p12 = pneg %p4837_p2 }
0x172c   : > { %4046 = vmatpush3.bf16.msra.mxu0 %v4504_v26 }
0x172d   : > { %4047 = vmatprep.subr.bf16.mxu0 %v4505_v27  ;;  %p4845_p10 = pnand %p4844_p1, %p4838_p12 }
0x172e   : > { %3245 = vmatpush1.bf16.msra.mxu1 %v4481_v34 }
0x172f   : > { %3246 = vmatprep.subr.bf16.mxu1 %v4486_v50 }
0x1730   : > { %4048 = vmatpush3.bf16.msra.mxu0 %v4506_v28 }
0x1731   : > { %4049 = vmatprep.subr.bf16.mxu0 %v4507_v29 }
0x1732   : > { %3247 = vmatpush1.bf16.msra.mxu1 %v4484_v51 }
0x1733   : > { %3248 = vmatprep.subr.bf16.mxu1 %v4489_v52 }
0x1734   : > { %4050 = vmatpush3.bf16.msra.mxu0 %v4508_v20 }
0x1736   : > { %3249 = vmatpush1.bf16.msra.mxu1 %v4487_v61 }
0x1737   : > { %3250 = vmatprep.subr.bf16.mxu1 %v4492_v19 }
0x173a   : > { %3251 = vmatpush1.bf16.msra.mxu1 %v4490_v55 }
0x17b4   : > { %v3111_v30 = vpop.xlane.xlu0 %3110 }
0x17b5   : > { %v3114_v44 = vmul.f32 0.0078125, %v3111_v30  ;;  %v3113_v45 = vpop.xlane.xlu1 %3112 }
0x17b6   : > { %v3115_v53 = vmul.f32 0.0078125, %v3113_v45 }
0x17b7   : > { %v3116_v21 = vsub.f32 %v5894_v54, %v3114_v44 }
0x17b8   : > { %v3117_v46 = vsub.f32 %v5898_v33, %v3115_v53 }
0x17b9   : > { %v3118_v57 = vmul.f32 %v3116_v21, %v3116_v21 }
0x17ba   : > { %v3119_v47 = vmul.f32 %v3117_v46, %v3117_v46 }
0x17bb   : > { %3120 = vadd.xlane.f32.xlu0 %v3118_v57 }
0x17bc   : > { %3122 = vadd.xlane.f32.xlu1 %v3119_v47 }
0x1848   : > { %v3121_v4 = vpop.xlane.xlu0 %3120 }
0x1849   : > { %v3124_v7 = vmul.f32 0.0078125, %v3121_v4  ;;  %v3123_v10 = vpop.xlane.xlu1 %3122 }
0x184a   : > { %v3125_v11 = vmul.f32 0.0078125, %v3123_v10  ;;  %v3939_v10 = vld [vmem:[%s5409_s25 + $0x11] ss:$0 sm:$0xff] }
0x184b   : > { %v3126_v8 = vadd.f32 1e-05, %v3124_v7 }
0x184c   : > { %v3127_v38 = vadd.f32 1e-05, %v3125_v11 }
0x184d   : > { %4561 = vrsqrt.f32 %v3126_v8 }
0x184e   : > { %4563 = vrsqrt.f32 %v3127_v38 }
0x1857   : > { %v4562_v39 = vpop.eup %4561 }
0x1858   : > { %v3130_v14 = vmul.f32 %v4562_v39, %v3116_v21  ;;  %v4564_v15 = vpop.eup %4563  ;;  %v3940_v39 = vld [vmem:[%s5409_s25 + $0x12] ss:$0 sm:$0xff] }
0x1859   : > { %v3131_v17 = vmul.f32 %v4564_v15, %v3117_v46 }
0x185a   : > { %v3136_v9 = vmul.f32 %v3904_v13, %v3130_v14 }
0x185b   : > { %v3137_v23 = vmul.f32 %v3904_v13, %v3131_v17 }
0x185c   : > { %v3142_v24 = vadd.f32 %v3905_v16, %v3136_v9 }
0x185d   : > { %v3143_v25 = vadd.f32 %v3905_v16, %v3137_v23 }
0x185f   : > { %v3144_v22 = vpack.c.bf16 %v3143_v25, %v3142_v24 }
0x1861   : > { %3269 = vmatmul.mubr.bf16.vlgmr.msra.gmra.mrb[56].mxu1 %v3144_v22 }
0x1934   : > { %v3270_v5 = vpop.f32.mrb[56].mxu1 }
0x1935   : > { %v3271_v41 = vadd.f32 %v3270_v5, %v3149_v32  ;;  %v3272_v6 = vpop.f32.mrb[57].mxu1 }
0x1936   : > { %v3273_v42 = vadd.f32 %v3272_v6, %v3153_v37  ;;  %v3274_v18 = vpop.f32.mrb[58].mxu1 }
0x1937   : > { %v3275_v30 = vadd.f32 %v3274_v18, %v3149_v32  ;;  %v3276_v44 = vpop.f32.mrb[59].mxu1  ;;  %v3279_v45 = vmax.f32 %v3271_v41, 0.0 }
0x1938   : > { %v3277_v21 = vadd.f32 %v3276_v44, %v3153_v37  ;;  %v3280_v57 = vmax.f32 %v3273_v42, 0.0 }
0x1939   : > { %v3281_v53 = vmax.f32 %v3275_v30, 0.0 }
0x193a   : > { %v3282_v46 = vmax.f32 %v3277_v21, 0.0 }
0x193b   : > { %v3283_v47 = vpack.c.bf16 %v3281_v53, %v3279_v45 }
0x193c   : > { %v3284_v48 = vpack.c.bf16 %v3282_v46, %v3280_v57 }
0x193e   : > { %3417 = vmatprep.mubr.bf16.mxu0 %v3284_v48 }
0x193f   : > { %3418 = vmatmul.mubr.bf16.vlgmr.msra.gmra.mrb[44].mxu0 %v3283_v47 }
0x1a12   : > { %v4051_v36 = vpop.f32.mrb[44].mxu0 }
0x1a13   : > { %v4052_v40 = vpop.f32.mrb[45].mxu0 }
0x1a14   : > { %v4053_v58 = vadd.f32 %v4052_v40, %v4051_v36  ;;  %v4054_v49 = vpop.f32.mrb[46].mxu0 }
0x1a15   : > { %v4055_v34 = vpop.f32.mrb[47].mxu0 }
0x1a16   : > { %v3420_v50 = vadd.f32 %v4053_v58, %v3922_v35  ;;  %v4056_v51 = vadd.f32 %v4055_v34, %v4054_v49 }
0x1a18   : > { %v3426_v52 = vmul.f32 0.5, %v3420_v50  ;;  %v3423_v61 = vadd.f32 %v4056_v51, %v3922_v35 }
0x1a1a   : > { %v3427_v19 = vmul.f32 0.5, %v3423_v61  ;;  %v3428_v55 = vadd.f32 %v3426_v52, %v5894_v54 }
0x1a1c   : > { %3432 = vadd.xlane.f32.xlu0 %v3428_v55  ;;  %v3429_v43 = vadd.f32 %v3427_v19, %v5898_v33 }
0x1a1e   : > { %3434 = vadd.xlane.f32.xlu1 %v3429_v43 }
0x1aa9   : > { %v3433_v56 = vpop.xlane.xlu0 %3432 }
0x1aaa   : > { %v3436_v60 = vmul.f32 0.0078125, %v3433_v56 }
0x1aab   : > { %v3435_v62 = vpop.xlane.xlu1 %3434 }
0x1aac   : > { %v3438_v63 = vsub.f32 %v3428_v55, %v3436_v60  ;;  %v3437_v0 = vmul.f32 0.0078125, %v3435_v62 }
0x1aae   : > { %v3439_v1 = vsub.f32 %v3429_v43, %v3437_v0  ;;  %v3440_v12 = vmul.f32 %v3438_v63, %v3438_v63 }
0x1ab0   : > { %3442 = vadd.xlane.f32.xlu0 %v3440_v12  ;;  %v3441_v2 = vmul.f32 %v3439_v1, %v3439_v1 }
0x1ab2   : > { %3444 = vadd.xlane.f32.xlu1 %v3441_v2 }
0x1b3d   : > { %v3443_v59 = vpop.xlane.xlu0 %3442 }
0x1b3e   : > { %v3446_v3 = vmul.f32 0.0078125, %v3443_v59 }
0x1b3f   : > { %v3445_v4 = vpop.xlane.xlu1 %3444 }
0x1b40   : > { %v3448_v54 = vadd.f32 1e-05, %v3446_v3  ;;  %v3447_v7 = vmul.f32 0.0078125, %v3445_v4 }
0x1b42   : > { %4565 = vrsqrt.f32 %v3448_v54  ;;  %v3449_v33 = vadd.f32 1e-05, %v3447_v7 }
0x1b44   : > { %4567 = vrsqrt.f32 %v3449_v33 }
0x1b4c   : > { %v4566_v8 = vpop.eup %4565 }
0x1b4d   : > { %v3452_v11 = vmul.f32 %v4566_v8, %v3438_v63 }
0x1b4e   : > { %v4568_v38 = vpop.eup %4567 }
0x1b4f   : > { %v3453_v13 = vmul.f32 %v4568_v38, %v3439_v1  ;;  %v3458_v14 = vmul.f32 %v3939_v10, %v3452_v11 }
0x1b51   : > { %v3459_v15 = vmul.f32 %v3939_v10, %v3453_v13  ;;  %v3464_v16 = vadd.f32 %v3940_v39, %v3458_v14 }
0x1b53   : > { %v3465_v9 = vadd.f32 %v3940_v39, %v3459_v15  ;;  %3466 = vst [vmem:[#allocation18] sm:$0xff] %v3464_v16 }
0x1b55   : > { %3467 = vst [vmem:[#allocation18 + $0x8] sm:$0xff] %v3465_v9 }
0x1b56   : > { %4848 = shalt.err (!%p4845_p10)
}
0x1b57   : > { %s6095_s23 = sld [smem:[#allocation39_spill]] }
0x1b5d   : > { %s4849_s19 = scalar_lea.hbm %s6095_s23, 256 }
0x1b5e   : > { %p4850_p3 = scmp.ne.s32.totalorder %s6095_s23, %s4849_s19  ;;  %p4855_p8 = scmp.lt.u32.totalorder %s4849_s19, %s6095_s23 }
0x1b60   : > { %p4851_p11 = pnand %p4850_p3, %p4310_p9 }
0x1b62   : > { %p4852_p6 = pneg %p4851_p11 }
0x1b64   : > { %p4857_p13 = pnand %p4855_p8, %p4852_p6 }
0x1b66   : > { %4860 = shalt.err (!%p4857_p13)
}
0x1b67   : > { %s4959_s20 = smov 128   ;;  %s4960_s1 = smov 8  }
0x1b68   : > { %4266 = dma.vmem_to_hbm [thread:$0]  (%p4310_p9), %s3478_s7, 256, %s6095_s23, [#allocation5], %s4959_s20, %s4959_s20, %s4960_s1  }
0x1b69   : > { %4906 = dma.done.wait (%p4310_p9), [#allocation5], 256  }
0x1b6a   : > { %4908 = vsyncadd (%p4310_p9), [#allocation5], 4294967040 }
0x1b6b PF: > { %s28_s30 = sadd.s32 1, %s4931_s30   ;;  %s6096_s25 = sld [smem:[#allocation25_spill]] }
0x1b6c   : > { %p25_p4 = scmp.ge.s32.totalorder %s28_s30, 4   ;;  %s6097_s26 = sld [smem:[#allocation26_spill]] }
0x1b6d   : > { %s6098_s27 = sld [smem:[#allocation30_spill]]  ;;  %s6099_s17 = sld [smem:[#allocation29_spill]] }
0x1b6e   : > { %s6100_s28 = smov %s4927_s29  ;;  %27 = sbr.rel (!%p25_p4) target bundleno = 17 (0x11), region = 194 }
0x1b73   : > { %s6101_s29 = smov %s6099_s17 }
0x1b75   :  { %3493 = vsyncpa [#allocation4], 1 }
0x1b76   :  { %3495 = vsyncpa [#allocation4 + $0x1], 1 }
0x1b77   :  { %3496 = vsyncpa [#allocation8], 1 }
0x1b78   :  { %3497 = vsyncpa [#allocation5], 1 }
0x1b79   :  { %3499 = vsyncpa [#allocation5 + $0x1], 1 }
0x1b7a   :  { %3500 = vsyncpa [#allocation6], 1 }
0x1b7b   :  { %3502 = vsyncpa [#allocation6 + $0x1], 1 }
0x1b7c   :  { %3503 = vsyncpa [#allocation17], 1 }

</bundles_post_ra>
